<compile_context>
chip_gen: v5e
topology: v5e:2x2
jax: 0.10.0
libtpu: 0.0.40
codegen_flags: <defaults>
</compile_context>

<pallas_src>
import functools
import math

import jax
import jax.numpy as jnp
import numpy as np
from jax.experimental import pallas as pl
from jax.experimental.pallas import tpu as pltpu


def _silu(v):
    # sigmoid via EUP exp + approx reciprocal (keeps the divide off the VALU).
    return v * pl.reciprocal(1.0 + jnp.exp(-v), approx=True)


def _dwconv_kernel(xm_ref, xh_ref, wd_ref, bd_ref, wp_ref, bp_ref, o_ref, xb_ref,
                   *, ksize, tile_h, pad, out_w):
    # xm_ref: (1, tile_h, Wp, C_in)  padded-input rows [i*tile_h, (i+1)*tile_h)
    # xh_ref: (1, 2p,    Wp, C_in)   the 2p halo rows just below the main block
    # xb_ref: (4p, Wp, C_in) scratch boundary window (last 2p main rows + halo)
    c_in = xm_ref.shape[-1]
    k2p = 2 * pad
    main_h = tile_h - k2p

    # Only this small 4*pad-row window is copied; the bulk of the depthwise
    # taps read directly from the pipelined input block (no full-tile copy).
    xb_ref[pl.ds(0, k2p)] = xm_ref[0, pl.ds(main_h, k2p)]
    xb_ref[pl.ds(k2p, k2p)] = xh_ref[0]

    if xm_ref.dtype == jnp.float32:
        # Cast is a no-op for f32; slice the refs directly (cheap loads).
        def m_tap(dr, dc):
            return xm_ref[0, pl.ds(dr, main_h), pl.ds(dc, out_w), :]

        def b_tap(dr, dc):
            return xb_ref[pl.ds(dr, k2p), pl.ds(dc, out_w), :]
    else:
        # Hoist the widening cast out of the k*k tap loop for sub-32-bit input.
        xm32 = xm_ref[0].astype(jnp.float32)
        xb32 = xb_ref[...].astype(jnp.float32)

        def m_tap(dr, dc):
            return xm32[dr:dr + main_h, dc:dc + out_w, :]

        def b_tap(dr, dc):
            return xb32[dr:dr + k2p, dc:dc + out_w, :]

    # Depthwise kxk: statically unrolled shifted-slice multiply-adds (VPU work,
    # no channel contraction -> no MXU).  Output rows are split at main_h:
    #   rows [0, main_h)      -> taps read from the main input block,
    #   rows [main_h, tile_h) -> taps read from the small boundary scratch.
    acc_m = jnp.zeros((main_h, out_w, c_in), jnp.float32)
    acc_b = jnp.zeros((k2p, out_w, c_in), jnp.float32)
    for dr in range(ksize):
        for dc in range(ksize):
            w_tap = wd_ref[dr * ksize + dc].astype(jnp.float32)   # (1, C_in)
            acc_m = acc_m + m_tap(dr, dc).astype(jnp.float32) * w_tap
            acc_b = acc_b + b_tap(dr, dc).astype(jnp.float32) * w_tap

    z = jnp.concatenate([acc_m, acc_b], axis=0)          # (tile_h, W, C_in)
    z = z + bd_ref[...].astype(jnp.float32)              # folded BN bias (dconv)
    z = _silu(z)                                         # SiLU (EUP)

    # Pointwise 1x1 conv == GEMM over channels: bf16 MXU, f32 accumulation.
    a = z.reshape(tile_h * out_w, c_in).astype(wp_ref.dtype)
    y = jnp.dot(a, wp_ref[...], preferred_element_type=jnp.float32)
    y = y + bp_ref[...].astype(jnp.float32)               # folded BN bias (pconv)
    y = _silu(y)                                          # SiLU (EUP)
    # TODO(synk): for narrow-channel layers (C_out < 128) a lane-dense
    # (tile_h, W*C_out) output packing would give unmasked stores; kept the
    # free reshape here to stay layout-safe.
    o_ref[0] = y.reshape(tile_h, out_w, -1).astype(o_ref.dtype)


def _vmem_budget_and_limit():
    """Generation-aware VMEM sizing: ~1/2 of physical for tiling, ~3/4 as the
    compiler's scoped limit (64/96 MiB on v5e/v6e, 32/48 MiB on v7x)."""
    cap = 128 * 1024 * 1024
    try:
        info = pltpu.get_tpu_info()
        cap = int(getattr(info, "vmem_capacity_bytes", cap))
    except Exception:
        pass
    budget = cap // 2
    limit = int(min(cap * 3 // 4, 112 * 1024 * 1024))
    return budget, limit


def _pick_tile_h(H, W, c_in, c_out, ksize, itemsize, budget_bytes):
    """Largest H tile (multiple of 8 and of 2*pad, with a non-empty interior)
    whose per-step footprint fits the generation-aware VMEM budget."""
    p = (ksize - 1) // 2
    base = (8 * 2 * p) // math.gcd(8, 2 * p)
    while base <= 2 * p:                       # keep main_h = tile_h - 2p > 0
        base *= 2

    def footprint(th):
        wp_ = W + 2 * p
        b = 2 * th * wp_ * c_in * itemsize            # main input (dbl-buffered)
        b += 2 * 2 * p * wp_ * c_in * itemsize        # halo input (dbl-buffered)
        b += 4 * p * wp_ * c_in * itemsize            # boundary scratch
        b += 2 * th * W * c_out * itemsize            # output (dbl-buffered)
        b += th * W * (c_in + c_out) * 4              # f32 acc / GEMM result
        if itemsize < 4:
            b += (th + 4 * p) * wp_ * c_in * 4        # hoisted f32 window casts
        b += 2 * (ksize * ksize * c_in + c_in * c_out + c_in + c_out) * 4
        return b

    th = base
    while th < H and footprint(th * 2) <= budget_bytes:
        th *= 2
    return th


def dwconv_forward(x, params, *, ksize, stride=1, eps=1e-5):
    """Fused DWConv forward (inference): depthwise conv+BN+SiLU -> 1x1 conv+BN+SiLU.

    x: (N, C_in, H, W) NCHW (PyTorch layout). Returns NCHW (N, C_out, H, W).
    """
    if stride != 1:
        # TODO(synk): stride > 1 depthwise path not implemented (module default is 1).
        raise NotImplementedError("stride > 1 not supported by the Pallas path")
    assert ksize % 2 == 1 and ksize >= 3, "ksize must be odd and >= 3"

    N, C_in, H, W = x.shape
    wd_t = params["dconv_w"]                 # (C_in, 1, k, k)
    wp_t = params["pconv_w"]                 # (C_out, C_in, 1, 1)
    C_out = wp_t.shape[0]
    p = (ksize - 1) // 2

    # ---- Fold BN (inference) into conv weights / bias at trace time. ----
    sd = params["dconv_bn_gamma"] / jnp.sqrt(params["dconv_bn_var"] + eps)   # (C_in,)
    wd = wd_t[:, 0, :, :] * sd[:, None, None]                                # (C_in,k,k)
    wd = jnp.transpose(wd, (1, 2, 0)).reshape(ksize * ksize, 1, C_in)
    bd = (params["dconv_bn_beta"] - params["dconv_bn_mean"] * sd).reshape(1, C_in)

    sp = params["pconv_bn_gamma"] / jnp.sqrt(params["pconv_bn_var"] + eps)   # (C_out,)
    wp = jnp.transpose(wp_t[:, :, 0, 0] * sp[:, None])                       # (C_in,C_out)
    bp = (params["pconv_bn_beta"] - params["pconv_bn_mean"] * sp).reshape(1, C_out)

    wd = wd.astype(jnp.float32)
    bd = bd.astype(jnp.float32)
    bp = bp.astype(jnp.float32)
    wp = wp.astype(jnp.bfloat16)      # bf16 MXU GEMM (f32 accumulation in-kernel)

    # ---- Tiling: grid over (N, H-blocks); full W and C resident per tile. ----
    budget, vmem_limit = _vmem_budget_and_limit()
    tile_h = _pick_tile_h(H, W, C_in, C_out, ksize,
                          jnp.dtype(x.dtype).itemsize, budget)
    n_hblk = -(-H // tile_h)
    Ht = n_hblk * tile_h                 # padded output height
    Hp = Ht + 2 * p                      # padded input height (covers bottom halo)
    Wp = W + 2 * p
    halo_stride = tile_h // (2 * p)      # tile_h is a multiple of 2*p by construction

    # NHWC + zero padding for 'same' conv and H tiling.
    # TODO(synk): keep the surrounding graph NHWC end-to-end (and fold the W halo
    # into the kernel) to drop this transpose/pad pass and the output transpose;
    # kept explicit here for exact PyTorch NCHW parity.
    x_nhwc = jnp.transpose(x, (0, 2, 3, 1))
    x_pad = jnp.pad(x_nhwc, ((0, 0), (p, Hp - H - p), (p, p), (0, 0)))

    kernel = functools.partial(_dwconv_kernel, ksize=ksize, tile_h=tile_h,
                               pad=p, out_w=W)

    # TODO(synk): wd/bd/wp/bp have constant index maps; single-buffering them
    # (pipeline_mode) would shave a little VMEM on v7x — left default for safety.
    out_pad = pl.pallas_call(
        kernel,
        out_shape=jax.ShapeDtypeStruct((N, Ht, W, C_out), x.dtype),
        grid=(N, n_hblk),
        in_specs=[
            # main tile_h rows of the padded input
            pl.BlockSpec((1, tile_h, Wp, C_in), lambda n, i: (n, i, 0, 0)),
            # 2*pad halo rows just below the main block (same array, small blocks)
            pl.BlockSpec((1, 2 * p, Wp, C_in),
                         lambda n, i: (n, (i + 1) * halo_stride, 0, 0)),
            pl.BlockSpec((ksize * ksize, 1, C_in), lambda n, i: (0, 0, 0)),
            pl.BlockSpec((1, C_in), lambda n, i: (0, 0)),
            pl.BlockSpec((C_in, C_out), lambda n, i: (0, 0)),
            pl.BlockSpec((1, C_out), lambda n, i: (0, 0)),
        ],
        out_specs=pl.BlockSpec((1, tile_h, W, C_out), lambda n, i: (n, i, 0, 0)),
        scratch_shapes=[pltpu.VMEM((4 * p, Wp, C_in), x.dtype)],
        compiler_params=pltpu.CompilerParams(
            dimension_semantics=("parallel", "parallel"),
            vmem_limit_bytes=vmem_limit),
    )(x_pad, x_pad, wd, bd, wp, bp)

    y = out_pad[:, :H]                                   # drop H padding
    return jnp.transpose(y, (0, 3, 1, 2))                # back to NCHW


def dwconv_reference(x, params, *, ksize, eps=1e-5):
    """Pure-JAX reference (matches PyTorch DWConv in eval mode)."""
    p = (ksize - 1) // 2
    y = jax.lax.conv_general_dilated(
        x, params["dconv_w"], window_strides=(1, 1), padding=[(p, p), (p, p)],
        dimension_numbers=("NCHW", "OIHW", "NCHW"),
        feature_group_count=x.shape[1])
    y = ((y - params["dconv_bn_mean"][None, :, None, None])
         / jnp.sqrt(params["dconv_bn_var"] + eps)[None, :, None, None]
         * params["dconv_bn_gamma"][None, :, None, None]
         + params["dconv_bn_beta"][None, :, None, None])
    y = y * jax.nn.sigmoid(y)
    z = jax.lax.conv_general_dilated(
        y, params["pconv_w"], window_strides=(1, 1), padding=[(0, 0), (0, 0)],
        dimension_numbers=("NCHW", "OIHW", "NCHW"))
    z = ((z - params["pconv_bn_mean"][None, :, None, None])
         / jnp.sqrt(params["pconv_bn_var"] + eps)[None, :, None, None]
         * params["pconv_bn_gamma"][None, :, None, None]
         + params["pconv_bn_beta"][None, :, None, None])
    return z * jax.nn.sigmoid(z)


if __name__ == "__main__":
    key = jax.random.PRNGKey(0)
    N, C_in, H, W = 2, 8, 16, 16
    C_out, ksize = 16, 5
    ks = jax.random.split(key, 11)
    x = jax.random.normal(ks[0], (N, C_in, H, W), jnp.float32)
    params = {
        "dconv_w": jax.random.normal(ks[1], (C_in, 1, ksize, ksize), jnp.float32) * 0.2,
        "dconv_bn_gamma": 1.0 + 0.1 * jax.random.normal(ks[2], (C_in,), jnp.float32),
        "dconv_bn_beta": 0.1 * jax.random.normal(ks[3], (C_in,), jnp.float32),
        "dconv_bn_mean": 0.1 * jax.random.normal(ks[4], (C_in,), jnp.float32),
        "dconv_bn_var": jax.random.uniform(ks[5], (C_in,), jnp.float32, 0.5, 1.5),
        "pconv_w": jax.random.normal(ks[6], (C_out, C_in, 1, 1), jnp.float32) * 0.2,
        "pconv_bn_gamma": 1.0 + 0.1 * jax.random.normal(ks[7], (C_out,), jnp.float32),
        "pconv_bn_beta": 0.1 * jax.random.normal(ks[8], (C_out,), jnp.float32),
        "pconv_bn_mean": 0.1 * jax.random.normal(ks[9], (C_out,), jnp.float32),
        "pconv_bn_var": jax.random.uniform(ks[10], (C_out,), jnp.float32, 0.5, 1.5),
    }

    fwd = jax.jit(functools.partial(dwconv_forward, ksize=ksize))
    out = jax.block_until_ready(fwd(x, params))

    ref = jax.block_until_ready(
        jax.jit(functools.partial(dwconv_reference, ksize=ksize))(x, params))

    assert out.shape == ref.shape, (out.shape, ref.shape)
    # bf16 pointwise GEMM + approx-reciprocal SiLU => relax vs. the f32 reference.
    if not np.allclose(np.asarray(out), np.asarray(ref), rtol=1e-2, atol=1e-2):
        err = float(jnp.max(jnp.abs(out - ref)))
        raise AssertionError(f"mismatch vs reference: max abs err = {err}")
    print("KERNEL_OK")
</pallas_src>

<mosaic_0001>
module attributes {stable_mosaic.version = 11 : i64} {
  func.func @_dwconv_kernel(%arg0: i32, %arg1: i32, %arg2: memref<1x16x20x8xf32, #tpu.memory_space<vmem>>, %arg3: memref<1x4x20x8xf32, #tpu.memory_space<vmem>>, %arg4: memref<25x1x8xf32, #tpu.memory_space<vmem>>, %arg5: memref<1x8xf32, #tpu.memory_space<vmem>>, %arg6: memref<8x16xbf16, #tpu.memory_space<vmem>>, %arg7: memref<1x16xf32, #tpu.memory_space<vmem>>, %arg8: memref<1x16x16x16xf32, #tpu.memory_space<vmem>>, %arg9: memref<8x20x8xf32, #tpu.memory_space<vmem>>) attributes {dimension_semantics = [#tpu.dimension_semantics<parallel>, #tpu.dimension_semantics<parallel>], iteration_bounds = array<i64: 2, 1>, scalar_prefetch = 0 : i64, scratch_operands = 1 : i64, tpu.core_type = #tpu.core_type<tc>, window_params = [{transform_indices = @transform_0, window_bounds = array<i64: 1, 16, 20, 8>}, {transform_indices = @transform_1, window_bounds = array<i64: 1, 4, 20, 8>}, {pipeline_mode = #tpu.pipeline_mode<synchronous>, transform_indices = @transform_2, window_bounds = array<i64: 25, 1, 8>}, {pipeline_mode = #tpu.pipeline_mode<synchronous>, transform_indices = @transform_3, window_bounds = array<i64: 1, 8>}, {pipeline_mode = #tpu.pipeline_mode<synchronous>, transform_indices = @transform_4, window_bounds = array<i64: 8, 16>}, {pipeline_mode = #tpu.pipeline_mode<synchronous>, transform_indices = @transform_5, window_bounds = array<i64: 1, 16>}, {transform_indices = @transform_6, window_bounds = array<i64: 1, 16, 16, 16>}]} {
    %c0 = arith.constant 0 : index
    %c12 = arith.constant 12 : index
    %c0_0 = arith.constant 0 : index
    %c0_1 = arith.constant 0 : index
    %0 = vector.load %arg2[%c0, %c12, %c0_0, %c0_1] : memref<1x16x20x8xf32, #tpu.memory_space<vmem>>, vector<1x4x20x8xf32>
    %1 = vector.shape_cast %0 : vector<1x4x20x8xf32> to vector<4x20x8xf32>
    %c0_2 = arith.constant 0 : index
    %c0_3 = arith.constant 0 : index
    %c0_4 = arith.constant 0 : index
    %2 = vector.load %arg9[%c0_2, %c0_3, %c0_4] : memref<8x20x8xf32, #tpu.memory_space<vmem>>, vector<4x20x8xf32>
    tpu.vector_store %arg9[%c0_2, %c0_3, %c0_4], %1 {strides = array<i32>} : memref<8x20x8xf32, #tpu.memory_space<vmem>>, vector<4x20x8xf32>,
    %c0_5 = arith.constant 0 : index
    %c0_6 = arith.constant 0 : index
    %c0_7 = arith.constant 0 : index
    %c0_8 = arith.constant 0 : index
    %3 = vector.load %arg3[%c0_5, %c0_6, %c0_7, %c0_8] : memref<1x4x20x8xf32, #tpu.memory_space<vmem>>, vector<1x4x20x8xf32>
    %4 = vector.shape_cast %3 : vector<1x4x20x8xf32> to vector<4x20x8xf32>
    %c4 = arith.constant 4 : index
    %c0_9 = arith.constant 0 : index
    %c0_10 = arith.constant 0 : index
    %5 = vector.load %arg9[%c4, %c0_9, %c0_10] : memref<8x20x8xf32, #tpu.memory_space<vmem>>, vector<4x20x8xf32>
    tpu.vector_store %arg9[%c4, %c0_9, %c0_10], %4 {strides = array<i32>} : memref<8x20x8xf32, #tpu.memory_space<vmem>>, vector<4x20x8xf32>,
    %cst = arith.constant 0.000000e+00 : f32
    %6 = vector.broadcast %cst : f32 to vector<12x16x8xf32>
    %cst_11 = arith.constant 0.000000e+00 : f32
    %7 = vector.broadcast %cst_11 : f32 to vector<4x16x8xf32>
    %c0_12 = arith.constant 0 : index
    %c0_13 = arith.constant 0 : index
    %c0_14 = arith.constant 0 : index
    %8 = vector.load %arg4[%c0_12, %c0_13, %c0_14] : memref<25x1x8xf32, #tpu.memory_space<vmem>>, vector<1x1x8xf32>
    %9 = vector.shape_cast %8 : vector<1x1x8xf32> to vector<1x8xf32>
    %c0_15 = arith.constant 0 : index
    %c0_16 = arith.constant 0 : index
    %c0_17 = arith.constant 0 : index
    %c0_18 = arith.constant 0 : index
    %10 = vector.load %arg2[%c0_15, %c0_16, %c0_17, %c0_18] : memref<1x16x20x8xf32, #tpu.memory_space<vmem>>, vector<1x12x16x8xf32>
    %11 = vector.shape_cast %10 : vector<1x12x16x8xf32> to vector<12x16x8xf32>
    %12 = vector.shape_cast %9 : vector<1x8xf32> to vector<1x1x8xf32>
    %13 = vector.broadcast %12 : vector<1x1x8xf32> to vector<12x16x8xf32>
    %14 = arith.mulf %11, %13 : vector<12x16x8xf32>
    %15 = arith.addf %6, %14 : vector<12x16x8xf32>
    %c0_19 = arith.constant 0 : index
    %c0_20 = arith.constant 0 : index
    %c0_21 = arith.constant 0 : index
    %16 = vector.load %arg9[%c0_19, %c0_20, %c0_21] : memref<8x20x8xf32, #tpu.memory_space<vmem>>, vector<4x16x8xf32>
    %17 = vector.shape_cast %9 : vector<1x8xf32> to vector<1x1x8xf32>
    %18 = vector.broadcast %17 : vector<1x1x8xf32> to vector<4x16x8xf32>
    %19 = arith.mulf %16, %18 : vector<4x16x8xf32>
    %20 = arith.addf %7, %19 : vector<4x16x8xf32>
    %c1 = arith.constant 1 : index
    %c0_22 = arith.constant 0 : index
    %c0_23 = arith.constant 0 : index
    %21 = vector.load %arg4[%c1, %c0_22, %c0_23] : memref<25x1x8xf32, #tpu.memory_space<vmem>>, vector<1x1x8xf32>
    %22 = vector.shape_cast %21 : vector<1x1x8xf32> to vector<1x8xf32>
    %c0_24 = arith.constant 0 : index
    %c0_25 = arith.constant 0 : index
    %c1_26 = arith.constant 1 : index
    %c0_27 = arith.constant 0 : index
    %23 = vector.load %arg2[%c0_24, %c0_25, %c1_26, %c0_27] : memref<1x16x20x8xf32, #tpu.memory_space<vmem>>, vector<1x12x16x8xf32>
    %24 = vector.shape_cast %23 : vector<1x12x16x8xf32> to vector<12x16x8xf32>
    %25 = vector.shape_cast %22 : vector<1x8xf32> to vector<1x1x8xf32>
    %26 = vector.broadcast %25 : vector<1x1x8xf32> to vector<12x16x8xf32>
    %27 = arith.mulf %24, %26 : vector<12x16x8xf32>
    %28 = arith.addf %15, %27 : vector<12x16x8xf32>
    %c0_28 = arith.constant 0 : index
    %c1_29 = arith.constant 1 : index
    %c0_30 = arith.constant 0 : index
    %29 = vector.load %arg9[%c0_28, %c1_29, %c0_30] : memref<8x20x8xf32, #tpu.memory_space<vmem>>, vector<4x16x8xf32>
    %30 = vector.shape_cast %22 : vector<1x8xf32> to vector<1x1x8xf32>
    %31 = vector.broadcast %30 : vector<1x1x8xf32> to vector<4x16x8xf32>
    %32 = arith.mulf %29, %31 : vector<4x16x8xf32>
    %33 = arith.addf %20, %32 : vector<4x16x8xf32>
    %c2 = arith.constant 2 : index
    %c0_31 = arith.constant 0 : index
    %c0_32 = arith.constant 0 : index
    %34 = vector.load %arg4[%c2, %c0_31, %c0_32] : memref<25x1x8xf32, #tpu.memory_space<vmem>>, vector<1x1x8xf32>
    %35 = vector.shape_cast %34 : vector<1x1x8xf32> to vector<1x8xf32>
    %c0_33 = arith.constant 0 : index
    %c0_34 = arith.constant 0 : index
    %c2_35 = arith.constant 2 : index
    %c0_36 = arith.constant 0 : index
    %36 = vector.load %arg2[%c0_33, %c0_34, %c2_35, %c0_36] : memref<1x16x20x8xf32, #tpu.memory_space<vmem>>, vector<1x12x16x8xf32>
    %37 = vector.shape_cast %36 : vector<1x12x16x8xf32> to vector<12x16x8xf32>
    %38 = vector.shape_cast %35 : vector<1x8xf32> to vector<1x1x8xf32>
    %39 = vector.broadcast %38 : vector<1x1x8xf32> to vector<12x16x8xf32>
    %40 = arith.mulf %37, %39 : vector<12x16x8xf32>
    %41 = arith.addf %28, %40 : vector<12x16x8xf32>
    %c0_37 = arith.constant 0 : index
    %c2_38 = arith.constant 2 : index
    %c0_39 = arith.constant 0 : index
    %42 = vector.load %arg9[%c0_37, %c2_38, %c0_39] : memref<8x20x8xf32, #tpu.memory_space<vmem>>, vector<4x16x8xf32>
    %43 = vector.shape_cast %35 : vector<1x8xf32> to vector<1x1x8xf32>
    %44 = vector.broadcast %43 : vector<1x1x8xf32> to vector<4x16x8xf32>
    %45 = arith.mulf %42, %44 : vector<4x16x8xf32>
    %46 = arith.addf %33, %45 : vector<4x16x8xf32>
    %c3 = arith.constant 3 : index
    %c0_40 = arith.constant 0 : index
    %c0_41 = arith.constant 0 : index
    %47 = vector.load %arg4[%c3, %c0_40, %c0_41] : memref<25x1x8xf32, #tpu.memory_space<vmem>>, vector<1x1x8xf32>
    %48 = vector.shape_cast %47 : vector<1x1x8xf32> to vector<1x8xf32>
    %c0_42 = arith.constant 0 : index
    %c0_43 = arith.constant 0 : index
    %c3_44 = arith.constant 3 : index
    %c0_45 = arith.constant 0 : index
    %49 = vector.load %arg2[%c0_42, %c0_43, %c3_44, %c0_45] : memref<1x16x20x8xf32, #tpu.memory_space<vmem>>, vector<1x12x16x8xf32>
    %50 = vector.shape_cast %49 : vector<1x12x16x8xf32> to vector<12x16x8xf32>
    %51 = vector.shape_cast %48 : vector<1x8xf32> to vector<1x1x8xf32>
    %52 = vector.broadcast %51 : vector<1x1x8xf32> to vector<12x16x8xf32>
    %53 = arith.mulf %50, %52 : vector<12x16x8xf32>
    %54 = arith.addf %41, %53 : vector<12x16x8xf32>
    %c0_46 = arith.constant 0 : index
    %c3_47 = arith.constant 3 : index
    %c0_48 = arith.constant 0 : index
    %55 = vector.load %arg9[%c0_46, %c3_47, %c0_48] : memref<8x20x8xf32, #tpu.memory_space<vmem>>, vector<4x16x8xf32>
    %56 = vector.shape_cast %48 : vector<1x8xf32> to vector<1x1x8xf32>
    %57 = vector.broadcast %56 : vector<1x1x8xf32> to vector<4x16x8xf32>
    %58 = arith.mulf %55, %57 : vector<4x16x8xf32>
    %59 = arith.addf %46, %58 : vector<4x16x8xf32>
    %c4_49 = arith.constant 4 : index
    %c0_50 = arith.constant 0 : index
    %c0_51 = arith.constant 0 : index
    %60 = vector.load %arg4[%c4_49, %c0_50, %c0_51] : memref<25x1x8xf32, #tpu.memory_space<vmem>>, vector<1x1x8xf32>
    %61 = vector.shape_cast %60 : vector<1x1x8xf32> to vector<1x8xf32>
    %c0_52 = arith.constant 0 : index
    %c0_53 = arith.constant 0 : index
    %c4_54 = arith.constant 4 : index
    %c0_55 = arith.constant 0 : index
    %62 = vector.load %arg2[%c0_52, %c0_53, %c4_54, %c0_55] : memref<1x16x20x8xf32, #tpu.memory_space<vmem>>, vector<1x12x16x8xf32>
    %63 = vector.shape_cast %62 : vector<1x12x16x8xf32> to vector<12x16x8xf32>
    %64 = vector.shape_cast %61 : vector<1x8xf32> to vector<1x1x8xf32>
    %65 = vector.broadcast %64 : vector<1x1x8xf32> to vector<12x16x8xf32>
    %66 = arith.mulf %63, %65 : vector<12x16x8xf32>
    %67 = arith.addf %54, %66 : vector<12x16x8xf32>
    %c0_56 = arith.constant 0 : index
    %c4_57 = arith.constant 4 : index
    %c0_58 = arith.constant 0 : index
    %68 = vector.load %arg9[%c0_56, %c4_57, %c0_58] : memref<8x20x8xf32, #tpu.memory_space<vmem>>, vector<4x16x8xf32>
    %69 = vector.shape_cast %61 : vector<1x8xf32> to vector<1x1x8xf32>
    %70 = vector.broadcast %69 : vector<1x1x8xf32> to vector<4x16x8xf32>
    %71 = arith.mulf %68, %70 : vector<4x16x8xf32>
    %72 = arith.addf %59, %71 : vector<4x16x8xf32>
    %c5 = arith.constant 5 : index
    %c0_59 = arith.constant 0 : index
    %c0_60 = arith.constant 0 : index
    %73 = vector.load %arg4[%c5, %c0_59, %c0_60] : memref<25x1x8xf32, #tpu.memory_space<vmem>>, vector<1x1x8xf32>
    %74 = vector.shape_cast %73 : vector<1x1x8xf32> to vector<1x8xf32>
    %c0_61 = arith.constant 0 : index
    %c1_62 = arith.constant 1 : index
    %c0_63 = arith.constant 0 : index
    %c0_64 = arith.constant 0 : index
    %75 = vector.load %arg2[%c0_61, %c1_62, %c0_63, %c0_64] : memref<1x16x20x8xf32, #tpu.memory_space<vmem>>, vector<1x12x16x8xf32>
    %76 = vector.shape_cast %75 : vector<1x12x16x8xf32> to vector<12x16x8xf32>
    %77 = vector.shape_cast %74 : vector<1x8xf32> to vector<1x1x8xf32>
    %78 = vector.broadcast %77 : vector<1x1x8xf32> to vector<12x16x8xf32>
    %79 = arith.mulf %76, %78 : vector<12x16x8xf32>
    %80 = arith.addf %67, %79 : vector<12x16x8xf32>
    %c1_65 = arith.constant 1 : index
    %c0_66 = arith.constant 0 : index
    %c0_67 = arith.constant 0 : index
    %81 = vector.load %arg9[%c1_65, %c0_66, %c0_67] : memref<8x20x8xf32, #tpu.memory_space<vmem>>, vector<4x16x8xf32>
    %82 = vector.shape_cast %74 : vector<1x8xf32> to vector<1x1x8xf32>
    %83 = vector.broadcast %82 : vector<1x1x8xf32> to vector<4x16x8xf32>
    %84 = arith.mulf %81, %83 : vector<4x16x8xf32>
    %85 = arith.addf %72, %84 : vector<4x16x8xf32>
    %c6 = arith.constant 6 : index
    %c0_68 = arith.constant 0 : index
    %c0_69 = arith.constant 0 : index
    %86 = vector.load %arg4[%c6, %c0_68, %c0_69] : memref<25x1x8xf32, #tpu.memory_space<vmem>>, vector<1x1x8xf32>
    %87 = vector.shape_cast %86 : vector<1x1x8xf32> to vector<1x8xf32>
    %c0_70 = arith.constant 0 : index
    %c1_71 = arith.constant 1 : index
    %c1_72 = arith.constant 1 : index
    %c0_73 = arith.constant 0 : index
    %88 = vector.load %arg2[%c0_70, %c1_71, %c1_72, %c0_73] : memref<1x16x20x8xf32, #tpu.memory_space<vmem>>, vector<1x12x16x8xf32>
    %89 = vector.shape_cast %88 : vector<1x12x16x8xf32> to vector<12x16x8xf32>
    %90 = vector.shape_cast %87 : vector<1x8xf32> to vector<1x1x8xf32>
    %91 = vector.broadcast %90 : vector<1x1x8xf32> to vector<12x16x8xf32>
    %92 = arith.mulf %89, %91 : vector<12x16x8xf32>
    %93 = arith.addf %80, %92 : vector<12x16x8xf32>
    %c1_74 = arith.constant 1 : index
    %c1_75 = arith.constant 1 : index
    %c0_76 = arith.constant 0 : index
    %94 = vector.load %arg9[%c1_74, %c1_75, %c0_76] : memref<8x20x8xf32, #tpu.memory_space<vmem>>, vector<4x16x8xf32>
    %95 = vector.shape_cast %87 : vector<1x8xf32> to vector<1x1x8xf32>
    %96 = vector.broadcast %95 : vector<1x1x8xf32> to vector<4x16x8xf32>
    %97 = arith.mulf %94, %96 : vector<4x16x8xf32>
    %98 = arith.addf %85, %97 : vector<4x16x8xf32>
    %c7 = arith.constant 7 : index
    %c0_77 = arith.constant 0 : index
    %c0_78 = arith.constant 0 : index
    %99 = vector.load %arg4[%c7, %c0_77, %c0_78] : memref<25x1x8xf32, #tpu.memory_space<vmem>>, vector<1x1x8xf32>
    %100 = vector.shape_cast %99 : vector<1x1x8xf32> to vector<1x8xf32>
    %c0_79 = arith.constant 0 : index
    %c1_80 = arith.constant 1 : index
    %c2_81 = arith.constant 2 : index
    %c0_82 = arith.constant 0 : index
    %101 = vector.load %arg2[%c0_79, %c1_80, %c2_81, %c0_82] : memref<1x16x20x8xf32, #tpu.memory_space<vmem>>, vector<1x12x16x8xf32>
    %102 = vector.shape_cast %101 : vector<1x12x16x8xf32> to vector<12x16x8xf32>
    %103 = vector.shape_cast %100 : vector<1x8xf32> to vector<1x1x8xf32>
    %104 = vector.broadcast %103 : vector<1x1x8xf32> to vector<12x16x8xf32>
    %105 = arith.mulf %102, %104 : vector<12x16x8xf32>
    %106 = arith.addf %93, %105 : vector<12x16x8xf32>
    %c1_83 = arith.constant 1 : index
    %c2_84 = arith.constant 2 : index
    %c0_85 = arith.constant 0 : index
    %107 = vector.load %arg9[%c1_83, %c2_84, %c0_85] : memref<8x20x8xf32, #tpu.memory_space<vmem>>, vector<4x16x8xf32>
    %108 = vector.shape_cast %100 : vector<1x8xf32> to vector<1x1x8xf32>
    %109 = vector.broadcast %108 : vector<1x1x8xf32> to vector<4x16x8xf32>
    %110 = arith.mulf %107, %109 : vector<4x16x8xf32>
    %111 = arith.addf %98, %110 : vector<4x16x8xf32>
    %c8 = arith.constant 8 : index
    %c0_86 = arith.constant 0 : index
    %c0_87 = arith.constant 0 : index
    %112 = vector.load %arg4[%c8, %c0_86, %c0_87] : memref<25x1x8xf32, #tpu.memory_space<vmem>>, vector<1x1x8xf32>
    %113 = vector.shape_cast %112 : vector<1x1x8xf32> to vector<1x8xf32>
    %c0_88 = arith.constant 0 : index
    %c1_89 = arith.constant 1 : index
    %c3_90 = arith.constant 3 : index
    %c0_91 = arith.constant 0 : index
    %114 = vector.load %arg2[%c0_88, %c1_89, %c3_90, %c0_91] : memref<1x16x20x8xf32, #tpu.memory_space<vmem>>, vector<1x12x16x8xf32>
    %115 = vector.shape_cast %114 : vector<1x12x16x8xf32> to vector<12x16x8xf32>
    %116 = vector.shape_cast %113 : vector<1x8xf32> to vector<1x1x8xf32>
    %117 = vector.broadcast %116 : vector<1x1x8xf32> to vector<12x16x8xf32>
    %118 = arith.mulf %115, %117 : vector<12x16x8xf32>
    %119 = arith.addf %106, %118 : vector<12x16x8xf32>
    %c1_92 = arith.constant 1 : index
    %c3_93 = arith.constant 3 : index
    %c0_94 = arith.constant 0 : index
    %120 = vector.load %arg9[%c1_92, %c3_93, %c0_94] : memref<8x20x8xf32, #tpu.memory_space<vmem>>, vector<4x16x8xf32>
    %121 = vector.shape_cast %113 : vector<1x8xf32> to vector<1x1x8xf32>
    %122 = vector.broadcast %121 : vector<1x1x8xf32> to vector<4x16x8xf32>
    %123 = arith.mulf %120, %122 : vector<4x16x8xf32>
    %124 = arith.addf %111, %123 : vector<4x16x8xf32>
    %c9 = arith.constant 9 : index
    %c0_95 = arith.constant 0 : index
    %c0_96 = arith.constant 0 : index
    %125 = vector.load %arg4[%c9, %c0_95, %c0_96] : memref<25x1x8xf32, #tpu.memory_space<vmem>>, vector<1x1x8xf32>
    %126 = vector.shape_cast %125 : vector<1x1x8xf32> to vector<1x8xf32>
    %c0_97 = arith.constant 0 : index
    %c1_98 = arith.constant 1 : index
    %c4_99 = arith.constant 4 : index
    %c0_100 = arith.constant 0 : index
    %127 = vector.load %arg2[%c0_97, %c1_98, %c4_99, %c0_100] : memref<1x16x20x8xf32, #tpu.memory_space<vmem>>, vector<1x12x16x8xf32>
    %128 = vector.shape_cast %127 : vector<1x12x16x8xf32> to vector<12x16x8xf32>
    %129 = vector.shape_cast %126 : vector<1x8xf32> to vector<1x1x8xf32>
    %130 = vector.broadcast %129 : vector<1x1x8xf32> to vector<12x16x8xf32>
    %131 = arith.mulf %128, %130 : vector<12x16x8xf32>
    %132 = arith.addf %119, %131 : vector<12x16x8xf32>
    %c1_101 = arith.constant 1 : index
    %c4_102 = arith.constant 4 : index
    %c0_103 = arith.constant 0 : index
    %133 = vector.load %arg9[%c1_101, %c4_102, %c0_103] : memref<8x20x8xf32, #tpu.memory_space<vmem>>, vector<4x16x8xf32>
    %134 = vector.shape_cast %126 : vector<1x8xf32> to vector<1x1x8xf32>
    %135 = vector.broadcast %134 : vector<1x1x8xf32> to vector<4x16x8xf32>
    %136 = arith.mulf %133, %135 : vector<4x16x8xf32>
    %137 = arith.addf %124, %136 : vector<4x16x8xf32>
    %c10 = arith.constant 10 : index
    %c0_104 = arith.constant 0 : index
    %c0_105 = arith.constant 0 : index
    %138 = vector.load %arg4[%c10, %c0_104, %c0_105] : memref<25x1x8xf32, #tpu.memory_space<vmem>>, vector<1x1x8xf32>
    %139 = vector.shape_cast %138 : vector<1x1x8xf32> to vector<1x8xf32>
    %c0_106 = arith.constant 0 : index
    %c2_107 = arith.constant 2 : index
    %c0_108 = arith.constant 0 : index
    %c0_109 = arith.constant 0 : index
    %140 = vector.load %arg2[%c0_106, %c2_107, %c0_108, %c0_109] : memref<1x16x20x8xf32, #tpu.memory_space<vmem>>, vector<1x12x16x8xf32>
    %141 = vector.shape_cast %140 : vector<1x12x16x8xf32> to vector<12x16x8xf32>
    %142 = vector.shape_cast %139 : vector<1x8xf32> to vector<1x1x8xf32>
    %143 = vector.broadcast %142 : vector<1x1x8xf32> to vector<12x16x8xf32>
    %144 = arith.mulf %141, %143 : vector<12x16x8xf32>
    %145 = arith.addf %132, %144 : vector<12x16x8xf32>
    %c2_110 = arith.constant 2 : index
    %c0_111 = arith.constant 0 : index
    %c0_112 = arith.constant 0 : index
    %146 = vector.load %arg9[%c2_110, %c0_111, %c0_112] : memref<8x20x8xf32, #tpu.memory_space<vmem>>, vector<4x16x8xf32>
    %147 = vector.shape_cast %139 : vector<1x8xf32> to vector<1x1x8xf32>
    %148 = vector.broadcast %147 : vector<1x1x8xf32> to vector<4x16x8xf32>
    %149 = arith.mulf %146, %148 : vector<4x16x8xf32>
    %150 = arith.addf %137, %149 : vector<4x16x8xf32>
    %c11 = arith.constant 11 : index
    %c0_113 = arith.constant 0 : index
    %c0_114 = arith.constant 0 : index
    %151 = vector.load %arg4[%c11, %c0_113, %c0_114] : memref<25x1x8xf32, #tpu.memory_space<vmem>>, vector<1x1x8xf32>
    %152 = vector.shape_cast %151 : vector<1x1x8xf32> to vector<1x8xf32>
    %c0_115 = arith.constant 0 : index
    %c2_116 = arith.constant 2 : index
    %c1_117 = arith.constant 1 : index
    %c0_118 = arith.constant 0 : index
    %153 = vector.load %arg2[%c0_115, %c2_116, %c1_117, %c0_118] : memref<1x16x20x8xf32, #tpu.memory_space<vmem>>, vector<1x12x16x8xf32>
    %154 = vector.shape_cast %153 : vector<1x12x16x8xf32> to vector<12x16x8xf32>
    %155 = vector.shape_cast %152 : vector<1x8xf32> to vector<1x1x8xf32>
    %156 = vector.broadcast %155 : vector<1x1x8xf32> to vector<12x16x8xf32>
    %157 = arith.mulf %154, %156 : vector<12x16x8xf32>
    %158 = arith.addf %145, %157 : vector<12x16x8xf32>
    %c2_119 = arith.constant 2 : index
    %c1_120 = arith.constant 1 : index
    %c0_121 = arith.constant 0 : index
    %159 = vector.load %arg9[%c2_119, %c1_120, %c0_121] : memref<8x20x8xf32, #tpu.memory_space<vmem>>, vector<4x16x8xf32>
    %160 = vector.shape_cast %152 : vector<1x8xf32> to vector<1x1x8xf32>
    %161 = vector.broadcast %160 : vector<1x1x8xf32> to vector<4x16x8xf32>
    %162 = arith.mulf %159, %161 : vector<4x16x8xf32>
    %163 = arith.addf %150, %162 : vector<4x16x8xf32>
    %c12_122 = arith.constant 12 : index
    %c0_123 = arith.constant 0 : index
    %c0_124 = arith.constant 0 : index
    %164 = vector.load %arg4[%c12_122, %c0_123, %c0_124] : memref<25x1x8xf32, #tpu.memory_space<vmem>>, vector<1x1x8xf32>
    %165 = vector.shape_cast %164 : vector<1x1x8xf32> to vector<1x8xf32>
    %c0_125 = arith.constant 0 : index
    %c2_126 = arith.constant 2 : index
    %c2_127 = arith.constant 2 : index
    %c0_128 = arith.constant 0 : index
    %166 = vector.load %arg2[%c0_125, %c2_126, %c2_127, %c0_128] : memref<1x16x20x8xf32, #tpu.memory_space<vmem>>, vector<1x12x16x8xf32>
    %167 = vector.shape_cast %166 : vector<1x12x16x8xf32> to vector<12x16x8xf32>
    %168 = vector.shape_cast %165 : vector<1x8xf32> to vector<1x1x8xf32>
    %169 = vector.broadcast %168 : vector<1x1x8xf32> to vector<12x16x8xf32>
    %170 = arith.mulf %167, %169 : vector<12x16x8xf32>
    %171 = arith.addf %158, %170 : vector<12x16x8xf32>
    %c2_129 = arith.constant 2 : index
    %c2_130 = arith.constant 2 : index
    %c0_131 = arith.constant 0 : index
    %172 = vector.load %arg9[%c2_129, %c2_130, %c0_131] : memref<8x20x8xf32, #tpu.memory_space<vmem>>, vector<4x16x8xf32>
    %173 = vector.shape_cast %165 : vector<1x8xf32> to vector<1x1x8xf32>
    %174 = vector.broadcast %173 : vector<1x1x8xf32> to vector<4x16x8xf32>
    %175 = arith.mulf %172, %174 : vector<4x16x8xf32>
    %176 = arith.addf %163, %175 : vector<4x16x8xf32>
    %c13 = arith.constant 13 : index
    %c0_132 = arith.constant 0 : index
    %c0_133 = arith.constant 0 : index
    %177 = vector.load %arg4[%c13, %c0_132, %c0_133] : memref<25x1x8xf32, #tpu.memory_space<vmem>>, vector<1x1x8xf32>
    %178 = vector.shape_cast %177 : vector<1x1x8xf32> to vector<1x8xf32>
    %c0_134 = arith.constant 0 : index
    %c2_135 = arith.constant 2 : index
    %c3_136 = arith.constant 3 : index
    %c0_137 = arith.constant 0 : index
    %179 = vector.load %arg2[%c0_134, %c2_135, %c3_136, %c0_137] : memref<1x16x20x8xf32, #tpu.memory_space<vmem>>, vector<1x12x16x8xf32>
    %180 = vector.shape_cast %179 : vector<1x12x16x8xf32> to vector<12x16x8xf32>
    %181 = vector.shape_cast %178 : vector<1x8xf32> to vector<1x1x8xf32>
    %182 = vector.broadcast %181 : vector<1x1x8xf32> to vector<12x16x8xf32>
    %183 = arith.mulf %180, %182 : vector<12x16x8xf32>
    %184 = arith.addf %171, %183 : vector<12x16x8xf32>
    %c2_138 = arith.constant 2 : index
    %c3_139 = arith.constant 3 : index
    %c0_140 = arith.constant 0 : index
    %185 = vector.load %arg9[%c2_138, %c3_139, %c0_140] : memref<8x20x8xf32, #tpu.memory_space<vmem>>, vector<4x16x8xf32>
    %186 = vector.shape_cast %178 : vector<1x8xf32> to vector<1x1x8xf32>
    %187 = vector.broadcast %186 : vector<1x1x8xf32> to vector<4x16x8xf32>
    %188 = arith.mulf %185, %187 : vector<4x16x8xf32>
    %189 = arith.addf %176, %188 : vector<4x16x8xf32>
    %c14 = arith.constant 14 : index
    %c0_141 = arith.constant 0 : index
    %c0_142 = arith.constant 0 : index
    %190 = vector.load %arg4[%c14, %c0_141, %c0_142] : memref<25x1x8xf32, #tpu.memory_space<vmem>>, vector<1x1x8xf32>
    %191 = vector.shape_cast %190 : vector<1x1x8xf32> to vector<1x8xf32>
    %c0_143 = arith.constant 0 : index
    %c2_144 = arith.constant 2 : index
    %c4_145 = arith.constant 4 : index
    %c0_146 = arith.constant 0 : index
    %192 = vector.load %arg2[%c0_143, %c2_144, %c4_145, %c0_146] : memref<1x16x20x8xf32, #tpu.memory_space<vmem>>, vector<1x12x16x8xf32>
    %193 = vector.shape_cast %192 : vector<1x12x16x8xf32> to vector<12x16x8xf32>
    %194 = vector.shape_cast %191 : vector<1x8xf32> to vector<1x1x8xf32>
    %195 = vector.broadcast %194 : vector<1x1x8xf32> to vector<12x16x8xf32>
    %196 = arith.mulf %193, %195 : vector<12x16x8xf32>
    %197 = arith.addf %184, %196 : vector<12x16x8xf32>
    %c2_147 = arith.constant 2 : index
    %c4_148 = arith.constant 4 : index
    %c0_149 = arith.constant 0 : index
    %198 = vector.load %arg9[%c2_147, %c4_148, %c0_149] : memref<8x20x8xf32, #tpu.memory_space<vmem>>, vector<4x16x8xf32>
    %199 = vector.shape_cast %191 : vector<1x8xf32> to vector<1x1x8xf32>
    %200 = vector.broadcast %199 : vector<1x1x8xf32> to vector<4x16x8xf32>
    %201 = arith.mulf %198, %200 : vector<4x16x8xf32>
    %202 = arith.addf %189, %201 : vector<4x16x8xf32>
    %c15 = arith.constant 15 : index
    %c0_150 = arith.constant 0 : index
    %c0_151 = arith.constant 0 : index
    %203 = vector.load %arg4[%c15, %c0_150, %c0_151] : memref<25x1x8xf32, #tpu.memory_space<vmem>>, vector<1x1x8xf32>
    %204 = vector.shape_cast %203 : vector<1x1x8xf32> to vector<1x8xf32>
    %c0_152 = arith.constant 0 : index
    %c3_153 = arith.constant 3 : index
    %c0_154 = arith.constant 0 : index
    %c0_155 = arith.constant 0 : index
    %205 = vector.load %arg2[%c0_152, %c3_153, %c0_154, %c0_155] : memref<1x16x20x8xf32, #tpu.memory_space<vmem>>, vector<1x12x16x8xf32>
    %206 = vector.shape_cast %205 : vector<1x12x16x8xf32> to vector<12x16x8xf32>
    %207 = vector.shape_cast %204 : vector<1x8xf32> to vector<1x1x8xf32>
    %208 = vector.broadcast %207 : vector<1x1x8xf32> to vector<12x16x8xf32>
    %209 = arith.mulf %206, %208 : vector<12x16x8xf32>
    %210 = arith.addf %197, %209 : vector<12x16x8xf32>
    %c3_156 = arith.constant 3 : index
    %c0_157 = arith.constant 0 : index
    %c0_158 = arith.constant 0 : index
    %211 = vector.load %arg9[%c3_156, %c0_157, %c0_158] : memref<8x20x8xf32, #tpu.memory_space<vmem>>, vector<4x16x8xf32>
    %212 = vector.shape_cast %204 : vector<1x8xf32> to vector<1x1x8xf32>
    %213 = vector.broadcast %212 : vector<1x1x8xf32> to vector<4x16x8xf32>
    %214 = arith.mulf %211, %213 : vector<4x16x8xf32>
    %215 = arith.addf %202, %214 : vector<4x16x8xf32>
    %c16 = arith.constant 16 : index
    %c0_159 = arith.constant 0 : index
    %c0_160 = arith.constant 0 : index
    %216 = vector.load %arg4[%c16, %c0_159, %c0_160] : memref<25x1x8xf32, #tpu.memory_space<vmem>>, vector<1x1x8xf32>
    %217 = vector.shape_cast %216 : vector<1x1x8xf32> to vector<1x8xf32>
    %c0_161 = arith.constant 0 : index
    %c3_162 = arith.constant 3 : index
    %c1_163 = arith.constant 1 : index
    %c0_164 = arith.constant 0 : index
    %218 = vector.load %arg2[%c0_161, %c3_162, %c1_163, %c0_164] : memref<1x16x20x8xf32, #tpu.memory_space<vmem>>, vector<1x12x16x8xf32>
    %219 = vector.shape_cast %218 : vector<1x12x16x8xf32> to vector<12x16x8xf32>
    %220 = vector.shape_cast %217 : vector<1x8xf32> to vector<1x1x8xf32>
    %221 = vector.broadcast %220 : vector<1x1x8xf32> to vector<12x16x8xf32>
    %222 = arith.mulf %219, %221 : vector<12x16x8xf32>
    %223 = arith.addf %210, %222 : vector<12x16x8xf32>
    %c3_165 = arith.constant 3 : index
    %c1_166 = arith.constant 1 : index
    %c0_167 = arith.constant 0 : index
    %224 = vector.load %arg9[%c3_165, %c1_166, %c0_167] : memref<8x20x8xf32, #tpu.memory_space<vmem>>, vector<4x16x8xf32>
    %225 = vector.shape_cast %217 : vector<1x8xf32> to vector<1x1x8xf32>
    %226 = vector.broadcast %225 : vector<1x1x8xf32> to vector<4x16x8xf32>
    %227 = arith.mulf %224, %226 : vector<4x16x8xf32>
    %228 = arith.addf %215, %227 : vector<4x16x8xf32>
    %c17 = arith.constant 17 : index
    %c0_168 = arith.constant 0 : index
    %c0_169 = arith.constant 0 : index
    %229 = vector.load %arg4[%c17, %c0_168, %c0_169] : memref<25x1x8xf32, #tpu.memory_space<vmem>>, vector<1x1x8xf32>
    %230 = vector.shape_cast %229 : vector<1x1x8xf32> to vector<1x8xf32>
    %c0_170 = arith.constant 0 : index
    %c3_171 = arith.constant 3 : index
    %c2_172 = arith.constant 2 : index
    %c0_173 = arith.constant 0 : index
    %231 = vector.load %arg2[%c0_170, %c3_171, %c2_172, %c0_173] : memref<1x16x20x8xf32, #tpu.memory_space<vmem>>, vector<1x12x16x8xf32>
    %232 = vector.shape_cast %231 : vector<1x12x16x8xf32> to vector<12x16x8xf32>
    %233 = vector.shape_cast %230 : vector<1x8xf32> to vector<1x1x8xf32>
    %234 = vector.broadcast %233 : vector<1x1x8xf32> to vector<12x16x8xf32>
    %235 = arith.mulf %232, %234 : vector<12x16x8xf32>
    %236 = arith.addf %223, %235 : vector<12x16x8xf32>
    %c3_174 = arith.constant 3 : index
    %c2_175 = arith.constant 2 : index
    %c0_176 = arith.constant 0 : index
    %237 = vector.load %arg9[%c3_174, %c2_175, %c0_176] : memref<8x20x8xf32, #tpu.memory_space<vmem>>, vector<4x16x8xf32>
    %238 = vector.shape_cast %230 : vector<1x8xf32> to vector<1x1x8xf32>
    %239 = vector.broadcast %238 : vector<1x1x8xf32> to vector<4x16x8xf32>
    %240 = arith.mulf %237, %239 : vector<4x16x8xf32>
    %241 = arith.addf %228, %240 : vector<4x16x8xf32>
    %c18 = arith.constant 18 : index
    %c0_177 = arith.constant 0 : index
    %c0_178 = arith.constant 0 : index
    %242 = vector.load %arg4[%c18, %c0_177, %c0_178] : memref<25x1x8xf32, #tpu.memory_space<vmem>>, vector<1x1x8xf32>
    %243 = vector.shape_cast %242 : vector<1x1x8xf32> to vector<1x8xf32>
    %c0_179 = arith.constant 0 : index
    %c3_180 = arith.constant 3 : index
    %c3_181 = arith.constant 3 : index
    %c0_182 = arith.constant 0 : index
    %244 = vector.load %arg2[%c0_179, %c3_180, %c3_181, %c0_182] : memref<1x16x20x8xf32, #tpu.memory_space<vmem>>, vector<1x12x16x8xf32>
    %245 = vector.shape_cast %244 : vector<1x12x16x8xf32> to vector<12x16x8xf32>
    %246 = vector.shape_cast %243 : vector<1x8xf32> to vector<1x1x8xf32>
    %247 = vector.broadcast %246 : vector<1x1x8xf32> to vector<12x16x8xf32>
    %248 = arith.mulf %245, %247 : vector<12x16x8xf32>
    %249 = arith.addf %236, %248 : vector<12x16x8xf32>
    %c3_183 = arith.constant 3 : index
    %c3_184 = arith.constant 3 : index
    %c0_185 = arith.constant 0 : index
    %250 = vector.load %arg9[%c3_183, %c3_184, %c0_185] : memref<8x20x8xf32, #tpu.memory_space<vmem>>, vector<4x16x8xf32>
    %251 = vector.shape_cast %243 : vector<1x8xf32> to vector<1x1x8xf32>
    %252 = vector.broadcast %251 : vector<1x1x8xf32> to vector<4x16x8xf32>
    %253 = arith.mulf %250, %252 : vector<4x16x8xf32>
    %254 = arith.addf %241, %253 : vector<4x16x8xf32>
    %c19 = arith.constant 19 : index
    %c0_186 = arith.constant 0 : index
    %c0_187 = arith.constant 0 : index
    %255 = vector.load %arg4[%c19, %c0_186, %c0_187] : memref<25x1x8xf32, #tpu.memory_space<vmem>>, vector<1x1x8xf32>
    %256 = vector.shape_cast %255 : vector<1x1x8xf32> to vector<1x8xf32>
    %c0_188 = arith.constant 0 : index
    %c3_189 = arith.constant 3 : index
    %c4_190 = arith.constant 4 : index
    %c0_191 = arith.constant 0 : index
    %257 = vector.load %arg2[%c0_188, %c3_189, %c4_190, %c0_191] : memref<1x16x20x8xf32, #tpu.memory_space<vmem>>, vector<1x12x16x8xf32>
    %258 = vector.shape_cast %257 : vector<1x12x16x8xf32> to vector<12x16x8xf32>
    %259 = vector.shape_cast %256 : vector<1x8xf32> to vector<1x1x8xf32>
    %260 = vector.broadcast %259 : vector<1x1x8xf32> to vector<12x16x8xf32>
    %261 = arith.mulf %258, %260 : vector<12x16x8xf32>
    %262 = arith.addf %249, %261 : vector<12x16x8xf32>
    %c3_192 = arith.constant 3 : index
    %c4_193 = arith.constant 4 : index
    %c0_194 = arith.constant 0 : index
    %263 = vector.load %arg9[%c3_192, %c4_193, %c0_194] : memref<8x20x8xf32, #tpu.memory_space<vmem>>, vector<4x16x8xf32>
    %264 = vector.shape_cast %256 : vector<1x8xf32> to vector<1x1x8xf32>
    %265 = vector.broadcast %264 : vector<1x1x8xf32> to vector<4x16x8xf32>
    %266 = arith.mulf %263, %265 : vector<4x16x8xf32>
    %267 = arith.addf %254, %266 : vector<4x16x8xf32>
    %c20 = arith.constant 20 : index
    %c0_195 = arith.constant 0 : index
    %c0_196 = arith.constant 0 : index
    %268 = vector.load %arg4[%c20, %c0_195, %c0_196] : memref<25x1x8xf32, #tpu.memory_space<vmem>>, vector<1x1x8xf32>
    %269 = vector.shape_cast %268 : vector<1x1x8xf32> to vector<1x8xf32>
    %c0_197 = arith.constant 0 : index
    %c4_198 = arith.constant 4 : index
    %c0_199 = arith.constant 0 : index
    %c0_200 = arith.constant 0 : index
    %270 = vector.load %arg2[%c0_197, %c4_198, %c0_199, %c0_200] : memref<1x16x20x8xf32, #tpu.memory_space<vmem>>, vector<1x12x16x8xf32>
    %271 = vector.shape_cast %270 : vector<1x12x16x8xf32> to vector<12x16x8xf32>
    %272 = vector.shape_cast %269 : vector<1x8xf32> to vector<1x1x8xf32>
    %273 = vector.broadcast %272 : vector<1x1x8xf32> to vector<12x16x8xf32>
    %274 = arith.mulf %271, %273 : vector<12x16x8xf32>
    %275 = arith.addf %262, %274 : vector<12x16x8xf32>
    %c4_201 = arith.constant 4 : index
    %c0_202 = arith.constant 0 : index
    %c0_203 = arith.constant 0 : index
    %276 = vector.load %arg9[%c4_201, %c0_202, %c0_203] : memref<8x20x8xf32, #tpu.memory_space<vmem>>, vector<4x16x8xf32>
    %277 = vector.shape_cast %269 : vector<1x8xf32> to vector<1x1x8xf32>
    %278 = vector.broadcast %277 : vector<1x1x8xf32> to vector<4x16x8xf32>
    %279 = arith.mulf %276, %278 : vector<4x16x8xf32>
    %280 = arith.addf %267, %279 : vector<4x16x8xf32>
    %c21 = arith.constant 21 : index
    %c0_204 = arith.constant 0 : index
    %c0_205 = arith.constant 0 : index
    %281 = vector.load %arg4[%c21, %c0_204, %c0_205] : memref<25x1x8xf32, #tpu.memory_space<vmem>>, vector<1x1x8xf32>
    %282 = vector.shape_cast %281 : vector<1x1x8xf32> to vector<1x8xf32>
    %c0_206 = arith.constant 0 : index
    %c4_207 = arith.constant 4 : index
    %c1_208 = arith.constant 1 : index
    %c0_209 = arith.constant 0 : index
    %283 = vector.load %arg2[%c0_206, %c4_207, %c1_208, %c0_209] : memref<1x16x20x8xf32, #tpu.memory_space<vmem>>, vector<1x12x16x8xf32>
    %284 = vector.shape_cast %283 : vector<1x12x16x8xf32> to vector<12x16x8xf32>
    %285 = vector.shape_cast %282 : vector<1x8xf32> to vector<1x1x8xf32>
    %286 = vector.broadcast %285 : vector<1x1x8xf32> to vector<12x16x8xf32>
    %287 = arith.mulf %284, %286 : vector<12x16x8xf32>
    %288 = arith.addf %275, %287 : vector<12x16x8xf32>
    %c4_210 = arith.constant 4 : index
    %c1_211 = arith.constant 1 : index
    %c0_212 = arith.constant 0 : index
    %289 = vector.load %arg9[%c4_210, %c1_211, %c0_212] : memref<8x20x8xf32, #tpu.memory_space<vmem>>, vector<4x16x8xf32>
    %290 = vector.shape_cast %282 : vector<1x8xf32> to vector<1x1x8xf32>
    %291 = vector.broadcast %290 : vector<1x1x8xf32> to vector<4x16x8xf32>
    %292 = arith.mulf %289, %291 : vector<4x16x8xf32>
    %293 = arith.addf %280, %292 : vector<4x16x8xf32>
    %c22 = arith.constant 22 : index
    %c0_213 = arith.constant 0 : index
    %c0_214 = arith.constant 0 : index
    %294 = vector.load %arg4[%c22, %c0_213, %c0_214] : memref<25x1x8xf32, #tpu.memory_space<vmem>>, vector<1x1x8xf32>
    %295 = vector.shape_cast %294 : vector<1x1x8xf32> to vector<1x8xf32>
    %c0_215 = arith.constant 0 : index
    %c4_216 = arith.constant 4 : index
    %c2_217 = arith.constant 2 : index
    %c0_218 = arith.constant 0 : index
    %296 = vector.load %arg2[%c0_215, %c4_216, %c2_217, %c0_218] : memref<1x16x20x8xf32, #tpu.memory_space<vmem>>, vector<1x12x16x8xf32>
    %297 = vector.shape_cast %296 : vector<1x12x16x8xf32> to vector<12x16x8xf32>
    %298 = vector.shape_cast %295 : vector<1x8xf32> to vector<1x1x8xf32>
    %299 = vector.broadcast %298 : vector<1x1x8xf32> to vector<12x16x8xf32>
    %300 = arith.mulf %297, %299 : vector<12x16x8xf32>
    %301 = arith.addf %288, %300 : vector<12x16x8xf32>
    %c4_219 = arith.constant 4 : index
    %c2_220 = arith.constant 2 : index
    %c0_221 = arith.constant 0 : index
    %302 = vector.load %arg9[%c4_219, %c2_220, %c0_221] : memref<8x20x8xf32, #tpu.memory_space<vmem>>, vector<4x16x8xf32>
    %303 = vector.shape_cast %295 : vector<1x8xf32> to vector<1x1x8xf32>
    %304 = vector.broadcast %303 : vector<1x1x8xf32> to vector<4x16x8xf32>
    %305 = arith.mulf %302, %304 : vector<4x16x8xf32>
    %306 = arith.addf %293, %305 : vector<4x16x8xf32>
    %c23 = arith.constant 23 : index
    %c0_222 = arith.constant 0 : index
    %c0_223 = arith.constant 0 : index
    %307 = vector.load %arg4[%c23, %c0_222, %c0_223] : memref<25x1x8xf32, #tpu.memory_space<vmem>>, vector<1x1x8xf32>
    %308 = vector.shape_cast %307 : vector<1x1x8xf32> to vector<1x8xf32>
    %c0_224 = arith.constant 0 : index
    %c4_225 = arith.constant 4 : index
    %c3_226 = arith.constant 3 : index
    %c0_227 = arith.constant 0 : index
    %309 = vector.load %arg2[%c0_224, %c4_225, %c3_226, %c0_227] : memref<1x16x20x8xf32, #tpu.memory_space<vmem>>, vector<1x12x16x8xf32>
    %310 = vector.shape_cast %309 : vector<1x12x16x8xf32> to vector<12x16x8xf32>
    %311 = vector.shape_cast %308 : vector<1x8xf32> to vector<1x1x8xf32>
    %312 = vector.broadcast %311 : vector<1x1x8xf32> to vector<12x16x8xf32>
    %313 = arith.mulf %310, %312 : vector<12x16x8xf32>
    %314 = arith.addf %301, %313 : vector<12x16x8xf32>
    %c4_228 = arith.constant 4 : index
    %c3_229 = arith.constant 3 : index
    %c0_230 = arith.constant 0 : index
    %315 = vector.load %arg9[%c4_228, %c3_229, %c0_230] : memref<8x20x8xf32, #tpu.memory_space<vmem>>, vector<4x16x8xf32>
    %316 = vector.shape_cast %308 : vector<1x8xf32> to vector<1x1x8xf32>
    %317 = vector.broadcast %316 : vector<1x1x8xf32> to vector<4x16x8xf32>
    %318 = arith.mulf %315, %317 : vector<4x16x8xf32>
    %319 = arith.addf %306, %318 : vector<4x16x8xf32>
    %c24 = arith.constant 24 : index
    %c0_231 = arith.constant 0 : index
    %c0_232 = arith.constant 0 : index
    %320 = vector.load %arg4[%c24, %c0_231, %c0_232] : memref<25x1x8xf32, #tpu.memory_space<vmem>>, vector<1x1x8xf32>
    %321 = vector.shape_cast %320 : vector<1x1x8xf32> to vector<1x8xf32>
    %c0_233 = arith.constant 0 : index
    %c4_234 = arith.constant 4 : index
    %c4_235 = arith.constant 4 : index
    %c0_236 = arith.constant 0 : index
    %322 = vector.load %arg2[%c0_233, %c4_234, %c4_235, %c0_236] : memref<1x16x20x8xf32, #tpu.memory_space<vmem>>, vector<1x12x16x8xf32>
    %323 = vector.shape_cast %322 : vector<1x12x16x8xf32> to vector<12x16x8xf32>
    %324 = vector.shape_cast %321 : vector<1x8xf32> to vector<1x1x8xf32>
    %325 = vector.broadcast %324 : vector<1x1x8xf32> to vector<12x16x8xf32>
    %326 = arith.mulf %323, %325 : vector<12x16x8xf32>
    %327 = arith.addf %314, %326 : vector<12x16x8xf32>
    %c4_237 = arith.constant 4 : index
    %c4_238 = arith.constant 4 : index
    %c0_239 = arith.constant 0 : index
    %328 = vector.load %arg9[%c4_237, %c4_238, %c0_239] : memref<8x20x8xf32, #tpu.memory_space<vmem>>, vector<4x16x8xf32>
    %329 = vector.shape_cast %321 : vector<1x8xf32> to vector<1x1x8xf32>
    %330 = vector.broadcast %329 : vector<1x1x8xf32> to vector<4x16x8xf32>
    %331 = arith.mulf %328, %330 : vector<4x16x8xf32>
    %332 = arith.addf %319, %331 : vector<4x16x8xf32>
    %333 = tpu.concatenate %327, %332 in 0 : vector<12x16x8xf32>, vector<4x16x8xf32> -> vector<16x16x8xf32>
    %c0_240 = arith.constant 0 : index
    %c0_241 = arith.constant 0 : index
    %334 = vector.load %arg5[%c0_240, %c0_241] : memref<1x8xf32, #tpu.memory_space<vmem>>, vector<1x8xf32>
    %335 = vector.shape_cast %334 : vector<1x8xf32> to vector<1x1x8xf32>
    %336 = vector.broadcast %335 : vector<1x1x8xf32> to vector<16x16x8xf32>
    %337 = arith.addf %333, %336 : vector<16x16x8xf32>
    %cst_242 = arith.constant 0.000000e+00 : f32
    %338 = vector.broadcast %cst_242 : f32 to vector<16x16x8xf32>
    %339 = arith.subf %338, %337 : vector<16x16x8xf32>
    %340 = math.exp %339 : vector<16x16x8xf32>
    %cst_243 = arith.constant 1.000000e+00 : f32
    %341 = vector.broadcast %cst_243 : f32 to vector<16x16x8xf32>
    %342 = arith.addf %341, %340 : vector<16x16x8xf32>
    %343 = tpu.reciprocal %342 {approx = true} : vector<16x16x8xf32> -> vector<16x16x8xf32>
    %344 = arith.mulf %337, %343 : vector<16x16x8xf32>
    %345 = vector.shape_cast %344 : vector<16x16x8xf32> to vector<256x8xf32>
    %346 = arith.truncf %345 : vector<256x8xf32> to vector<256x8xbf16>
    %c0_244 = arith.constant 0 : index
    %c0_245 = arith.constant 0 : index
    %347 = vector.load %arg6[%c0_244, %c0_245] : memref<8x16xbf16, #tpu.memory_space<vmem>>, vector<8x16xbf16>
    %cst_246 = arith.constant dense<0.000000e+00> : vector<256x16xf32>
    %348 = tpu.matmul %346, %347, %cst_246 {dimension_numbers = #tpu.dot_dimension_numbers<[1], [0], [0], [1], [0, 0, 1, 1], [], []>} : vector<256x8xbf16>, vector<8x16xbf16>, vector<256x16xf32> -> vector<256x16xf32>
    %c0_247 = arith.constant 0 : index
    %c0_248 = arith.constant 0 : index
    %349 = vector.load %arg7[%c0_247, %c0_248] : memref<1x16xf32, #tpu.memory_space<vmem>>, vector<1x16xf32>
    %350 = vector.broadcast %349 : vector<1x16xf32> to vector<256x16xf32>
    %351 = arith.addf %348, %350 : vector<256x16xf32>
    %cst_249 = arith.constant 0.000000e+00 : f32
    %352 = vector.broadcast %cst_249 : f32 to vector<256x16xf32>
    %353 = arith.subf %352, %351 : vector<256x16xf32>
    %354 = math.exp %353 : vector<256x16xf32>
    %cst_250 = arith.constant 1.000000e+00 : f32
    %355 = vector.broadcast %cst_250 : f32 to vector<256x16xf32>
    %356 = arith.addf %355, %354 : vector<256x16xf32>
    %357 = tpu.reciprocal %356 {approx = true} : vector<256x16xf32> -> vector<256x16xf32>
    %358 = arith.mulf %351, %357 : vector<256x16xf32>
    %359 = vector.shape_cast %358 : vector<256x16xf32> to vector<16x16x16xf32>
    %c0_251 = arith.constant 0 : index
    %c0_252 = arith.constant 0 : index
    %c0_253 = arith.constant 0 : index
    %c0_254 = arith.constant 0 : index
    %360 = vector.load %arg8[%c0_251, %c0_252, %c0_253, %c0_254] : memref<1x16x16x16xf32, #tpu.memory_space<vmem>>, vector<1x16x16x16xf32>
    %361 = vector.shape_cast %360 : vector<1x16x16x16xf32> to vector<16x16x16xf32>
    %362 = vector.shape_cast %359 : vector<16x16x16xf32> to vector<1x16x16x16xf32>
    tpu.vector_store %arg8[%c0_251, %c0_252, %c0_253, %c0_254], %362 {strides = array<i32>} : memref<1x16x16x16xf32, #tpu.memory_space<vmem>>, vector<1x16x16x16xf32>,
    return
  }
  func.func @transform_0(%arg0: i32, %arg1: i32) -> (i32, i32, i32, i32) {
    %c0_i32 = arith.constant 0 : i32
    %c0_i32_0 = arith.constant 0 : i32
    %c0_i32_1 = arith.constant 0 : i32
    return %arg0, %arg1, %c0_i32, %c0_i32_0 : i32, i32, i32, i32
  }
  func.func @transform_1(%arg0: i32, %arg1: i32) -> (i32, i32, i32, i32) {
    %c1_i32 = arith.constant 1 : i32
    %0 = arith.addi %arg1, %c1_i32 : i32
    %c4_i32 = arith.constant 4 : i32
    %1 = arith.muli %0, %c4_i32 : i32
    %c0_i32 = arith.constant 0 : i32
    %c0_i32_0 = arith.constant 0 : i32
    %c0_i32_1 = arith.constant 0 : i32
    return %arg0, %1, %c0_i32, %c0_i32_0 : i32, i32, i32, i32
  }
  func.func @transform_2(%arg0: i32, %arg1: i32) -> (i32, i32, i32) {
    %c0_i32 = arith.constant 0 : i32
    %c0_i32_0 = arith.constant 0 : i32
    %c0_i32_1 = arith.constant 0 : i32
    %c0_i32_2 = arith.constant 0 : i32
    return %c0_i32, %c0_i32_0, %c0_i32_1 : i32, i32, i32
  }
  func.func @transform_3(%arg0: i32, %arg1: i32) -> (i32, i32) {
    %c0_i32 = arith.constant 0 : i32
    %c0_i32_0 = arith.constant 0 : i32
    %c0_i32_1 = arith.constant 0 : i32
    return %c0_i32, %c0_i32_0 : i32, i32
  }
  func.func @transform_4(%arg0: i32, %arg1: i32) -> (i32, i32) {
    %c0_i32 = arith.constant 0 : i32
    %c0_i32_0 = arith.constant 0 : i32
    %c0_i32_1 = arith.constant 0 : i32
    return %c0_i32, %c0_i32_0 : i32, i32
  }
  func.func @transform_5(%arg0: i32, %arg1: i32) -> (i32, i32) {
    %c0_i32 = arith.constant 0 : i32
    %c0_i32_0 = arith.constant 0 : i32
    %c0_i32_1 = arith.constant 0 : i32
    return %c0_i32, %c0_i32_0 : i32, i32
  }
  func.func @transform_6(%arg0: i32, %arg1: i32) -> (i32, i32, i32, i32) {
    %c0_i32 = arith.constant 0 : i32
    %c0_i32_0 = arith.constant 0 : i32
    %c0_i32_1 = arith.constant 0 : i32
    return %arg0, %arg1, %c0_i32, %c0_i32_0 : i32, i32, i32, i32
  }
}

</mosaic_0001>

<bundles_post_ra>
// kernel: dwconv_forward.1
= control target key start
LH: loop header
LB: loop body
LE: loop exit
PB: predicated region body
PF: predicated region fallthrough
CT: control target
= control target key end

     0   :  { %s4712_s21 = smov 0   ;;  %s4714_s22 = smov 0   ;;  %s7533_s0 = inlined_call_operand.vmem [shape: f32[2,20,20,8], index: 0, kind: input, shape index: {}, may-alias: {0,1}]   ;;  %s7534_s1 = inlined_call_operand.vmem [shape: f32[2,20,20,8], index: 1, kind: input, shape index: {}, may-alias: {0,1}]   ;;  %s7535_s2 = inlined_call_operand.vmem [shape: f32[25,1,8], index: 2, kind: input, shape index: {}]   ;;  %s7536_s3 = inlined_call_operand.vmem [shape: f32[1,8], index: 3, kind: input, shape index: {}]   ;;  %s7537_s4 = inlined_call_operand.vmem [shape: bf16[8,16], index: 4, kind: input, shape index: {}]   ;;  %s7538_s5 = inlined_call_operand.vmem [shape: f32[1,16], index: 5, kind: input, shape index: {}]   ;;  %s7539_s6 = inlined_call_operand.vmem [shape: f32[2,16,16,16], index: 6, kind: output, shape index: {}]  }
   0x1   :  { %s4716_s23 = smov 0  }
   0x2 LB: > { %s28_s24 = sadd.s32 1, %s4671_s22  ;;  %p3694_p0 = scmp.ge.s32.totalorder %s4675_s23, 1  ;;  %s4675_s23 = sphi %s4716_s23, %s16_s23   ;;  %s4671_s22 = sphi %s4714_s22, %s7645_s22   ;;  %s4667_s21 = sphi %s4712_s21, %s7644_s21  }
   0x3   : > { %p30_p1 = scmp.ge.s32.totalorder %s28_s24, 2  ;;  %p270_p2 = scmp.lt.s32.totalorder %s4675_s23, 3 }
   0x5   : > { %s7647_s24 = smov (%p30_p1, %s28_s24), 0  ;;  %p271_p3 = pnand %p3694_p0, %p270_p2 }
   0x7   : > { %274 = sbr.rel (%p271_p3) target bundleno = 681 (0x2a9), region = 44 }
   0xc   : > { %v3202_v0 = vld [vmem:[%s7537_s4] sm:$0xf]  ;;  %vm3255_vm0 = vcmask 1043456   ;;  %p333_p4 = scmp.lt.s32.totalorder %s4667_s21, 1  ;;  %v4766_v6 = vld [vmem:[%s7535_s2 + $0x4] ss:$0 sm:$0xff] }
   0xd   : > { %v3257_v1 = vsel %vm3255_vm0, %v3202_v0, 0  ;;  %v4738_v2 = vld [vmem:[%s7535_s2] ss:$0 sm:$0xff]  ;;  %v4744_v3 = vld [vmem:[%s7535_s2 + $0x1] ss:$0 sm:$0xff]  ;;  %vm388_vm1 = vcmask 64512  }
   0xe   : > { %3266 = vmatpush.bf16.msra.mxu0 %v3257_v1  ;;  %4236 = vmatpush.bf16.msra.mxu1 %v3257_v1  ;;  %s7649_s21 = smov (!%p333_p4, %s4667_s21), 1  ;;  %7590 = vst [vmem:[#allocation3_spill] sm:$0xff] %v4738_v2  ;;  %v4749_v4 = vld [vmem:[%s7535_s2 + $0x2] ss:$0 sm:$0xff]  ;;  %v4761_v5 = vld [vmem:[%s7535_s2 + $0x3] ss:$0 sm:$0xff] }
   0xf   : > { %4237 = vmatpush.bf16.msra.mxu2 %v3257_v1  ;;  %4238 = vmatpush.bf16.msra.mxu3 %v3257_v1  ;;  %s4239_s29 = smul.u32 480, %s7649_s21  ;;  %v4788_v25 = vld [vmem:[%s7535_s2 + $0x5] ss:$0 sm:$0xff]  ;;  %v4797_v32 = vld [vmem:[%s7535_s2 + $0x6] ss:$0 sm:$0xff]  ;;  %vm391_vm2 = vcmask 60416  }
  0x10   : > { %v4806_v39 = vld [vmem:[%s7535_s2 + $0x7] ss:$0 sm:$0xff]  ;;  %v4815_v46 = vld [vmem:[%s7535_s2 + $0x8] ss:$0 sm:$0xff]  ;;  %v4824_v53 = vld [vmem:[%s7535_s2 + $0x9] ss:$0 sm:$0xff] }
  0x11   : > { %s4756_s12 = scalar_lea.vmem %s7533_s0, %s4239_s29  ;;  %v4834_v61 = vld [vmem:[%s7535_s2 + $0xa] ss:$0 sm:$0xff]  ;;  %s4234_s27 = sadd.s32 384, %s4239_s29  ;;  %vm3540_vm3 = vcmask 130048  }
  0x12   : > { %v428_v7 = vld [vmem:[%s4756_s12] sm:$0xff]  ;;  %v429_v8 = vld [vmem:[%s4756_s12 + $0x8] sm:$0xff]  ;;  %v3716_v28 = vld [vmem:[%s4756_s12 + $0x18] sm:$0xff]  ;;  %s5193_s30 = scalar_lea.vmem %s7534_s1, %s4234_s27  ;;  %s4235_s15 = sshll.u32 %s7649_s21, 8 }
  0x13   : > { %v529_v9 = vld [vmem:[%s4756_s12 + $0x1] sm:$0xff]  ;;  %v455_v10 = vmul.f32 %v4738_v2, %v428_v7  ;;  %v456_v11 = vmul.f32 %v4738_v2, %v429_v8  ;;  %v530_v12 = vld [vmem:[%s4756_s12 + $0x9] sm:$0xff]  ;;  %v3741_v35 = vld [vmem:[%s4756_s12 + $0x19] sm:$0xff]  ;;  %v961_v37 = vmul.f32 %v4788_v25, %v3716_v28  ;;  %s7379_s18 = scalar_lea.vmem %s7539_s6, %s4235_s15 }
  0x14   : > { %v556_v13 = vmul.f32 %v4744_v3, %v529_v9  ;;  %v630_v14 = vld [vmem:[%s4756_s12 + $0x2] sm:$0xff]  ;;  %v631_v15 = vld [vmem:[%s4756_s12 + $0xa] sm:$0xff]  ;;  %v557_v16 = vmul.f32 %v4744_v3, %v530_v12  ;;  %v3766_v42 = vld [vmem:[%s4756_s12 + $0x1a] sm:$0xff]  ;;  %v1063_v44 = vmul.f32 %v4797_v32, %v3741_v35 }
  0x15   : > { %v657_v17 = vmul.f32 %v4749_v4, %v630_v14  ;;  %v658_v18 = vmul.f32 %v4749_v4, %v631_v15  ;;  %v731_v19 = vld [vmem:[%s4756_s12 + $0x3] sm:$0xff]  ;;  %v732_v20 = vld [vmem:[%s4756_s12 + $0xb] sm:$0xff]  ;;  %v3791_v49 = vld [vmem:[%s4756_s12 + $0x1b] sm:$0xff]  ;;  %v1164_v51 = vmul.f32 %v4806_v39, %v3766_v42 }
  0x16   : > { %v832_v21 = vld [vmem:[%s4756_s12 + $0x4] sm:$0xff]  ;;  %v580_v22 = vadd.f32 %v556_v13, %v455_v10  ;;  %v758_v23 = vmul.f32 %v4761_v5, %v731_v19  ;;  %v833_v24 = vld [vmem:[%s4756_s12 + $0xc] sm:$0xff]  ;;  %v581_v26 = vadd.f32 %v557_v16, %v456_v11  ;;  %v759_v27 = vmul.f32 %v4761_v5, %v732_v20  ;;  %v3816_v56 = vld [vmem:[%s4756_s12 + $0x1c] sm:$0xff] }
  0x17   : > { %v859_v30 = vmul.f32 %v4766_v6, %v832_v21  ;;  %v3717_v31 = vld [vmem:[%s4756_s12 + $0x20] sm:$0xff]  ;;  %v860_v34 = vmul.f32 %v4766_v6, %v833_v24  ;;  %v1265_v58 = vmul.f32 %v4815_v46, %v3791_v49  ;;  %v3841_v60 = vld [vmem:[%s4756_s12 + $0x30] sm:$0xff]  ;;  %v3842_v0 = vld [vmem:[%s4756_s12 + $0x38] sm:$0xff]  ;;  %v1366_v8 = vmul.f32 %v4824_v53, %v3816_v56 }
  0x18   : > { %v681_v29 = vadd.f32 %v657_v17, %v580_v22  ;;  %v682_v33 = vadd.f32 %v658_v18, %v581_v26  ;;  %v3742_v38 = vld [vmem:[%s4756_s12 + $0x21] sm:$0xff]  ;;  %v962_v41 = vmul.f32 %v4788_v25, %v3717_v31  ;;  %v3866_v1 = vld [vmem:[%s4756_s12 + $0x31] sm:$0xff]  ;;  %v3867_v9 = vld [vmem:[%s4756_s12 + $0x39] sm:$0xff]  ;;  %v1468_v19 = vmul.f32 %v4834_v61, %v3841_v60 }
  0x19   : > { %v3767_v45 = vld [vmem:[%s4756_s12 + $0x22] sm:$0xff]  ;;  %v1064_v48 = vmul.f32 %v4797_v32, %v3742_v38  ;;  %v4844_v10 = vld [vmem:[%s7535_s2 + $0xb] ss:$0 sm:$0xff]  ;;  %v4849_v11 = vld [vmem:[%s7535_s2 + $0xc] ss:$0 sm:$0xff]  ;;  %v1469_v26 = vmul.f32 %v4834_v61, %v3842_v0 }
  0x1a   : > { %v782_v36 = vadd.f32 %v758_v23, %v681_v29  ;;  %v783_v40 = vadd.f32 %v759_v27, %v682_v33  ;;  %v3792_v52 = vld [vmem:[%s4756_s12 + $0x23] sm:$0xff]  ;;  %v1165_v55 = vmul.f32 %v4806_v39, %v3767_v45  ;;  %v3891_v14 = vld [vmem:[%s4756_s12 + $0x32] sm:$0xff]  ;;  %v3892_v15 = vld [vmem:[%s4756_s12 + $0x3a] sm:$0xff]  ;;  %v1571_v35 = vmul.f32 %v4844_v10, %v3867_v9 }
  0x1b   : > { %v3817_v59 = vld [vmem:[%s4756_s12 + $0x24] sm:$0xff]  ;;  %v1266_v63 = vmul.f32 %v4815_v46, %v3792_v52  ;;  %v3916_v16 = vld [vmem:[%s4756_s12 + $0x33] sm:$0xff]  ;;  %v4858_v17 = vld [vmem:[%s7535_s2 + $0xd] ss:$0 sm:$0xff]  ;;  %v1672_v42 = vmul.f32 %v4849_v11, %v3892_v15 }
  0x1c   : > { %v883_v43 = vadd.f32 %v859_v30, %v782_v36  ;;  %v884_v47 = vadd.f32 %v860_v34, %v783_v40  ;;  %v1367_v13 = vmul.f32 %v4824_v53, %v3817_v59  ;;  %v3917_v20 = vld [vmem:[%s4756_s12 + $0x3b] sm:$0xff]  ;;  %v4867_v23 = vld [vmem:[%s7535_s2 + $0xe] ss:$0 sm:$0xff]  ;;  %v3967_v28 = vld [vmem:[%s4756_s12 + $0x50] sm:$0xff]  ;;  %v1570_v30 = vmul.f32 %v4844_v10, %v3866_v1 }
  0x1d   : > { %v3941_v21 = vld [vmem:[%s4756_s12 + $0x34] sm:$0xff]  ;;  %v3942_v22 = vld [vmem:[%s4756_s12 + $0x3c] sm:$0xff]  ;;  %v3966_v27 = vld [vmem:[%s4756_s12 + $0x48] sm:$0xff] }
  0x1e   : > { %v985_v50 = vadd.f32 %v961_v37, %v883_v43  ;;  %v986_v54 = vadd.f32 %v962_v41, %v884_v47  ;;  %v4876_v31 = vld [vmem:[%s7535_s2 + $0xf] ss:$0 sm:$0xff]  ;;  %v3992_v36 = vld [vmem:[%s4756_s12 + $0x51] sm:$0xff]  ;;  %v4884_v37 = vld [vmem:[%s7535_s2 + $0x10] ss:$0 sm:$0xff]  ;;  %v1671_v41 = vmul.f32 %v4849_v11, %v3891_v14  ;;  %v1772_v43 = vmul.f32 %v4858_v17, %v3916_v16 }
  0x1f   : > { %v3991_v33 = vld [vmem:[%s4756_s12 + $0x49] sm:$0xff]  ;;  %7591 = vst [vmem:[#allocation4_spill] sm:$0xff] %v4884_v37  ;;  %v4894_v45 = vld [vmem:[%s7535_s2 + $0x11] ss:$0 sm:$0xff]  ;;  %v1874_v52 = vmul.f32 %v4867_v23, %v3942_v22  ;;  %v4091_v56 = vld [vmem:[%s4756_s12 + $0x60] sm:$0xff]  ;;  %v1975_v59 = vmul.f32 %v4876_v31, %v3966_v27  ;;  %v1976_v60 = vmul.f32 %v4876_v31, %v3967_v28  ;;  %v2078_v16 = vmul.f32 %v4884_v37, %v3992_v36 }
  0x20   : > { %v1087_v57 = vadd.f32 %v1063_v44, %v985_v50  ;;  %v1088_v62 = vadd.f32 %v1064_v48, %v986_v54  ;;  %v4016_v38 = vld [vmem:[%s4756_s12 + $0x4a] sm:$0xff]  ;;  %v4017_v44 = vld [vmem:[%s4756_s12 + $0x52] sm:$0xff]  ;;  %7592 = vst [vmem:[#allocation5_spill] sm:$0xff] %v4894_v45  ;;  %v1773_v50 = vmul.f32 %v4858_v17, %v3917_v20  ;;  %v463_v0 = vmul.f32 %v4738_v2, %v4091_v56  ;;  %v4141_v20 = vld [vmem:[%s4756_s12 + $0x62] sm:$0xff] }
  0x21   : > { %v4041_v47 = vld [vmem:[%s4756_s12 + $0x4b] sm:$0xff]  ;;  %v4042_v54 = vld [vmem:[%s4756_s12 + $0x53] sm:$0xff]  ;;  %v4166_v28 = vld [vmem:[%s4756_s12 + $0x63] sm:$0xff] }
  0x22   : > { %v1188_v7 = vadd.f32 %v1164_v51, %v1087_v57  ;;  %v1189_v12 = vadd.f32 %v1165_v55, %v1088_v62  ;;  %v4900_v48 = vld [vmem:[%s7535_s2 + $0x12] ss:$0 sm:$0xff]  ;;  %v1873_v51 = vmul.f32 %v4867_v23, %v3941_v21  ;;  %v4092_v57 = vld [vmem:[%s4756_s12 + $0x68] sm:$0xff]  ;;  %v4914_v62 = vld [vmem:[%s7535_s2 + $0x13] ss:$0 sm:$0xff] }
  0x23   : > { %7593 = vst [vmem:[#allocation6_spill] sm:$0xff] %v4900_v48  ;;  %v4066_v55 = vld [vmem:[%s4756_s12 + $0x4c] sm:$0xff]  ;;  %v4923_v9 = vld [vmem:[%s7535_s2 + $0x14] ss:$0 sm:$0xff]  ;;  %v2279_v27 = vmul.f32 %v4900_v48, %v4041_v47  ;;  %v766_v47 = vmul.f32 %v4761_v5, %v4166_v28 }
  0x24   : > { %v1289_v18 = vadd.f32 %v1265_v58, %v1188_v7  ;;  %v1290_v24 = vadd.f32 %v1266_v63, %v1189_v12  ;;  %7594 = vst [vmem:[#allocation7_spill] sm:$0xff] %v4914_v62  ;;  %v4116_v63 = vld [vmem:[%s4756_s12 + $0x61] sm:$0xff]  ;;  %v2077_v7 = vmul.f32 %v4884_v37, %v3991_v33  ;;  %v4117_v12 = vld [vmem:[%s4756_s12 + $0x69] sm:$0xff] }
  0x25   : > { %7595 = vst [vmem:[#allocation8_spill] sm:$0xff] %v4923_v9  ;;  %v564_v14 = vmul.f32 %v4744_v3, %v4116_v63  ;;  %v4142_v21 = vld [vmem:[%s4756_s12 + $0x6a] sm:$0xff]  ;;  %v565_v22 = vmul.f32 %v4744_v3, %v4117_v12 }
  0x26   : > { %v1390_v29 = vadd.f32 %v1366_v8, %v1289_v18  ;;  %v1391_v34 = vadd.f32 %v1367_v13, %v1290_v24  ;;  %v4067_v8 = vld [vmem:[%s4756_s12 + $0x54] sm:$0xff]  ;;  %v464_v13 = vmul.f32 %v4738_v2, %v4092_v57  ;;  %v2178_v18 = vmul.f32 %v4894_v45, %v4016_v38 }
  0x28   : > { %v1492_v40 = vadd.f32 %v1468_v19, %v1390_v29  ;;  %v1493_v49 = vadd.f32 %v1469_v26, %v1391_v34  ;;  %v4933_v19 = vld [vmem:[%s7535_s2 + $0x15] ss:$0 sm:$0xff]  ;;  %v2179_v26 = vmul.f32 %v4894_v45, %v4017_v44  ;;  %v4167_v29 = vld [vmem:[%s4756_s12 + $0x6b] sm:$0xff]  ;;  %v2280_v34 = vmul.f32 %v4900_v48, %v4042_v54 }
  0x29   : > { %v589_v36 = vadd.f32 %v565_v22, %v464_v13  ;;  %v666_v44 = vmul.f32 %v4749_v4, %v4142_v21  ;;  %v4953_v54 = vmul.f32 %v4923_v9, %v4091_v56  ;;  %v3725_v13 = vld [vmem:[%s4756_s12 + $0x80] sm:$0xff] }
  0x2a   : > { %v1594_v58 = vadd.f32 %v1570_v30, %v1492_v40  ;;  %v1595_v1 = vadd.f32 %v1571_v35, %v1493_v49  ;;  %v588_v30 = vadd.f32 %v564_v14, %v463_v0  ;;  %v4944_v35 = vmul.f32 %v4914_v62, %v4066_v55  ;;  %v4191_v40 = vld [vmem:[%s4756_s12 + $0x64] sm:$0xff]  ;;  %v4972_v14 = vld [vmem:[%s7535_s2 + $0x17] ss:$0 sm:$0xff] }
  0x2b   : > { %v767_v55 = vmul.f32 %v4761_v5, %v4167_v29  ;;  %v867_v22 = vmul.f32 %v4766_v6, %v4191_v40 }
  0x2c   : > { %v1695_v15 = vadd.f32 %v1671_v41, %v1594_v58  ;;  %v1696_v24 = vadd.f32 %v1672_v42, %v1595_v1  ;;  %v4192_v41 = vld [vmem:[%s4756_s12 + $0x6c] sm:$0xff]  ;;  %v665_v42 = vmul.f32 %v4749_v4, %v4141_v20  ;;  %v3724_v58 = vld [vmem:[%s4756_s12 + $0x78] sm:$0xff]  ;;  %v4963_v1 = vmul.f32 %v4923_v9, %v4092_v57 }
  0x2e   : > { %v1796_v33 = vadd.f32 %v1772_v43, %v1695_v15  ;;  %v1797_v38 = vadd.f32 %v1773_v50, %v1696_v24  ;;  %v2381_v43 = vmul.f32 %v4914_v62, %v4067_v8  ;;  %v4958_v50 = vld [vmem:[%s7535_s2 + $0x16] ss:$0 sm:$0xff]  ;;  %v689_v8 = vadd.f32 %v665_v42, %v588_v30  ;;  %v3749_v24 = vld [vmem:[%s4756_s12 + $0x79] sm:$0xff] }
  0x2f   : > { %v690_v15 = vadd.f32 %v666_v44, %v589_v36  ;;  %v4983_v42 = vmul.f32 %v4958_v50, %v4141_v20  ;;  %v4988_v36 = vld [vmem:[%s7535_s2 + $0x18] ss:$0 sm:$0xff]  ;;  %v3775_v20 = vld [vmem:[%s4756_s12 + $0x82] sm:$0xff] }
  0x30   : > { %v1897_v49 = vadd.f32 %v1873_v51, %v1796_v33  ;;  %v1898_v0 = vadd.f32 %v1874_v52, %v1797_v38  ;;  %v4966_v51 = vmul.f32 %v4933_v19, %v4116_v63  ;;  %v868_v52 = vmul.f32 %v4766_v6, %v4192_v41  ;;  %v3750_v33 = vld [vmem:[%s4756_s12 + $0x81] sm:$0xff] }
  0x31   : > { %v4978_v63 = vmul.f32 %v4933_v19, %v4117_v12  ;;  %v790_v30 = vadd.f32 %v766_v47, %v689_v8  ;;  %v791_v44 = vadd.f32 %v767_v55, %v690_v15  ;;  %v3774_v12 = vld [vmem:[%s4756_s12 + $0x7a] sm:$0xff]  ;;  %v4998_v8 = vmul.f32 %v4972_v14, %v4166_v28 }
  0x32   : > { %v1999_v56 = vadd.f32 %v1975_v59, %v1897_v49  ;;  %v2000_v57 = vadd.f32 %v1976_v60, %v1898_v0  ;;  %v969_v59 = vmul.f32 %v4788_v25, %v3724_v58  ;;  %v970_v60 = vmul.f32 %v4788_v25, %v3725_v13 }
  0x33   : > { %v4993_v49 = vmul.f32 %v4958_v50, %v4142_v21  ;;  %v891_v58 = vadd.f32 %v867_v22, %v790_v30  ;;  %v892_v55 = vadd.f32 %v868_v52, %v791_v44  ;;  %v1072_v13 = vmul.f32 %v4797_v32, %v3750_v33  ;;  %v3849_v33 = vld [vmem:[%s4756_s12 + $0x90] sm:$0xff] }
  0x34   : > { %v2101_v38 = vadd.f32 %v2077_v7, %v1999_v56  ;;  %v2102_v47 = vadd.f32 %v2078_v16, %v2000_v57  ;;  %v1071_v7 = vmul.f32 %v4797_v32, %v3749_v24  ;;  %v3799_v56 = vld [vmem:[%s4756_s12 + $0x7b] sm:$0xff]  ;;  %v5003_v16 = vmul.f32 %v4972_v14, %v4167_v29  ;;  %v3800_v24 = vld [vmem:[%s4756_s12 + $0x83] sm:$0xff] }
  0x35   : > { %v993_v21 = vadd.f32 %v969_v59, %v891_v58  ;;  %v1172_v22 = vmul.f32 %v4806_v39, %v3774_v12  ;;  %v3824_v57 = vld [vmem:[%s4756_s12 + $0x7c] sm:$0xff]  ;;  %v5009_v28 = vmul.f32 %v4988_v36, %v4191_v40  ;;  %v994_v52 = vadd.f32 %v970_v60, %v892_v55  ;;  %v3874_v12 = vld [vmem:[%s4756_s12 + $0x91] sm:$0xff] }
  0x36   : > { %v2202_v0 = vadd.f32 %v2178_v18, %v2101_v38  ;;  %v2203_v15 = vadd.f32 %v2179_v26, %v2102_v47  ;;  %v1173_v30 = vmul.f32 %v4806_v39, %v3775_v20  ;;  %v3825_v26 = vld [vmem:[%s4756_s12 + $0x84] sm:$0xff]  ;;  %v5015_v29 = vmul.f32 %v4988_v36, %v4192_v41  ;;  %v3899_v20 = vld [vmem:[%s4756_s12 + $0x92] sm:$0xff] }
  0x37   : > { %v1095_v59 = vadd.f32 %v1071_v7, %v993_v21  ;;  %v1273_v44 = vmul.f32 %v4815_v46, %v3799_v56  ;;  %v1096_v47 = vadd.f32 %v1072_v13, %v994_v52  ;;  %v1274_v60 = vmul.f32 %v4815_v46, %v3800_v24  ;;  %v3900_v56 = vld [vmem:[%s4756_s12 + $0x9a] sm:$0xff] }
  0x38   : > { %v2303_v18 = vadd.f32 %v2279_v27, %v2202_v0  ;;  %v2304_v38 = vadd.f32 %v2280_v34, %v2203_v15  ;;  %v3850_v27 = vld [vmem:[%s4756_s12 + $0x98] sm:$0xff]  ;;  %v1374_v58 = vmul.f32 %v4824_v53, %v3824_v57  ;;  %v1375_v0 = vmul.f32 %v4824_v53, %v3825_v26 }
  0x39   : > { %v3875_v34 = vld [vmem:[%s4756_s12 + $0x99] sm:$0xff]  ;;  %v1196_v7 = vadd.f32 %v1172_v22, %v1095_v59  ;;  %v1476_v55 = vmul.f32 %v4834_v61, %v3849_v33  ;;  %v1197_v15 = vadd.f32 %v1173_v30, %v1096_v47  ;;  %v1477_v21 = vmul.f32 %v4834_v61, %v3850_v27 }
  0x3a   : > { %v2404_v40 = vadd.f32 %v4944_v35, %v2303_v18  ;;  %v2405_v41 = vadd.f32 %v2381_v43, %v2304_v38  ;;  %v3924_v35 = vld [vmem:[%s4756_s12 + $0x93] sm:$0xff]  ;;  %v1578_v24 = vmul.f32 %v4844_v10, %v3874_v12  ;;  %v3925_v57 = vld [vmem:[%s4756_s12 + $0x9b] sm:$0xff]  ;;  %v1579_v52 = vmul.f32 %v4844_v10, %v3875_v34 }
  0x3b   : > { %v3949_v43 = vld [vmem:[%s4756_s12 + $0x94] sm:$0xff]  ;;  %v1297_v18 = vadd.f32 %v1273_v44, %v1196_v7  ;;  %v1679_v26 = vmul.f32 %v4849_v11, %v3899_v20  ;;  %v3950_v33 = vld [vmem:[%s4756_s12 + $0x9c] sm:$0xff]  ;;  %v1298_v38 = vadd.f32 %v1274_v60, %v1197_v15  ;;  %v1680_v59 = vmul.f32 %v4849_v11, %v3900_v56  ;;  %v4024_v20 = vld [vmem:[%s4756_s12 + $0xaa] sm:$0xff] }
  0x3c   : > { %v2506_v13 = vadd.f32 %v4953_v54, %v2404_v40  ;;  %v2507_v22 = vadd.f32 %v4963_v1, %v2405_v41  ;;  %v3974_v54 = vld [vmem:[%s4756_s12 + $0xa8] sm:$0xff]  ;;  %v1780_v27 = vmul.f32 %v4858_v17, %v3924_v35  ;;  %v3975_v12 = vld [vmem:[%s4756_s12 + $0xb0] sm:$0xff]  ;;  %v1781_v47 = vmul.f32 %v4858_v17, %v3925_v57 }
  0x3d   : > { %v3999_v1 = vld [vmem:[%s4756_s12 + $0xa9] sm:$0xff]  ;;  %v1398_v40 = vadd.f32 %v1374_v58, %v1297_v18  ;;  %v5047_v34 = vmul.f32 %v4867_v23, %v3949_v43  ;;  %v1399_v41 = vadd.f32 %v1375_v0, %v1298_v38  ;;  %v5053_v7 = vmul.f32 %v4867_v23, %v3950_v33  ;;  %v4075_v33 = vld [vmem:[%s4756_s12 + $0xb4] sm:$0xff] }
  0x3e   : > { %v2607_v30 = vadd.f32 %v4966_v51, %v2506_v13  ;;  %v2608_v44 = vadd.f32 %v4978_v63, %v2507_v22  ;;  %v4000_v51 = vld [vmem:[%s4756_s12 + $0xb1] sm:$0xff]  ;;  %v5056_v56 = vmul.f32 %v4876_v31, %v3974_v54  ;;  %v5062_v15 = vmul.f32 %v4876_v31, %v3975_v12  ;;  %v5073_v22 = vld [vmem:[%s7536_s3] ss:$0 sm:$0xff] }
  0x3f   : > { %v4025_v63 = vld [vmem:[%s4756_s12 + $0xb2] sm:$0xff]  ;;  %v1500_v13 = vadd.f32 %v1476_v55, %v1398_v40  ;;  %v5065_v57 = vmul.f32 %v4884_v37, %v3999_v1  ;;  %v5076_v55 = vmul.f32 %v4884_v37, %v4000_v51  ;;  %v5079_v18 = vmul.f32 %v4894_v45, %v4024_v20  ;;  %v4124_v40 = vld [vmem:[%s4756_s12 + $0xc1] sm:$0xff] }
  0x40   : > { %v2708_v60 = vadd.f32 %v4983_v42, %v2607_v30  ;;  %v4049_v58 = vld [vmem:[%s4756_s12 + $0xab] sm:$0xff]  ;;  %v2709_v35 = vadd.f32 %v4993_v49, %v2608_v44  ;;  %v4050_v42 = vld [vmem:[%s4756_s12 + $0xb3] sm:$0xff]  ;;  %v1501_v49 = vadd.f32 %v1477_v21, %v1399_v41  ;;  %v5110_v41 = vld [vmem:[%s4756_s12 + $0xc2] sm:$0xff] }
  0x41   : > { %v4074_v0 = vld [vmem:[%s4756_s12 + $0xac] sm:$0xff]  ;;  %v1602_v30 = vadd.f32 %v1578_v24, %v1500_v13  ;;  %v5087_v38 = vmul.f32 %v4900_v48, %v4049_v58  ;;  %v5091_v1 = vmul.f32 %v4900_v48, %v4050_v42 }
  0x42   : > { %v2809_v43 = vadd.f32 %v4998_v8, %v2708_v60  ;;  %v2810_v54 = vadd.f32 %v5003_v16, %v2709_v35  ;;  %v5084_v8 = vmul.f32 %v4894_v45, %v4025_v63  ;;  %v1603_v12 = vadd.f32 %v1579_v52, %v1501_v49  ;;  %v4099_v16 = vld [vmem:[%s4756_s12 + $0xc0] sm:$0xff]  ;;  %v4100_v24 = vld [vmem:[%s4756_s12 + $0xc8] sm:$0xff]  ;;  %v3705_v48 = vld [vmem:[%s4756_s12 + $0x150] sm:$0xff] }
  0x43   : > { %v5094_v44 = vmul.f32 %v4914_v62, %v4074_v0  ;;  %v1703_v20 = vadd.f32 %v1679_v26, %v1602_v30  ;;  %v5101_v60 = vmul.f32 %v4914_v62, %v4075_v33  ;;  %v5107_v52 = vld [vmem:[%s4756_s12 + $0xc9] sm:$0xff]  ;;  %v5113_v63 = vld [vmem:[%s4756_s12 + $0x120] sm:$0xff]  ;;  %v5122_v26 = vmul.f32 %v4933_v19, %v4124_v40  ;;  %v3702_v0 = vld [vmem:[%s4756_s12 + $0x138] sm:$0xff]  ;;  %396 = vst.msk [vmem:[#allocation2 + $0x30] sm:$0xff] %vm388_vm1, %v3705_v48 }
  0x44   : > { %v2910_v21 = vadd.f32 %v5009_v28, %v2809_v43  ;;  %v2911_v51 = vadd.f32 %v5015_v29, %v2810_v54  ;;  %v5104_v28 = vmul.f32 %v4923_v9, %v4099_v16  ;;  %7596 = vst [vmem:[#allocation9_spill] sm:$0xff] %v5113_v63  ;;  %v1704_v35 = vadd.f32 %v1680_v59, %v1603_v12  ;;  %v5125_v13 = vld [vmem:[%s4756_s12 + $0xca] sm:$0xff]  ;;  %v3703_v54 = vld [vmem:[%s4756_s12 + $0x140] sm:$0xff] }
  0x45   : > { %v5119_v29 = vmul.f32 %v4923_v9, %v4100_v24  ;;  %v5128_v42 = vld [vmem:[%s4756_s12 + $0x128] sm:$0xff]  ;;  %389 = vst.msk [vmem:[#allocation2] sm:$0xff] %vm388_vm1, %v5113_v63  ;;  %v1804_v59 = vadd.f32 %v1780_v27, %v1703_v20  ;;  %v471_v49 = vmul.f32 %v4738_v2, %v4099_v16  ;;  %v472_v33 = vmul.f32 %v4738_v2, %v4100_v24  ;;  %v3701_v16 = vld [vmem:[%s4756_s12 + $0x130] sm:$0xf]  ;;  %v3733_v62 = vld [vmem:[%s4756_s12 + $0xe0] sm:$0xff] }
  0x46   : > { %v5116_v58 = vadd.f32 %v5073_v22, %v2910_v21  ;;  %7597 = vst [vmem:[#allocation10_spill] sm:$0xff] %v5128_v42  ;;  %v5134_v43 = vadd.f32 %v5073_v22, %v2911_v51  ;;  %v1805_v21 = vadd.f32 %v1781_v47, %v1704_v35  ;;  %v5143_v12 = vld [vmem:[%s4756_s12 + $0xc3] sm:$0xff]  ;;  %v5146_v9 = vld [vmem:[%s4756_s12 + $0xcb] sm:$0xff]  ;;  %v572_v51 = vmul.f32 %v4744_v3, %v4124_v40 }
  0x47   : > { %390 = vst.msk [vmem:[#allocation2 + $0x8] sm:$0xff] %vm388_vm1, %v5128_v42  ;;  %v573_v27 = vmul.f32 %v4744_v3, %v5107_v52  ;;  %v1905_v47 = vadd.f32 %v5047_v34, %v1804_v59  ;;  %v5156_v20 = vld [vmem:[%s4756_s12 + $0xc4] sm:$0xff]  ;;  %v5159_v35 = vld [vmem:[%s4756_s12 + $0xcc] sm:$0xff]  ;;  %v673_v40 = vmul.f32 %v4749_v4, %v5110_v41  ;;  %v674_v3 = vmul.f32 %v4749_v4, %v5125_v13  ;;  %v3732_v59 = vld [vmem:[%s4756_s12 + $0xd8] sm:$0xff] }
  0x48   : > { %v2994_v30 = vsub.f32 0.0, %v5116_v58  ;;  %393 = vst.msk [vmem:[#allocation2 + $0x18] sm:$0xff] %vm388_vm1, %v3702_v0  ;;  %v2995_v24 = vsub.f32 0.0, %v5134_v43  ;;  %v3704_v2 = vld [vmem:[%s4756_s12 + $0x148] sm:$0xf]  ;;  %v1906_v42 = vadd.f32 %v5053_v7, %v1805_v21  ;;  %v596_v63 = vadd.f32 %v572_v51, %v471_v49  ;;  %v3757_v7 = vld [vmem:[%s4756_s12 + $0xd9] sm:$0xff] }
  0x49   : > { %394 = vst.msk [vmem:[#allocation2 + $0x20] sm:$0xff] %vm388_vm1, %v3703_v54  ;;  %v597_v34 = vadd.f32 %v573_v27, %v472_v33  ;;  %v2007_v37 = vadd.f32 %v5056_v56, %v1905_v47  ;;  %v774_v4 = vmul.f32 %v4761_v5, %v5143_v12  ;;  %v775_v54 = vmul.f32 %v4761_v5, %v5146_v9  ;;  %v3706_v49 = vld [vmem:[%s4756_s12 + $0x158] sm:$0xff]  ;;  %v3707_v56 = vld [vmem:[%s4756_s12 + $0x160] sm:$0xf] }
  0x4a   : > { %v3026_v0 = vmul.f32 1.442695, %v2994_v30  ;;  %v3028_v45 = vmul.f32 1.442695, %v2995_v24  ;;  %392 = vst.msk [vmem:[#allocation2 + $0x10] sm:$0xf] %vm391_vm2, %v3701_v16  ;;  %v2008_v33 = vadd.f32 %v5062_v15, %v1906_v42  ;;  %v697_v30 = vadd.f32 %v673_v40, %v596_v63 }
  0x4b   : > { %v698_v21 = vadd.f32 %v674_v3, %v597_v34  ;;  %395 = vst.msk [vmem:[#allocation2 + $0x28] sm:$0xf] %vm391_vm2, %v3704_v2  ;;  %v2109_v51 = vadd.f32 %v5065_v57, %v2007_v37  ;;  %v875_v5 = vmul.f32 %v4766_v6, %v5156_v20  ;;  %v876_v27 = vmul.f32 %v4766_v6, %v5159_v35  ;;  %v3758_v16 = vld [vmem:[%s4756_s12 + $0xe1] sm:$0xff]  ;;  %v3709_v63 = vld [vmem:[%s4756_s12 + $0x170] sm:$0xff]  ;;  %v3710_v40 = vld [vmem:[%s4756_s12 + $0x178] sm:$0xf] }
  0x4c   : > { %4293 = vpow2.f32 %v3026_v0  ;;  %v3708_v15 = vld [vmem:[%s4756_s12 + $0x168] sm:$0xff]  ;;  %v2110_v2 = vadd.f32 %v5076_v55, %v2008_v33  ;;  %v798_v37 = vadd.f32 %v774_v4, %v697_v30  ;;  %v977_v57 = vmul.f32 %v4788_v25, %v3732_v59  ;;  %v3782_v6 = vld [vmem:[%s4756_s12 + $0xda] sm:$0xff]  ;;  %397 = vst.msk [vmem:[#allocation2 + $0x38] sm:$0xff] %vm388_vm1, %v3706_v49 }
  0x4d   : > { %4295 = vpow2.f32 %v3028_v45  ;;  %v799_v45 = vadd.f32 %v775_v54, %v698_v21  ;;  %v2210_v42 = vadd.f32 %v5079_v18, %v2109_v51  ;;  %v2592_v24 = vmul.f32 %v4933_v19, %v5107_v52  ;;  %v3783_v47 = vld [vmem:[%s4756_s12 + $0xe2] sm:$0xff]  ;;  %398 = vst.msk [vmem:[#allocation2 + $0x40] sm:$0xf] %vm391_vm2, %v3707_v56 }
  0x4e   : > { %v978_v48 = vmul.f32 %v4788_v25, %v3733_v62  ;;  %v1079_v55 = vmul.f32 %v4797_v32, %v3757_v7  ;;  %v2211_v3 = vadd.f32 %v5084_v8, %v2110_v2  ;;  %v899_v0 = vadd.f32 %v875_v5, %v798_v37  ;;  %v3807_v18 = vld [vmem:[%s4756_s12 + $0xdb] sm:$0xff]  ;;  %v3808_v4 = vld [vmem:[%s4756_s12 + $0xe3] sm:$0xff]  ;;  %399 = vst.msk [vmem:[#allocation2 + $0x48] sm:$0xff] %vm388_vm1, %v3708_v15  ;;  %v3857_v37 = vld [vmem:[%s4756_s12 + $0xf0] sm:$0xff] }
  0x4f   : > { %v900_v34 = vadd.f32 %v876_v27, %v799_v45  ;;  %v1080_v59 = vmul.f32 %v4797_v32, %v3758_v16  ;;  %v402_v25 = vld [vmem:[%s5193_s30] sm:$0xff]  ;;  %v2311_v62 = vadd.f32 %v5087_v38, %v2210_v42  ;;  %v2692_v52 = vmul.f32 %v4958_v50, %v5110_v41  ;;  %400 = vst.msk [vmem:[#allocation2 + $0x50] sm:$0xff] %vm388_vm1, %v3709_v63  ;;  %v403_v32 = vld [vmem:[%s5193_s30 + $0x8] sm:$0xff]  ;;  %v404_v41 = vld [vmem:[%s5193_s30 + $0x10] sm:$0xf] }
  0x50   : > { %v2693_v8 = vmul.f32 %v4958_v50, %v5125_v13  ;;  %v1180_v54 = vmul.f32 %v4806_v39, %v3782_v6  ;;  %v2312_v49 = vadd.f32 %v5091_v1, %v2211_v3  ;;  %v1001_v33 = vadd.f32 %v977_v57, %v899_v0  ;;  %v3832_v38 = vld [vmem:[%s4756_s12 + $0xdc] sm:$0xff]  ;;  %v3833_v56 = vld [vmem:[%s4756_s12 + $0xe4] sm:$0xff]  ;;  %401 = vst.msk [vmem:[#allocation2 + $0x58] sm:$0xf] %vm391_vm2, %v3710_v40  ;;  %v3882_v42 = vld [vmem:[%s4756_s12 + $0xf1] sm:$0xff] }
  0x51   : > { %v1002_v30 = vadd.f32 %v978_v48, %v900_v34  ;;  %v1181_v21 = vmul.f32 %v4806_v39, %v3783_v47  ;;  %v2412_v5 = vadd.f32 %v5094_v44, %v2311_v62  ;;  %v1281_v27 = vmul.f32 %v4815_v46, %v3807_v18  ;;  %415 = vst.msk [vmem:[#allocation2 + $0x60] sm:$0xff] %vm388_vm1, %v402_v25  ;;  %v3883_v47 = vld [vmem:[%s4756_s12 + $0xf9] sm:$0xff] }
  0x52   : > { %v4294_v7 = vpop.eup %4293  ;;  %v1282_v16 = vmul.f32 %v4815_v46, %v3808_v4  ;;  %v2413_v39 = vadd.f32 %v5101_v60, %v2312_v49  ;;  %v1103_v15 = vadd.f32 %v1079_v55, %v1001_v33  ;;  %416 = vst.msk [vmem:[#allocation2 + $0x68] sm:$0xff] %vm388_vm1, %v403_v32  ;;  %v1382_v44 = vmul.f32 %v4824_v53, %v3832_v38  ;;  %v3858_v46 = vld [vmem:[%s4756_s12 + $0xf8] sm:$0xff]  ;;  %v3982_v38 = vld [vmem:[%s4756_s12 + $0x108] sm:$0xff] }
  0x53   : > { %v4296_v51 = vpop.eup %4295  ;;  %v3090_v13 = vadd.f32 1.0, %v4294_v7  ;;  %v1104_v2 = vadd.f32 %v1080_v59, %v1002_v30  ;;  %v2514_v45 = vadd.f32 %v5104_v28, %v2412_v5  ;;  %v1383_v57 = vmul.f32 %v4824_v53, %v3833_v56  ;;  %417 = vst.msk [vmem:[#allocation2 + $0x70] sm:$0xf] %vm391_vm2, %v404_v41  ;;  %v3907_v34 = vld [vmem:[%s4756_s12 + $0xf2] sm:$0xff]  ;;  %v3908_v59 = vld [vmem:[%s4756_s12 + $0xfa] sm:$0xff] }
  0x54   : > { %v3091_v1 = vadd.f32 1.0, %v4296_v51  ;;  %v2515_v60 = vadd.f32 %v5119_v29, %v2413_v39  ;;  %v1204_v6 = vadd.f32 %v1180_v54, %v1103_v15  ;;  %v2793_v28 = vmul.f32 %v4972_v14, %v5143_v12  ;;  %v3933_v54 = vld [vmem:[%s4756_s12 + $0xfb] sm:$0xff]  ;;  %v4008_v39 = vld [vmem:[%s4756_s12 + $0x111] sm:$0xff] }
  0x55   : > { %4297 = vrcp.f32 %v3090_v13  ;;  %v1205_v63 = vadd.f32 %v1181_v21, %v1104_v2  ;;  %v2615_v48 = vadd.f32 %v5122_v26, %v2514_v45  ;;  %v2794_v55 = vmul.f32 %v4972_v14, %v5146_v9  ;;  %v3957_v49 = vld [vmem:[%s4756_s12 + $0xf4] sm:$0xff]  ;;  %v4032_v15 = vld [vmem:[%s4756_s12 + $0x10a] sm:$0xff] }
  0x56   : > { %4299 = vrcp.f32 %v3091_v1  ;;  %v1484_v53 = vmul.f32 %v4834_v61, %v3857_v37  ;;  %v2616_v40 = vadd.f32 %v2592_v24, %v2515_v60  ;;  %v1305_v3 = vadd.f32 %v1281_v27, %v1204_v6  ;;  %v3983_v13 = vld [vmem:[%s4756_s12 + $0x110] sm:$0xff] }
  0x57   : > { %v1306_v0 = vadd.f32 %v1282_v16, %v1205_v63  ;;  %v1485_v29 = vmul.f32 %v4834_v61, %v3858_v46  ;;  %v2716_v26 = vadd.f32 %v2692_v52, %v2615_v48  ;;  %v2894_v12 = vmul.f32 %v4988_v36, %v5156_v20  ;;  %v3932_v61 = vld [vmem:[%s4756_s12 + $0xf3] sm:$0xff]  ;;  %v4007_v1 = vld [vmem:[%s4756_s12 + $0x109] sm:$0xff] }
  0x58   : > { %v2895_v9 = vmul.f32 %v4988_v36, %v5159_v35  ;;  %v1586_v18 = vmul.f32 %v4844_v10, %v3882_v42  ;;  %v2717_v4 = vadd.f32 %v2693_v8, %v2616_v40  ;;  %v1406_v25 = vadd.f32 %v1382_v44, %v1305_v3  ;;  %v4033_v45 = vld [vmem:[%s4756_s12 + $0x112] sm:$0xff] }
  0x59   : > { %v1407_v24 = vadd.f32 %v1383_v57, %v1306_v0  ;;  %v1587_v62 = vmul.f32 %v4844_v10, %v3883_v47  ;;  %v2817_v52 = vadd.f32 %v2793_v28, %v2716_v26  ;;  %v1687_v7 = vmul.f32 %v4849_v11, %v3907_v34  ;;  %v3958_v10 = vld [vmem:[%s4756_s12 + $0xfc] sm:$0xff]  ;;  %v4057_v6 = vld [vmem:[%s4756_s12 + $0x10b] sm:$0xff]  ;;  %v4058_v63 = vld [vmem:[%s4756_s12 + $0x113] sm:$0xff] }
  0x5a   : > { %v1688_v20 = vmul.f32 %v4849_v11, %v3908_v59  ;;  %v2818_v33 = vadd.f32 %v2794_v55, %v2717_v4  ;;  %v1508_v30 = vadd.f32 %v1484_v53, %v1406_v25  ;;  %v1788_v51 = vmul.f32 %v4858_v17, %v3932_v61  ;;  %v4082_v42 = vld [vmem:[%s4756_s12 + $0x10c] sm:$0xff]  ;;  %v4083_v40 = vld [vmem:[%s4756_s12 + $0x114] sm:$0xff]  ;;  %v503_v34 = vld [vmem:[#allocation2] sm:$0xff] }
  0x5b   : > { %v4298_v32 = vpop.eup %4297  ;;  %v1509_v21 = vadd.f32 %v1485_v29, %v1407_v24  ;;  %v2918_v41 = vadd.f32 %v2894_v12, %v2817_v52  ;;  %v1789_v11 = vmul.f32 %v4858_v17, %v3933_v54  ;;  %v1889_v16 = vmul.f32 %v4867_v23, %v3957_v49  ;;  %v7598_v28 = vld [vmem:[#allocation4_spill] sm:$0xff]  ;;  %v7599_v53 = vld [vmem:[#allocation5_spill] sm:$0xff]  ;;  %v7600_v26 = vld [vmem:[#allocation6_spill] sm:$0xff] }
  0x5c   : > { %v4300_v35 = vpop.eup %4299  ;;  %v3154_v8 = vmul.f32 %v4298_v32, %v5116_v58  ;;  %v2919_v5 = vadd.f32 %v2895_v9, %v2818_v33  ;;  %v1610_v27 = vadd.f32 %v1586_v18, %v1508_v30  ;;  %v1890_v37 = vmul.f32 %v4867_v23, %v3958_v10  ;;  %v7601_v18 = vld [vmem:[#allocation7_spill] sm:$0xff]  ;;  %v504_v25 = vld [vmem:[#allocation2 + $0x8] sm:$0xff]  ;;  %v7602_v49 = vld [vmem:[#allocation9_spill] sm:$0xff] }
  0x5d   : > { %v3155_v56 = vmul.f32 %v4300_v35, %v5134_v43  ;;  %v1611_v58 = vadd.f32 %v1587_v62, %v1509_v21  ;;  %v5277_v43 = vadd.f32 %v5073_v22, %v2918_v41  ;;  %v1991_v17 = vmul.f32 %v4876_v31, %v3982_v38  ;;  %v604_v24 = vld [vmem:[#allocation2 + $0x1] sm:$0xff]  ;;  %v605_v52 = vld [vmem:[#allocation2 + $0x9] sm:$0xff]  ;;  %v7604_v33 = vld [vmem:[#allocation10_spill] sm:$0xff] }
  0x5e   : > { %v5283_v44 = vadd.f32 %v5073_v22, %v2919_v5  ;;  %v1711_v57 = vadd.f32 %v1687_v7, %v1610_v27  ;;  %v1992_v60 = vmul.f32 %v4876_v31, %v3983_v13  ;;  %v2093_v55 = vmul.f32 %v7598_v28, %v4007_v1  ;;  %v705_v7 = vld [vmem:[#allocation2 + $0x2] sm:$0xff]  ;;  %v807_v27 = vld [vmem:[#allocation2 + $0xb] sm:$0xff]  ;;  %v5327_v1 = vld [vmem:[%s7535_s2 + $0x1] ss:$0 sm:$0xff] }
  0x5f   : > { %v3186_v2 = vpack.c.bf16 %v3155_v56, %v3154_v8  ;;  %v1712_v46 = vadd.f32 %v1688_v20, %v1611_v58  ;;  %v3002_v48 = vsub.f32 0.0, %v5277_v43  ;;  %v2094_v23 = vmul.f32 %v7598_v28, %v4008_v39  ;;  %v706_v20 = vld [vmem:[#allocation2 + $0xa] sm:$0xff]  ;;  %v4132_v21 = vld [vmem:[%s4756_s12 + $0x121] sm:$0xff]  ;;  %7607 = vst [vmem:[#allocation5_spill] sm:$0xff] %v5327_v1 }
  0x60   : > { %v2194_v47 = vmul.f32 %v7599_v53, %v4032_v15  ;;  %v3003_v3 = vsub.f32 0.0, %v5283_v44  ;;  %v1812_v0 = vadd.f32 %v1788_v51, %v1711_v57  ;;  %v2195_v31 = vmul.f32 %v7599_v53, %v4033_v45  ;;  %v7603_v35 = vld [vmem:[#allocation8_spill] sm:$0xff]  ;;  %v7605_v38 = vld [vmem:[#allocation3_spill] sm:$0xff] }
  0x61   : > { %4215 = vmatmul.msk.bf16.vlgmr.msra.gmra.mxu0 %vm388_vm1, %v3186_v2  ;;  %v1813_v29 = vadd.f32 %v1789_v11, %v1712_v46  ;;  %v3042_v59 = vmul.f32 1.442695, %v3002_v48  ;;  %v2295_v12 = vmul.f32 %v7600_v26, %v4057_v6  ;;  %v2296_v9 = vmul.f32 %v7600_v26, %v4058_v63  ;;  %v4133_v10 = vld [vmem:[%s4756_s12 + $0x129] sm:$0xff]  ;;  %v5319_v11 = vld [vmem:[%s7535_s2] ss:$0 sm:$0xff] }
  0x62   : > { %v5300_v4 = vmul.f32 %v7601_v18, %v4082_v42  ;;  %v3044_v62 = vmul.f32 1.442695, %v3003_v3  ;;  %v1913_v61 = vadd.f32 %v1889_v16, %v1812_v0  ;;  %v5303_v32 = vmul.f32 %v7601_v18, %v4083_v40  ;;  %7606 = vst [vmem:[#allocation4_spill] sm:$0xff] %v5319_v11  ;;  %v806_v5 = vld [vmem:[#allocation2 + $0x3] sm:$0xff]  ;;  %v5334_v2 = vld [vmem:[%s7535_s2 + $0x2] ss:$0 sm:$0xff] }
  0x63   : > { %v1914_v54 = vadd.f32 %v1890_v37, %v1813_v29  ;;  %4301 = vpow2.f32 %v3042_v59  ;;  %v5307_v8 = vmul.f32 %v7603_v35, %v7602_v49  ;;  %v5311_v30 = vmul.f32 %v7603_v35, %v7604_v33  ;;  %v4157_v58 = vld [vmem:[%s4756_s12 + $0x122] sm:$0xff]  ;;  %v4158_v16 = vld [vmem:[%s4756_s12 + $0x12a] sm:$0xff]  ;;  %7608 = vst [vmem:[#allocation6_spill] sm:$0xff] %v5334_v2  ;;  %v1010_v3 = vld [vmem:[#allocation2 + $0x18] sm:$0xff] }
  0x64   : > { %v511_v56 = vmul.f32 %v7605_v38, %v503_v34  ;;  %4303 = vpow2.f32 %v3044_v62  ;;  %v2015_v41 = vadd.f32 %v1991_v17, %v1913_v61  ;;  %v512_v13 = vmul.f32 %v5319_v11, %v504_v25  ;;  %v907_v6 = vld [vmem:[#allocation2 + $0x4] sm:$0xff]  ;;  %v908_v63 = vld [vmem:[#allocation2 + $0xc] sm:$0xff]  ;;  %v5343_v28 = vld [vmem:[%s7535_s2 + $0x3] ss:$0 sm:$0xff] }
  0x65   : > { %v2016_v51 = vadd.f32 %v1992_v60, %v1914_v54  ;;  %v612_v39 = vmul.f32 %v5327_v1, %v604_v24  ;;  %v613_v15 = vmul.f32 %v5327_v1, %v605_v52  ;;  %v713_v37 = vmul.f32 %v5334_v2, %v705_v7  ;;  %v1011_v29 = vld [vmem:[#allocation2 + $0x20] sm:$0xff]  ;;  %v4183_v35 = vld [vmem:[%s4756_s12 + $0x12b] sm:$0xff] }
  0x66   : > { %v714_v17 = vmul.f32 %v5334_v2, %v706_v20  ;;  %v2117_v45 = vadd.f32 %v2093_v55, %v2015_v41  ;;  %v2599_v46 = vmul.f32 %v4933_v19, %v4132_v21  ;;  %v2600_v60 = vmul.f32 %v4933_v19, %v4133_v10  ;;  %v5352_v18 = vld [vmem:[%s7535_s2 + $0x4] ss:$0 sm:$0xff]  ;;  %v5359_v54 = vld [vmem:[%s7535_s2 + $0x5] ss:$0 sm:$0xff]  ;;  %v5370_v38 = vld [vmem:[%s7535_s2 + $0x6] ss:$0 sm:$0xff] }
  0x67   : > { %v2118_v57 = vadd.f32 %v2094_v23, %v2016_v51  ;;  %v620_v42 = vadd.f32 %v612_v39, %v511_v56  ;;  %v621_v48 = vadd.f32 %v613_v15, %v512_v13  ;;  %v814_v53 = vmul.f32 %v5343_v28, %v806_v5  ;;  %v1112_v7 = vld [vmem:[#allocation2 + $0x21] sm:$0xff]  ;;  %v4208_v5 = vld [vmem:[%s4756_s12 + $0x12c] sm:$0xff] }
  0x68   : > { %v815_v40 = vmul.f32 %v5343_v28, %v807_v27  ;;  %v2218_v55 = vadd.f32 %v2194_v47, %v2117_v45  ;;  %v2700_v0 = vmul.f32 %v4958_v50, %v4157_v58  ;;  %v2701_v19 = vmul.f32 %v4958_v50, %v4158_v16  ;;  %v4182_v49 = vld [vmem:[%s4756_s12 + $0x123] sm:$0xff]  ;;  %v1212_v41 = vld [vmem:[#allocation2 + $0x1a] sm:$0xff] }
  0x69   : > { %v2219_v23 = vadd.f32 %v2195_v31, %v2118_v57  ;;  %v4302_v34 = vpop.eup %4301  ;;  %v721_v59 = vadd.f32 %v713_v37, %v620_v42  ;;  %v722_v26 = vadd.f32 %v714_v17, %v621_v48  ;;  %v915_v25 = vmul.f32 %v5352_v18, %v907_v6  ;;  %v1111_v31 = vld [vmem:[#allocation2 + $0x19] sm:$0xff]  ;;  %v1213_v51 = vld [vmem:[#allocation2 + $0x22] sm:$0xff] }
  0x6a   : > { %v916_v47 = vmul.f32 %v5352_v18, %v908_v63  ;;  %v4304_v24 = vpop.eup %4303  ;;  %v3098_v62 = vadd.f32 1.0, %v4302_v34  ;;  %v2319_v61 = vadd.f32 %v2295_v12, %v2218_v55  ;;  %v1018_v52 = vmul.f32 %v5359_v54, %v1010_v3  ;;  %v4207_v13 = vld [vmem:[%s4756_s12 + $0x124] sm:$0xff]  ;;  %v1313_v37 = vld [vmem:[#allocation2 + $0x1b] sm:$0xff]  ;;  %v1517_v3 = vld [vmem:[#allocation2 + $0x30] sm:$0xff] }
  0x6b   : > { %v2320_v50 = vadd.f32 %v2296_v9, %v2219_v23  ;;  %v3099_v20 = vadd.f32 1.0, %v4304_v24  ;;  %v822_v33 = vadd.f32 %v814_v53, %v721_v59  ;;  %v823_v21 = vadd.f32 %v815_v40, %v722_v26  ;;  %v1314_v17 = vld [vmem:[#allocation2 + $0x23] sm:$0xff]  ;;  %v1518_v26 = vld [vmem:[#allocation2 + $0x38] sm:$0xff] }
  0x6c   : > { %v1019_v10 = vmul.f32 %v5359_v54, %v1011_v29  ;;  %4305 = vrcp.f32 %v3098_v62  ;;  %v2420_v12 = vadd.f32 %v5300_v4, %v2319_v61  ;;  %v1119_v56 = vmul.f32 %v5370_v38, %v1111_v31  ;;  %v5383_v6 = vld [vmem:[%s7535_s2 + $0x7] ss:$0 sm:$0xff]  ;;  %v5392_v29 = vld [vmem:[%s7535_s2 + $0x8] ss:$0 sm:$0xff]  ;;  %v1618_v24 = vld [vmem:[#allocation2 + $0x31] sm:$0xff] }
  0x6d   : > { %v2421_v9 = vadd.f32 %v5303_v32, %v2320_v50  ;;  %4307 = vrcp.f32 %v3099_v20  ;;  %v923_v27 = vadd.f32 %v915_v25, %v822_v33  ;;  %v924_v58 = vadd.f32 %v916_v47, %v823_v21  ;;  %v1415_v48 = vld [vmem:[#allocation2 + $0x24] sm:$0xff]  ;;  %v1619_v62 = vld [vmem:[#allocation2 + $0x39] sm:$0xff] }
  0x6e   : > { %v1120_v16 = vmul.f32 %v5370_v38, %v1112_v7  ;;  %v2522_v4 = vadd.f32 %v5307_v8, %v2420_v12  ;;  %v2801_v39 = vmul.f32 %v4972_v14, %v4182_v49  ;;  %v2802_v15 = vmul.f32 %v4972_v14, %v4183_v35  ;;  %v1414_v8 = vld [vmem:[#allocation2 + $0x1c] sm:$0xff]  ;;  %v1719_v20 = vld [vmem:[#allocation2 + $0x32] sm:$0xff] }
  0x6f   : > { %v2523_v32 = vadd.f32 %v5311_v30, %v2421_v9  ;;  %v1026_v45 = vadd.f32 %v1018_v52, %v923_v27  ;;  %v1027_v57 = vadd.f32 %v1019_v10, %v924_v58  ;;  %v1220_v63 = vmul.f32 %v5383_v6, %v1212_v41  ;;  %v1720_v10 = vld [vmem:[#allocation2 + $0x3a] sm:$0xff] }
  0x70   : > { %v1221_v42 = vmul.f32 %v5383_v6, %v1213_v51  ;;  %v2623_v30 = vadd.f32 %v2599_v46, %v2522_v4  ;;  %v2902_v40 = vmul.f32 %v4988_v36, %v4207_v13  ;;  %v2903_v14 = vmul.f32 %v4988_v36, %v4208_v5  ;;  %v5399_v36 = vld [vmem:[%s7535_s2 + $0x9] ss:$0 sm:$0xff]  ;;  %v1820_v12 = vld [vmem:[#allocation2 + $0x33] sm:$0xff]  ;;  %v1821_v13 = vld [vmem:[#allocation2 + $0x3b] sm:$0xff] }
  0x71   : > { %v2624_v53 = vadd.f32 %v2600_v60, %v2523_v32  ;;  %v1127_v55 = vadd.f32 %v1119_v56, %v1026_v45  ;;  %v1128_v23 = vadd.f32 %v1120_v16, %v1027_v57  ;;  %v1321_v34 = vmul.f32 %v5392_v29, %v1313_v37  ;;  %v5415_v56 = vld [vmem:[%s7535_s2 + $0xb] ss:$0 sm:$0xff]  ;;  %v1921_v5 = vld [vmem:[#allocation2 + $0x34] sm:$0xff]  ;;  %v5422_v16 = vld [vmem:[%s7535_s2 + $0xc] ss:$0 sm:$0xff] }
  0x72   : > { %v1322_v59 = vmul.f32 %v5392_v29, %v1314_v17  ;;  %v4306_v25 = vpop.eup %4305  ;;  %v2724_v46 = vadd.f32 %v2700_v0, %v2623_v30  ;;  %v1422_v47 = vmul.f32 %v5399_v36, %v1414_v8  ;;  %v1423_v31 = vmul.f32 %v5399_v36, %v1415_v48  ;;  %v5407_v0 = vld [vmem:[%s7535_s2 + $0xa] ss:$0 sm:$0xff]  ;;  %v1922_v32 = vld [vmem:[#allocation2 + $0x3c] sm:$0xff]  ;;  %v5429_v45 = vld [vmem:[%s7535_s2 + $0xd] ss:$0 sm:$0xff] }
  0x73   : > { %v2725_v60 = vadd.f32 %v2701_v19, %v2624_v53  ;;  %v4308_v61 = vpop.eup %4307  ;;  %v3162_v50 = vmul.f32 %v4306_v25, %v5277_v43  ;;  %v1228_v52 = vadd.f32 %v1220_v63, %v1127_v55  ;;  %v1229_v7 = vadd.f32 %v1221_v42, %v1128_v23  ;;  %v2025_v63 = vld [vmem:[#allocation2 + $0x50] sm:$0xff]  ;;  %v5443_v53 = vld [vmem:[%s7535_s2 + $0xe] ss:$0 sm:$0xff] }
  0x74   : > { %v1525_v19 = vmul.f32 %v5407_v0, %v1517_v3  ;;  %v3163_v49 = vmul.f32 %v4308_v61, %v5283_v44  ;;  %v2825_v35 = vadd.f32 %v2801_v39, %v2724_v46  ;;  %v1526_v21 = vmul.f32 %v5407_v0, %v1518_v26  ;;  %v2024_v39 = vld [vmem:[#allocation2 + $0x48] sm:$0xff]  ;;  %v2227_v26 = vld [vmem:[#allocation2 + $0x52] sm:$0xff] }
  0x75   : > { %v2826_v33 = vadd.f32 %v2802_v15, %v2725_v60  ;;  %v1329_v9 = vadd.f32 %v1321_v34, %v1228_v52  ;;  %v1330_v43 = vadd.f32 %v1322_v59, %v1229_v7  ;;  %v1626_v41 = vmul.f32 %v5415_v56, %v1618_v24  ;;  %v2125_v42 = vld [vmem:[#allocation2 + $0x49] sm:$0xff] }
  0x76   : > { %v1627_v51 = vmul.f32 %v5415_v56, %v1619_v62  ;;  %v3190_v44 = vpack.c.bf16 %v3163_v49, %v3162_v50  ;;  %v2926_v27 = vadd.f32 %v2902_v40, %v2825_v35  ;;  %v1727_v4 = vmul.f32 %v5422_v16, %v1719_v20  ;;  %v2226_v3 = vld [vmem:[#allocation2 + $0x4a] sm:$0xff]  ;;  %v2328_v62 = vld [vmem:[#allocation2 + $0x53] sm:$0xff]  ;;  %v2530_v35 = vld [vmem:[#allocation2 + $0x60] sm:$0xff] }
  0x77   : > { %v2927_v58 = vadd.f32 %v2903_v14, %v2826_v33  ;;  %v1430_v15 = vadd.f32 %v1422_v47, %v1329_v9  ;;  %v1431_v37 = vadd.f32 %v1423_v31, %v1330_v43  ;;  %v1728_v17 = vmul.f32 %v5422_v16, %v1720_v10  ;;  %v2126_v14 = vld [vmem:[#allocation2 + $0x51] sm:$0xff]  ;;  %v5461_v31 = vld [vmem:[%s7535_s2 + $0x10] ss:$0 sm:$0xff]  ;;  %v2531_v33 = vld [vmem:[#allocation2 + $0x68] sm:$0xff] }
  0x78   : > { %v1828_v57 = vmul.f32 %v5429_v45, %v1820_v12  ;;  %4219 = vmatmul.msk.bf16.vlgmr.msra.gmra.mxu1 %vm388_vm1, %v3190_v44  ;;  %v5434_v8 = vadd.f32 %v5073_v22, %v2926_v27  ;;  %v1829_v30 = vmul.f32 %v5429_v45, %v1821_v13  ;;  %v1929_v40 = vmul.f32 %v5443_v53, %v1921_v5  ;;  %v2327_v25 = vld [vmem:[#allocation2 + $0x4b] sm:$0xff]  ;;  %v2429_v49 = vld [vmem:[#allocation2 + $0x54] sm:$0xff]  ;;  %v5496_v27 = vld [vmem:[%s7535_s2 + $0x13] ss:$0 sm:$0xff] }
  0x79   : > { %v5437_v48 = vadd.f32 %v5073_v22, %v2927_v58  ;;  %v1533_v55 = vadd.f32 %v1525_v19, %v1430_v15  ;;  %v1534_v23 = vadd.f32 %v1526_v21, %v1431_v37  ;;  %v1930_v34 = vmul.f32 %v5443_v53, %v1922_v32  ;;  %v5450_v22 = vld [vmem:[%s7535_s2 + $0xf] ss:$0 sm:$0xff]  ;;  %v5472_v19 = vld [vmem:[%s7535_s2 + $0x11] ss:$0 sm:$0xff]  ;;  %v5483_v9 = vld [vmem:[%s7535_s2 + $0x12] ss:$0 sm:$0xff] }
  0x7a   : > { %v5453_v59 = vmul.f32 %v5450_v22, %v2024_v39  ;;  %v3010_v46 = vsub.f32 0.0, %v5434_v8  ;;  %v2033_v47 = vmul.f32 %v5450_v22, %v2025_v63  ;;  %v5464_v24 = vmul.f32 %v5461_v31, %v2125_v42  ;;  %v2428_v61 = vld [vmem:[#allocation2 + $0x4c] sm:$0xff]  ;;  %7609 = vst [vmem:[#allocation7_spill] sm:$0xff] %v5496_v27  ;;  %v531_v32 = vld [vmem:[%s4756_s12 + $0x19] sm:$0xff]  ;;  %v532_v39 = vld [vmem:[%s4756_s12 + $0x21] sm:$0xff] }
  0x7b   : > { %v3011_v60 = vsub.f32 0.0, %v5437_v48  ;;  %v1634_v50 = vadd.f32 %v1626_v41, %v1533_v55  ;;  %v1635_v52 = vadd.f32 %v1627_v51, %v1534_v23  ;;  %v5467_v7 = vmul.f32 %v5461_v31, %v2126_v14  ;;  %v430_v41 = vld [vmem:[%s4756_s12 + $0x18] sm:$0xff]  ;;  %v431_v51 = vld [vmem:[%s4756_s12 + $0x20] sm:$0xff]  ;;  %v5510_v37 = vld [vmem:[%s7535_s2 + $0x14] ss:$0 sm:$0xff] }
  0x7c   : > { %v5475_v20 = vmul.f32 %v5472_v19, %v2226_v3  ;;  %v3058_v21 = vmul.f32 1.442695, %v3010_v46  ;;  %v5478_v12 = vmul.f32 %v5472_v19, %v2227_v26  ;;  %v5486_v43 = vmul.f32 %v5483_v9, %v2327_v25  ;;  %v632_v15 = vld [vmem:[%s4756_s12 + $0x1a] sm:$0xff]  ;;  %7610 = vst [vmem:[#allocation9_spill] sm:$0xff] %v5510_v37  ;;  %v633_v14 = vld [vmem:[%s4756_s12 + $0x22] sm:$0xff] }
  0x7d   : > { %v3060_v10 = vmul.f32 1.442695, %v3011_v60  ;;  %v1735_v13 = vadd.f32 %v1727_v4, %v1634_v50  ;;  %v1736_v5 = vadd.f32 %v1728_v17, %v1635_v52  ;;  %v5491_v44 = vmul.f32 %v5483_v9, %v2328_v62  ;;  %v2631_v42 = vld [vmem:[#allocation2 + $0x61] sm:$0xff]  ;;  %v2632_v46 = vld [vmem:[#allocation2 + $0x69] sm:$0xff] }
  0x7e   : > { %v5499_v58 = vmul.f32 %v5496_v27, %v2428_v61  ;;  %4309 = vpow2.f32 %v3058_v21  ;;  %v5505_v4 = vmul.f32 %v5496_v27, %v2429_v49  ;;  %v5513_v17 = vmul.f32 %v5510_v37, %v2530_v35  ;;  %v733_v26 = vld [vmem:[%s4756_s12 + $0x1b] sm:$0xff]  ;;  %v734_v25 = vld [vmem:[%s4756_s12 + $0x23] sm:$0xff] }
  0x7f   : > { %v5516_v63 = vmul.f32 %v5510_v37, %v2531_v33  ;;  %4311 = vpow2.f32 %v3060_v10  ;;  %v1836_v3 = vadd.f32 %v1828_v57, %v1735_v13  ;;  %v1837_v55 = vadd.f32 %v1829_v30, %v1736_v5  ;;  %v2732_v60 = vld [vmem:[#allocation2 + $0x62] sm:$0xff]  ;;  %v5529_v30 = vld [vmem:[%s7535_s2 + $0x15] ss:$0 sm:$0xff] }
  0x80   : > { %v457_v23 = vmul.f32 %v5319_v11, %v430_v41  ;;  %v458_v62 = vmul.f32 %v5319_v11, %v431_v51  ;;  %v558_v61 = vmul.f32 %v5327_v1, %v531_v32  ;;  %v559_v50 = vmul.f32 %v5327_v1, %v532_v39  ;;  %v834_v21 = vld [vmem:[%s4756_s12 + $0x1c] sm:$0xff]  ;;  %v835_v10 = vld [vmem:[%s4756_s12 + $0x24] sm:$0xff] }
  0x81   : > { %v659_v52 = vmul.f32 %v5334_v2, %v632_v15  ;;  %v1937_v49 = vadd.f32 %v1929_v40, %v1836_v3  ;;  %v1938_v57 = vadd.f32 %v1930_v34, %v1837_v55  ;;  %v5532_v35 = vmul.f32 %v5529_v30, %v2631_v42  ;;  %v3718_v34 = vld [vmem:[%s4756_s12 + $0x30] sm:$0xff] }
  0x82   : > { %v660_v33 = vmul.f32 %v5334_v2, %v633_v14  ;;  %v582_v41 = vadd.f32 %v558_v61, %v457_v23  ;;  %v583_v51 = vadd.f32 %v559_v50, %v458_v62  ;;  %v760_v13 = vmul.f32 %v5343_v28, %v733_v26  ;;  %v5547_v15 = vld [vmem:[%s7535_s2 + $0x16] ss:$0 sm:$0xff]  ;;  %v3719_v14 = vld [vmem:[%s4756_s12 + $0x38] sm:$0xff] }
  0x83   : > { %v761_v40 = vmul.f32 %v5343_v28, %v734_v25  ;;  %v2040_v5 = vadd.f32 %v5453_v59, %v1937_v49  ;;  %v2041_v32 = vadd.f32 %v2033_v47, %v1938_v57  ;;  %v5542_v39 = vmul.f32 %v5529_v30, %v2632_v46  ;;  %v3743_v47 = vld [vmem:[%s4756_s12 + $0x31] sm:$0xff]  ;;  %v3744_v50 = vld [vmem:[%s4756_s12 + $0x39] sm:$0xff] }
  0x84   : > { %v5550_v42 = vmul.f32 %v5547_v15, %v2732_v60  ;;  %v4310_v3 = vpop.eup %4309  ;;  %v683_v55 = vadd.f32 %v659_v52, %v582_v41  ;;  %v684_v23 = vadd.f32 %v660_v33, %v583_v51  ;;  %v861_v26 = vmul.f32 %v5352_v18, %v834_v21  ;;  %v2733_v57 = vld [vmem:[#allocation2 + $0x6a] sm:$0xff] }
  0x85   : > { %v862_v59 = vmul.f32 %v5352_v18, %v835_v10  ;;  %v4312_v25 = vpop.eup %4311  ;;  %v3106_v46 = vadd.f32 1.0, %v4310_v3  ;;  %v2141_v62 = vadd.f32 %v5464_v24, %v2040_v5  ;;  %v2142_v61 = vadd.f32 %v5467_v7, %v2041_v32  ;;  %v2833_v52 = vld [vmem:[#allocation2 + $0x63] sm:$0xff]  ;;  %v3768_v7 = vld [vmem:[%s4756_s12 + $0x32] sm:$0xff]  ;;  %v3769_v5 = vld [vmem:[%s4756_s12 + $0x3a] sm:$0xff] }
  0x86   : > { %v963_v60 = vmul.f32 %v5359_v54, %v3718_v34  ;;  %v3107_v49 = vadd.f32 1.0, %v4312_v25  ;;  %v784_v33 = vadd.f32 %v760_v13, %v683_v55  ;;  %v785_v41 = vadd.f32 %v761_v40, %v684_v23  ;;  %v2834_v34 = vld [vmem:[#allocation2 + $0x6b] sm:$0xff]  ;;  %v3794_v25 = vld [vmem:[%s4756_s12 + $0x3b] sm:$0xff] }
  0x87   : > { %v964_v21 = vmul.f32 %v5359_v54, %v3719_v14  ;;  %4313 = vrcp.f32 %v3106_v46  ;;  %v2242_v10 = vadd.f32 %v5475_v20, %v2141_v62  ;;  %v2243_v51 = vadd.f32 %v5478_v12, %v2142_v61  ;;  %v2934_v32 = vld [vmem:[#allocation2 + $0x64] sm:$0xff]  ;;  %v5573_v12 = vld [vmem:[%s7535_s2 + $0x17] ss:$0 sm:$0xff] }
  0x88   : > { %v1065_v24 = vmul.f32 %v5370_v38, %v3743_v47  ;;  %4315 = vrcp.f32 %v3107_v49  ;;  %v885_v3 = vadd.f32 %v861_v26, %v784_v33  ;;  %v886_v13 = vadd.f32 %v862_v59, %v785_v41  ;;  %v3793_v47 = vld [vmem:[%s4756_s12 + $0x33] sm:$0xff] }
  0x89   : > { %v1066_v40 = vmul.f32 %v5370_v38, %v3744_v50  ;;  %v2343_v14 = vadd.f32 %v5486_v43, %v2242_v10  ;;  %v2344_v20 = vadd.f32 %v5491_v44, %v2243_v51  ;;  %v2741_v55 = vmul.f32 %v5547_v15, %v2733_v57  ;;  %v2935_v26 = vld [vmem:[#allocation2 + $0x6c] sm:$0xff]  ;;  %v3818_v62 = vld [vmem:[%s4756_s12 + $0x34] sm:$0xff] }
  0x8a   : > { %v2841_v23 = vmul.f32 %v5573_v12, %v2833_v52  ;;  %v987_v59 = vadd.f32 %v963_v60, %v885_v3  ;;  %v988_v46 = vadd.f32 %v964_v21, %v886_v13  ;;  %v1166_v43 = vmul.f32 %v5383_v6, %v3768_v7  ;;  %v5587_v57 = vld [vmem:[%s7535_s2 + $0x18] ss:$0 sm:$0xff]  ;;  %v3819_v52 = vld [vmem:[%s4756_s12 + $0x3c] sm:$0xff]  ;;  %v3843_v10 = vld [vmem:[%s4756_s12 + $0x48] sm:$0xff] }
  0x8b   : > { %v1167_v44 = vmul.f32 %v5383_v6, %v3769_v5  ;;  %v2444_v61 = vadd.f32 %v5499_v58, %v2343_v14  ;;  %v2445_v50 = vadd.f32 %v5505_v4, %v2344_v20  ;;  %v2842_v49 = vmul.f32 %v5573_v12, %v2834_v34 }
  0x8c   : > { %v2942_v60 = vmul.f32 %v5587_v57, %v2934_v32  ;;  %v1089_v33 = vadd.f32 %v1065_v24, %v987_v59  ;;  %v1090_v41 = vadd.f32 %v1066_v40, %v988_v46  ;;  %v1267_v21 = vmul.f32 %v5392_v29, %v3793_v47  ;;  %v3844_v32 = vld [vmem:[%s4756_s12 + $0x50] sm:$0xff] }
  0x8d   : > { %v1268_v58 = vmul.f32 %v5392_v29, %v3794_v25  ;;  %v4314_v4 = vpop.eup %4313  ;;  %v2546_v51 = vadd.f32 %v5513_v17, %v2444_v61  ;;  %v2547_v7 = vadd.f32 %v5516_v63, %v2445_v50  ;;  %v2943_v5 = vmul.f32 %v5587_v57, %v2935_v26  ;;  %v3868_v24 = vld [vmem:[%s4756_s12 + $0x49] sm:$0xff]  ;;  %v3869_v17 = vld [vmem:[%s4756_s12 + $0x51] sm:$0xff] }
  0x8e   : > { %v1368_v34 = vmul.f32 %v5399_v36, %v3818_v62  ;;  %v4316_v3 = vpop.eup %4315  ;;  %v3170_v13 = vmul.f32 %v4314_v4, %v5434_v8  ;;  %v1190_v40 = vadd.f32 %v1166_v43, %v1089_v33  ;;  %v1191_v14 = vadd.f32 %v1167_v44, %v1090_v41  ;;  %v3893_v59 = vld [vmem:[%s4756_s12 + $0x4a] sm:$0xff]  ;;  %v3894_v46 = vld [vmem:[%s4756_s12 + $0x52] sm:$0xff] }
  0x8f   : > { %v1369_v20 = vmul.f32 %v5399_v36, %v3819_v52  ;;  %v3171_v47 = vmul.f32 %v4316_v3, %v5437_v48  ;;  %v2647_v63 = vadd.f32 %v5532_v35, %v2546_v51  ;;  %v2648_v25 = vadd.f32 %v5542_v39, %v2547_v7  ;;  %v3918_v61 = vld [vmem:[%s4756_s12 + $0x4b] sm:$0xff]  ;;  %v3919_v48 = vld [vmem:[%s4756_s12 + $0x53] sm:$0xff]  ;;  %v3968_v51 = vld [vmem:[%s4756_s12 + $0x60] sm:$0xff] }
  0x90   : > { %v1470_v26 = vmul.f32 %v5407_v0, %v3843_v10  ;;  %v1291_v62 = vadd.f32 %v1267_v21, %v1190_v40  ;;  %v1292_v8 = vadd.f32 %v1268_v58, %v1191_v14  ;;  %v1471_v43 = vmul.f32 %v5407_v0, %v3844_v32  ;;  %v3943_v33 = vld [vmem:[%s4756_s12 + $0x4c] sm:$0xff]  ;;  %v3944_v41 = vld [vmem:[%s4756_s12 + $0x54] sm:$0xff] }
  0x91   : > { %v1572_v44 = vmul.f32 %v5415_v56, %v3868_v24  ;;  %v3194_v50 = vpack.c.bf16 %v3171_v47, %v3170_v13  ;;  %v2748_v35 = vadd.f32 %v5550_v42, %v2647_v63  ;;  %v2749_v52 = vadd.f32 %v2741_v55, %v2648_v25  ;;  %v3969_v7 = vld [vmem:[%s4756_s12 + $0x68] sm:$0xff] }
  0x92   : > { %v1573_v39 = vmul.f32 %v5415_v56, %v3869_v17  ;;  %v1392_v21 = vadd.f32 %v1368_v34, %v1291_v62  ;;  %v1393_v10 = vadd.f32 %v1369_v20, %v1292_v8  ;;  %v1673_v58 = vmul.f32 %v5422_v16, %v3893_v59  ;;  %v3993_v34 = vld [vmem:[%s4756_s12 + $0x61] sm:$0xff]  ;;  %v3994_v3 = vld [vmem:[%s4756_s12 + $0x69] sm:$0xff] }
  0x93   : > { %v1674_v4 = vmul.f32 %v5422_v16, %v3894_v46  ;;  %4223 = vmatmul.msk.bf16.vlgmr.msra.gmra.mxu2 %vm388_vm1, %v3194_v50  ;;  %v2849_v42 = vadd.f32 %v2841_v23, %v2748_v35  ;;  %v2850_v55 = vadd.f32 %v2842_v49, %v2749_v52  ;;  %v1774_v32 = vmul.f32 %v5429_v45, %v3918_v61  ;;  %v4018_v17 = vld [vmem:[%s4756_s12 + $0x62] sm:$0xff]  ;;  %v4019_v47 = vld [vmem:[%s4756_s12 + $0x6a] sm:$0xff] }
  0x94   : > { %v1775_v24 = vmul.f32 %v5429_v45, %v3919_v48  ;;  %v1494_v13 = vadd.f32 %v1470_v26, %v1392_v21  ;;  %v1495_v40 = vadd.f32 %v1471_v43, %v1393_v10  ;;  %v1875_v14 = vmul.f32 %v5443_v53, %v3943_v33  ;;  %v4043_v59 = vld [vmem:[%s4756_s12 + $0x63] sm:$0xff]  ;;  %v4044_v46 = vld [vmem:[%s4756_s12 + $0x6b] sm:$0xff]  ;;  %v4093_v21 = vld [vmem:[%s4756_s12 + $0x78] sm:$0xff] }
  0x95   : > { %v1876_v20 = vmul.f32 %v5443_v53, %v3944_v41  ;;  %v2950_v23 = vadd.f32 %v2942_v60, %v2849_v42  ;;  %v2951_v63 = vadd.f32 %v2943_v5, %v2850_v55  ;;  %v1977_v49 = vmul.f32 %v5450_v22, %v3968_v51  ;;  %v4068_v61 = vld [vmem:[%s4756_s12 + $0x64] sm:$0xff]  ;;  %v4069_v48 = vld [vmem:[%s4756_s12 + $0x6c] sm:$0xff]  ;;  %v5641_v60 = vld [vmem:[%s7536_s3] ss:$0 sm:$0xff] }
  0x96   : > { %v1978_v25 = vmul.f32 %v5450_v22, %v3969_v7  ;;  %v1596_v62 = vadd.f32 %v1572_v44, %v1494_v13  ;;  %v1597_v26 = vadd.f32 %v1573_v39, %v1495_v40  ;;  %v2079_v8 = vmul.f32 %v5461_v31, %v3993_v34  ;;  %v4094_v10 = vld [vmem:[%s4756_s12 + $0x80] sm:$0xff] }
  0x97   : > { %v2080_v43 = vmul.f32 %v5461_v31, %v3994_v3  ;;  %v5644_v5 = vadd.f32 %v5641_v60, %v2950_v23  ;;  %v5647_v44 = vadd.f32 %v5641_v60, %v2951_v63  ;;  %v2180_v50 = vmul.f32 %v5472_v19, %v4018_v17  ;;  %v4119_v55 = vld [vmem:[%s4756_s12 + $0x81] sm:$0xff] }
  0x98   : > { %v2181_v35 = vmul.f32 %v5472_v19, %v4019_v47  ;;  %v1697_v52 = vadd.f32 %v1673_v58, %v1596_v62  ;;  %v1698_v39 = vadd.f32 %v1674_v4, %v1597_v26  ;;  %v5652_v33 = vmul.f32 %v5483_v9, %v4043_v59  ;;  %v4118_v4 = vld [vmem:[%s4756_s12 + $0x79] sm:$0xff]  ;;  %v4144_v47 = vld [vmem:[%s4756_s12 + $0x82] sm:$0xff] }
  0x99   : > { %v5655_v41 = vmul.f32 %v5483_v9, %v4044_v46  ;;  %v3018_v51 = vsub.f32 0.0, %v5644_v5  ;;  %v3019_v7 = vsub.f32 0.0, %v5647_v44  ;;  %v5662_v42 = vmul.f32 %v5496_v27, %v4068_v61  ;;  %v4143_v17 = vld [vmem:[%s4756_s12 + $0x7a] sm:$0xff] }
  0x9a   : > { %v5665_v58 = vmul.f32 %v5496_v27, %v4069_v48  ;;  %v1798_v34 = vadd.f32 %v1774_v32, %v1697_v52  ;;  %v1799_v3 = vadd.f32 %v1775_v24, %v1698_v39  ;;  %v5670_v13 = vmul.f32 %v5510_v37, %v4093_v21  ;;  %v4168_v23 = vld [vmem:[%s4756_s12 + $0x7b] sm:$0xff]  ;;  %v4169_v24 = vld [vmem:[%s4756_s12 + $0x83] sm:$0xff] }
  0x9b   : > { %v5673_v40 = vmul.f32 %v5510_v37, %v4094_v10  ;;  %v3074_v63 = vmul.f32 1.442695, %v3018_v51  ;;  %v3076_v59 = vmul.f32 1.442695, %v3019_v7  ;;  %v465_v46 = vmul.f32 %v5319_v11, %v4093_v21  ;;  %v5684_v52 = vld [vmem:[%s4756_s12 + $0x7c] sm:$0xff] }
  0x9c   : > { %v466_v62 = vmul.f32 %v5319_v11, %v4094_v10  ;;  %v1899_v26 = vadd.f32 %v1875_v14, %v1798_v34  ;;  %v1900_v32 = vadd.f32 %v1876_v20, %v1799_v3  ;;  %v566_v61 = vmul.f32 %v5327_v1, %v4118_v4  ;;  %v4194_v10 = vld [vmem:[%s4756_s12 + $0x84] sm:$0xff]  ;;  %v3726_v11 = vld [vmem:[%s4756_s12 + $0x90] sm:$0xff] }
  0x9d   : > { %v567_v48 = vmul.f32 %v5327_v1, %v4119_v55  ;;  %4317 = vpow2.f32 %v3074_v63  ;;  %v667_v39 = vmul.f32 %v5334_v2, %v4143_v17  ;;  %v668_v51 = vmul.f32 %v5334_v2, %v4144_v47 }
  0x9e   : > { %v768_v21 = vmul.f32 %v5343_v28, %v4168_v23  ;;  %4319 = vpow2.f32 %v3076_v59  ;;  %v2001_v14 = vadd.f32 %v1977_v49, %v1899_v26  ;;  %v2002_v20 = vadd.f32 %v1978_v25, %v1900_v32  ;;  %v3727_v49 = vld [vmem:[%s4756_s12 + $0x98] sm:$0xff] }
  0x9f   : > { %v590_v7 = vadd.f32 %v566_v61, %v465_v46  ;;  %v2585_v34 = vmul.f32 %v5529_v30, %v4118_v4  ;;  %v2586_v3 = vmul.f32 %v5529_v30, %v4119_v55  ;;  %v591_v63 = vadd.f32 %v567_v48, %v466_v62  ;;  %v3751_v25 = vld [vmem:[%s4756_s12 + $0x91] sm:$0xff] }
  0xa0   : > { %v769_v1 = vmul.f32 %v5343_v28, %v4169_v24  ;;  %v2103_v2 = vadd.f32 %v2079_v8, %v2001_v14  ;;  %v2104_v37 = vadd.f32 %v2080_v43, %v2002_v20  ;;  %v869_v59 = vmul.f32 %v5352_v18, %v5684_v52  ;;  %v3752_v43 = vld [vmem:[%s4756_s12 + $0x99] sm:$0xff] }
  0xa1   : > { %v691_v27 = vadd.f32 %v667_v39, %v590_v7  ;;  %v2686_v46 = vmul.f32 %v5547_v15, %v4143_v17  ;;  %v2687_v4 = vmul.f32 %v5547_v15, %v4144_v47  ;;  %v692_v26 = vadd.f32 %v668_v51, %v591_v63  ;;  %v3776_v48 = vld [vmem:[%s4756_s12 + $0x92] sm:$0xff] }
  0xa2   : > { %v870_v55 = vmul.f32 %v5352_v18, %v4194_v10  ;;  %v2204_v62 = vadd.f32 %v2180_v50, %v2103_v2  ;;  %v2205_v32 = vadd.f32 %v2181_v35, %v2104_v37  ;;  %v971_v8 = vmul.f32 %v5359_v54, %v3726_v11  ;;  %v3777_v11 = vld [vmem:[%s4756_s12 + $0x9a] sm:$0xff] }
  0xa3   : > { %v792_v61 = vadd.f32 %v768_v21, %v691_v27  ;;  %v4318_v39 = vpop.eup %4317  ;;  %v2787_v14 = vmul.f32 %v5573_v12, %v4168_v23  ;;  %v793_v20 = vadd.f32 %v769_v1, %v692_v26  ;;  %v972_v17 = vmul.f32 %v5359_v54, %v3727_v49  ;;  %v3801_v23 = vld [vmem:[%s4756_s12 + $0x93] sm:$0xff] }
  0xa4   : > { %v1073_v47 = vmul.f32 %v5370_v38, %v3751_v25  ;;  %v4320_v51 = vpop.eup %4319  ;;  %v3114_v7 = vadd.f32 1.0, %v4318_v39  ;;  %v2305_v2 = vadd.f32 %v5652_v33, %v2204_v62  ;;  %v2306_v27 = vadd.f32 %v5655_v41, %v2205_v32  ;;  %v3802_v41 = vld [vmem:[%s4756_s12 + $0x9b] sm:$0xff] }
  0xa5   : > { %v893_v37 = vadd.f32 %v869_v59, %v792_v61  ;;  %v3115_v50 = vadd.f32 1.0, %v4320_v51  ;;  %v894_v35 = vadd.f32 %v870_v55, %v793_v20  ;;  %v1074_v21 = vmul.f32 %v5370_v38, %v3752_v43  ;;  %v3826_v55 = vld [vmem:[%s4756_s12 + $0x94] sm:$0xff] }
  0xa6   : > { %v1174_v1 = vmul.f32 %v5383_v6, %v3776_v48  ;;  %4321 = vrcp.f32 %v3114_v7  ;;  %v2406_v63 = vadd.f32 %v5662_v42, %v2305_v2  ;;  %v2407_v33 = vadd.f32 %v5665_v58, %v2306_v27  ;;  %v3827_v58 = vld [vmem:[%s4756_s12 + $0x9c] sm:$0xff]  ;;  %v3852_v43 = vld [vmem:[%s4756_s12 + $0xb0] sm:$0xff] }
  0xa7   : > { %v995_v49 = vadd.f32 %v971_v8, %v893_v37  ;;  %4323 = vrcp.f32 %v3115_v50  ;;  %v2788_v59 = vmul.f32 %v5573_v12, %v4169_v24  ;;  %v996_v25 = vadd.f32 %v972_v17, %v894_v35  ;;  %v3851_v8 = vld [vmem:[%s4756_s12 + $0xa8] sm:$0xff]  ;;  %v3877_v7 = vld [vmem:[%s4756_s12 + $0xb1] sm:$0xff] }
  0xa8   : > { %v1175_v26 = vmul.f32 %v5383_v6, %v3777_v11  ;;  %v2508_v62 = vadd.f32 %v5670_v13, %v2406_v63  ;;  %v2509_v32 = vadd.f32 %v5673_v40, %v2407_v33  ;;  %v1275_v42 = vmul.f32 %v5392_v29, %v3801_v23  ;;  %v3876_v17 = vld [vmem:[%s4756_s12 + $0xa9] sm:$0xff]  ;;  %v3927_v23 = vld [vmem:[%s4756_s12 + $0xb3] sm:$0xff] }
  0xa9   : > { %v1097_v61 = vadd.f32 %v1073_v47, %v995_v49  ;;  %v2888_v48 = vmul.f32 %v5587_v57, %v5684_v52  ;;  %v2889_v24 = vmul.f32 %v5587_v57, %v4194_v10  ;;  %v1098_v39 = vadd.f32 %v1074_v21, %v996_v25  ;;  %v3901_v2 = vld [vmem:[%s4756_s12 + $0xaa] sm:$0xff]  ;;  %v3902_v21 = vld [vmem:[%s4756_s12 + $0xb2] sm:$0xff] }
  0xaa   : > { %v1276_v20 = vmul.f32 %v5392_v29, %v3802_v41  ;;  %v2609_v13 = vadd.f32 %v2585_v34, %v2508_v62  ;;  %v2610_v40 = vadd.f32 %v2586_v3, %v2509_v32  ;;  %v1376_v51 = vmul.f32 %v5399_v36, %v3826_v55  ;;  %v3951_v62 = vld [vmem:[%s4756_s12 + $0xac] sm:$0xff]  ;;  %v3952_v32 = vld [vmem:[%s4756_s12 + $0xb4] sm:$0xff] }
  0xab   : > { %v1198_v47 = vadd.f32 %v1174_v1, %v1097_v61  ;;  %v1199_v27 = vadd.f32 %v1175_v26, %v1098_v39  ;;  %v1377_v37 = vmul.f32 %v5399_v36, %v3827_v58  ;;  %v1478_v52 = vmul.f32 %v5407_v0, %v3851_v8  ;;  %v3926_v1 = vld [vmem:[%s4756_s12 + $0xab] sm:$0xff]  ;;  %v3976_v61 = vld [vmem:[%s4756_s12 + $0xc0] sm:$0xff] }
  0xac   : > { %v1479_v10 = vmul.f32 %v5407_v0, %v3852_v43  ;;  %v4322_v11 = vpop.eup %4321  ;;  %v2710_v50 = vadd.f32 %v2686_v46, %v2609_v13  ;;  %v2711_v35 = vadd.f32 %v2687_v4, %v2610_v40  ;;  %v1580_v3 = vmul.f32 %v5415_v56, %v3876_v17  ;;  %v3977_v43 = vld [vmem:[%s4756_s12 + $0xc8] sm:$0xff] }
  0xad   : > { %v1299_v34 = vadd.f32 %v1275_v42, %v1198_v47  ;;  %v4324_v63 = vpop.eup %4323  ;;  %v3178_v33 = vmul.f32 %v4322_v11, %v5644_v5  ;;  %v1300_v49 = vadd.f32 %v1276_v20, %v1199_v27  ;;  %v1581_v41 = vmul.f32 %v5415_v56, %v3877_v7  ;;  %v4001_v20 = vld [vmem:[%s4756_s12 + $0xc1] sm:$0xff]  ;;  %v4002_v17 = vld [vmem:[%s4756_s12 + $0xc9] sm:$0xff] }
  0xae   : > { %v1681_v25 = vmul.f32 %v5422_v16, %v3901_v2  ;;  %v3179_v46 = vmul.f32 %v4324_v63, %v5647_v44  ;;  %v2811_v4 = vadd.f32 %v2787_v14, %v2710_v50  ;;  %v2812_v26 = vadd.f32 %v2788_v59, %v2711_v35  ;;  %v4026_v13 = vld [vmem:[%s4756_s12 + $0xc2] sm:$0xff]  ;;  %v4027_v2 = vld [vmem:[%s4756_s12 + $0xca] sm:$0xff] }
  0xaf   : > { %v1400_v55 = vadd.f32 %v1376_v51, %v1299_v34  ;;  %v1401_v42 = vadd.f32 %v1377_v37, %v1300_v49  ;;  %v1682_v5 = vmul.f32 %v5422_v16, %v3902_v21  ;;  %v1782_v58 = vmul.f32 %v5429_v45, %v3926_v1  ;;  %v4076_v11 = vld [vmem:[%s4756_s12 + $0xc4] sm:$0xff]  ;;  %v4077_v1 = vld [vmem:[%s4756_s12 + $0xcc] sm:$0xff]  ;;  %v4101_v49 = vld [vmem:[%s4756_s12 + $0xd8] sm:$0xff] }
  0xb0   : > { %v1783_v8 = vmul.f32 %v5429_v45, %v3927_v23  ;;  %v3198_v39 = vpack.c.bf16 %v3179_v46, %v3178_v33  ;;  %v2912_v44 = vadd.f32 %v2888_v48, %v2811_v4  ;;  %v2913_v14 = vadd.f32 %v2889_v24, %v2812_v26  ;;  %v7611_v26 = vld [vmem:[#allocation7_spill] sm:$0xff] }
  0xb1   : > { %v1502_v59 = vadd.f32 %v1478_v52, %v1400_v55  ;;  %v1503_v40 = vadd.f32 %v1479_v10, %v1401_v42  ;;  %v1883_v47 = vmul.f32 %v5443_v53, %v3951_v62  ;;  %v1884_v51 = vmul.f32 %v5443_v53, %v3952_v32  ;;  %v4051_v52 = vld [vmem:[%s4756_s12 + $0xc3] sm:$0xff]  ;;  %v4052_v10 = vld [vmem:[%s4756_s12 + $0xcb] sm:$0xff]  ;;  %v4126_v32 = vld [vmem:[%s4756_s12 + $0xd9] sm:$0xff] }
  0xb2   : > { %v1985_v7 = vmul.f32 %v5450_v22, %v3976_v61  ;;  %4227 = vmatmul.msk.bf16.vlgmr.msra.gmra.mxu3 %vm388_vm1, %v3198_v39  ;;  %v5760_v48 = vadd.f32 %v5641_v60, %v2912_v44  ;;  %v5763_v24 = vadd.f32 %v5641_v60, %v2913_v14  ;;  %v1986_v37 = vmul.f32 %v5450_v22, %v3977_v43  ;;  %v4102_v62 = vld [vmem:[%s4756_s12 + $0xe0] sm:$0xff]  ;;  %v7612_v14 = vld [vmem:[#allocation9_spill] sm:$0xff] }
  0xb3   : > { %v1604_v27 = vadd.f32 %v1580_v3, %v1502_v59  ;;  %v1605_v50 = vadd.f32 %v1581_v41, %v1503_v40  ;;  %v2087_v35 = vmul.f32 %v5461_v31, %v4001_v20  ;;  %v2088_v34 = vmul.f32 %v5461_v31, %v4002_v17  ;;  %v4151_v39 = vld [vmem:[%s4756_s12 + $0xda] sm:$0xff]  ;;  %v4152_v17 = vld [vmem:[%s4756_s12 + $0xe2] sm:$0xff] }
  0xb4   : > { %v2188_v21 = vmul.f32 %v5472_v19, %v4026_v13  ;;  %v2996_v23 = vsub.f32 0.0, %v5760_v48  ;;  %v2997_v3 = vsub.f32 0.0, %v5763_v24  ;;  %v2189_v33 = vmul.f32 %v5472_v19, %v4027_v2  ;;  %v5801_v13 = vld [vmem:[%s4756_s12 + $0xdb] sm:$0xff]  ;;  %v7613_v40 = vld [vmem:[#allocation4_spill] sm:$0xff] }
  0xb5   : > { %v1705_v63 = vadd.f32 %v1681_v25, %v1604_v27  ;;  %v1706_v46 = vadd.f32 %v1682_v5, %v1605_v50  ;;  %v5778_v41 = vmul.f32 %v5483_v9, %v4051_v52  ;;  %v5781_v4 = vmul.f32 %v5483_v9, %v4052_v10  ;;  %v4127_v5 = vld [vmem:[%s4756_s12 + $0xe1] sm:$0xff]  ;;  %v7614_v10 = vld [vmem:[#allocation5_spill] sm:$0xff] }
  0xb6   : > { %v5784_v55 = vmul.f32 %v7611_v26, %v4076_v11  ;;  %v3030_v61 = vmul.f32 1.442695, %v2996_v23  ;;  %v3032_v25 = vmul.f32 1.442695, %v2997_v3  ;;  %v5789_v43 = vmul.f32 %v7611_v26, %v4077_v1  ;;  %v5805_v27 = vld [vmem:[%s4756_s12 + $0xe3] sm:$0xff]  ;;  %v7615_v23 = vld [vmem:[#allocation6_spill] sm:$0xff] }
  0xb7   : > { %v1806_v42 = vadd.f32 %v1782_v58, %v1705_v63  ;;  %v1807_v44 = vadd.f32 %v1783_v8, %v1706_v46  ;;  %v5794_v59 = vmul.f32 %v7612_v14, %v4101_v49  ;;  %v5797_v20 = vmul.f32 %v7612_v14, %v4102_v62  ;;  %v5810_v50 = vld [vmem:[%s4756_s12 + $0xdc] sm:$0xff] }
  0xb8   : > { %v473_v2 = vmul.f32 %v7613_v40, %v4101_v49  ;;  %4325 = vpow2.f32 %v3030_v61  ;;  %v474_v52 = vmul.f32 %v7613_v40, %v4102_v62  ;;  %v574_v8 = vmul.f32 %v7614_v10, %v4126_v32  ;;  %v5815_v49 = vld [vmem:[%s4756_s12 + $0xe4] sm:$0xff] }
  0xb9   : > { %v1907_v58 = vadd.f32 %v1883_v47, %v1806_v42  ;;  %4327 = vpow2.f32 %v3032_v25  ;;  %v1908_v11 = vadd.f32 %v1884_v51, %v1807_v44  ;;  %v575_v1 = vmul.f32 %v7614_v10, %v4127_v5  ;;  %v3734_v44 = vld [vmem:[%s4756_s12 + $0xf0] sm:$0xff]  ;;  %v3735_v10 = vld [vmem:[%s4756_s12 + $0xf8] sm:$0xff] }
  0xba   : > { %v675_v3 = vmul.f32 %v7615_v23, %v4151_v39  ;;  %v598_v47 = vadd.f32 %v574_v8, %v473_v2  ;;  %v676_v46 = vmul.f32 %v7615_v23, %v4152_v17  ;;  %v776_v62 = vmul.f32 %v5343_v28, %v5801_v13 }
  0xbb   : > { %v2009_v63 = vadd.f32 %v1985_v7, %v1907_v58  ;;  %v2010_v61 = vadd.f32 %v1986_v37, %v1908_v11  ;;  %v5821_v51 = vmul.f32 %v5529_v30, %v4126_v32  ;;  %v599_v25 = vadd.f32 %v575_v1, %v474_v52 }
  0xbc   : > { %v777_v42 = vmul.f32 %v5343_v28, %v5805_v27  ;;  %v5827_v40 = vmul.f32 %v5529_v30, %v4127_v5  ;;  %v699_v2 = vadd.f32 %v675_v3, %v598_v47  ;;  %v877_v58 = vmul.f32 %v5352_v18, %v5810_v50 }
  0xbd   : > { %v2111_v7 = vadd.f32 %v2087_v35, %v2009_v63  ;;  %v2112_v37 = vadd.f32 %v2088_v34, %v2010_v61  ;;  %v5833_v32 = vmul.f32 %v5547_v15, %v4151_v39  ;;  %v700_v52 = vadd.f32 %v676_v46, %v599_v25  ;;  %v3759_v35 = vld [vmem:[%s4756_s12 + $0xf1] sm:$0xff]  ;;  %v3760_v34 = vld [vmem:[%s4756_s12 + $0xf9] sm:$0xff] }
  0xbe   : > { %v878_v28 = vmul.f32 %v5352_v18, %v5815_v49  ;;  %v4326_v8 = vpop.eup %4325  ;;  %v5839_v5 = vmul.f32 %v5547_v15, %v4152_v17  ;;  %v800_v1 = vadd.f32 %v776_v62, %v699_v2  ;;  %v979_v23 = vmul.f32 %v5359_v54, %v3734_v44  ;;  %v405_v39 = vld [vmem:[%s5193_s30 + $0x18] sm:$0xff]  ;;  %v406_v25 = vld [vmem:[%s5193_s30 + $0x20] sm:$0xff]  ;;  %v407_v2 = vld [vmem:[%s5193_s30 + $0x28] sm:$0xf] }
  0xbf   : > { %v2212_v11 = vadd.f32 %v2188_v21, %v2111_v7  ;;  %v4328_v3 = vpop.eup %4327  ;;  %v3092_v63 = vadd.f32 1.0, %v4326_v8  ;;  %v2213_v47 = vadd.f32 %v2189_v33, %v2112_v37  ;;  %v801_v46 = vadd.f32 %v777_v42, %v700_v52  ;;  %v3784_v61 = vld [vmem:[%s4756_s12 + $0xf2] sm:$0xff]  ;;  %418 = vst.msk [vmem:[#allocation2 + $0x78] sm:$0xff] %vm388_vm1, %v405_v39  ;;  %v3785_v7 = vld [vmem:[%s4756_s12 + $0xfa] sm:$0xff]  ;;  %v3859_v39 = vld [vmem:[%s4756_s12 + $0x108] sm:$0xff] }
  0xc0   : > { %v980_v18 = vmul.f32 %v5359_v54, %v3735_v10  ;;  %v3093_v21 = vadd.f32 1.0, %v4328_v3  ;;  %v901_v62 = vadd.f32 %v877_v58, %v800_v1  ;;  %v1081_v44 = vmul.f32 %v5370_v38, %v3759_v35  ;;  %419 = vst.msk [vmem:[#allocation2 + $0x80] sm:$0xff] %vm388_vm1, %v406_v25  ;;  %v3809_v10 = vld [vmem:[%s4756_s12 + $0xf3] sm:$0xff]  ;;  %v3810_v52 = vld [vmem:[%s4756_s12 + $0xfb] sm:$0xff] }
  0xc1   : > { %v2313_v17 = vadd.f32 %v5778_v41, %v2212_v11  ;;  %4329 = vrcp.f32 %v3092_v63  ;;  %v2314_v33 = vadd.f32 %v5781_v4, %v2213_v47  ;;  %v902_v54 = vadd.f32 %v878_v28, %v801_v46  ;;  %420 = vst.msk [vmem:[#allocation2 + $0x88] sm:$0xf] %vm391_vm2, %v407_v2  ;;  %v3834_v8 = vld [vmem:[%s4756_s12 + $0xf4] sm:$0xff] }
  0xc2   : > { %v1082_v42 = vmul.f32 %v5370_v38, %v3760_v34  ;;  %4331 = vrcp.f32 %v3093_v21  ;;  %v1003_v58 = vadd.f32 %v979_v23, %v901_v62  ;;  %v1182_v37 = vmul.f32 %v5383_v6, %v3784_v61  ;;  %v3835_v34 = vld [vmem:[%s4756_s12 + $0xfc] sm:$0xff]  ;;  %v3860_v63 = vld [vmem:[%s4756_s12 + $0x110] sm:$0xff] }
  0xc3   : > { %v2414_v41 = vadd.f32 %v5784_v55, %v2313_v17  ;;  %v2415_v35 = vadd.f32 %v5789_v43, %v2314_v33  ;;  %v2795_v4 = vmul.f32 %v5573_v12, %v5801_v13  ;;  %v1004_v28 = vadd.f32 %v980_v18, %v902_v54  ;;  %v3884_v18 = vld [vmem:[%s4756_s12 + $0x109] sm:$0xff]  ;;  %v3885_v21 = vld [vmem:[%s4756_s12 + $0x111] sm:$0xff] }
  0xc4   : > { %v1183_v38 = vmul.f32 %v5383_v6, %v3785_v7  ;;  %v2796_v55 = vmul.f32 %v5573_v12, %v5805_v27  ;;  %v1105_v1 = vadd.f32 %v1081_v44, %v1003_v58  ;;  %v1283_v23 = vmul.f32 %v5392_v29, %v3809_v10  ;;  %v3935_v10 = vld [vmem:[%s4756_s12 + $0x113] sm:$0xff] }
  0xc5   : > { %v2516_v11 = vadd.f32 %v5794_v59, %v2414_v41  ;;  %v2517_v43 = vadd.f32 %v5797_v20, %v2415_v35  ;;  %v2896_v13 = vmul.f32 %v5587_v57, %v5810_v50  ;;  %v1106_v6 = vadd.f32 %v1082_v42, %v1004_v28  ;;  %v3934_v42 = vld [vmem:[%s4756_s12 + $0x10b] sm:$0xff]  ;;  %v3984_v28 = vld [vmem:[%s4756_s12 + $0x120] sm:$0xff] }
  0xc6   : > { %v1284_v3 = vmul.f32 %v5392_v29, %v3810_v52  ;;  %v2897_v27 = vmul.f32 %v5587_v57, %v5815_v49  ;;  %v1206_v47 = vadd.f32 %v1182_v37, %v1105_v1  ;;  %v1384_v46 = vmul.f32 %v5399_v36, %v3834_v8  ;;  %v3959_v58 = vld [vmem:[%s4756_s12 + $0x10c] sm:$0xff]  ;;  %v3960_v37 = vld [vmem:[%s4756_s12 + $0x114] sm:$0xff]  ;;  %v4009_v1 = vld [vmem:[%s4756_s12 + $0x121] sm:$0xff] }
  0xc7   : > { %v2617_v59 = vadd.f32 %v5821_v51, %v2516_v11  ;;  %v4330_v61 = vpop.eup %4329  ;;  %v2618_v20 = vadd.f32 %v5827_v40, %v2517_v43  ;;  %v1207_v25 = vadd.f32 %v1183_v38, %v1106_v6  ;;  %v1385_v50 = vmul.f32 %v5399_v36, %v3835_v34  ;;  %v3909_v51 = vld [vmem:[%s4756_s12 + $0x10a] sm:$0xff]  ;;  %v3910_v40 = vld [vmem:[%s4756_s12 + $0x112] sm:$0xff]  ;;  %v4034_v43 = vld [vmem:[%s4756_s12 + $0x122] sm:$0xff] }
  0xc8   : > { %v1486_v29 = vmul.f32 %v5407_v0, %v3859_v39  ;;  %v4332_v17 = vpop.eup %4331  ;;  %v3156_v49 = vmul.f32 %v4330_v61, %v5760_v48  ;;  %v1307_v44 = vadd.f32 %v1283_v23, %v1206_v47  ;;  %v1487_v7 = vmul.f32 %v5407_v0, %v3860_v63  ;;  %v3985_v38 = vld [vmem:[%s4756_s12 + $0x128] sm:$0xff] }
  0xc9   : > { %v2718_v62 = vadd.f32 %v5833_v32, %v2617_v59  ;;  %v3157_v2 = vmul.f32 %v4332_v17, %v5763_v24  ;;  %v2719_v36 = vadd.f32 %v5839_v5, %v2618_v20  ;;  %v1308_v33 = vadd.f32 %v1284_v3, %v1207_v25  ;;  %v4010_v23 = vld [vmem:[%s4756_s12 + $0x129] sm:$0xff] }
  0xca   : > { %v1588_v54 = vmul.f32 %v5415_v56, %v3884_v18  ;;  %v1408_v48 = vadd.f32 %v1384_v46, %v1307_v44  ;;  %v1589_v32 = vmul.f32 %v5415_v56, %v3885_v21  ;;  %v1689_v0 = vmul.f32 %v5422_v16, %v3909_v51  ;;  %v4059_v59 = vld [vmem:[%s4756_s12 + $0x123] sm:$0xff]  ;;  %v4085_v20 = vld [vmem:[%s4756_s12 + $0x12c] sm:$0xff]  ;;  %v4109_v21 = vld [vmem:[%s4756_s12 + $0x138] sm:$0xff] }
  0xcb   : > { %v2819_v41 = vadd.f32 %v2795_v4, %v2718_v62  ;;  %v3187_v24 = vpack.c.bf16 %v3157_v2, %v3156_v49  ;;  %v2820_v52 = vadd.f32 %v2796_v55, %v2719_v36  ;;  %v1409_v5 = vadd.f32 %v1385_v50, %v1308_v33  ;;  %v4084_v61 = vld [vmem:[%s4756_s12 + $0x124] sm:$0xff]  ;;  %v505_v44 = vld [vmem:[#allocation2 + $0x18] sm:$0xff] }
  0xcc   : > { %v1690_v35 = vmul.f32 %v5422_v16, %v3910_v40  ;;  %v1510_v4 = vadd.f32 %v1486_v29, %v1408_v48  ;;  %v1790_v11 = vmul.f32 %v5429_v45, %v3934_v42  ;;  %v1791_v56 = vmul.f32 %v5429_v45, %v3935_v10  ;;  %v4110_v51 = vld [vmem:[%s4756_s12 + $0x140] sm:$0xff] }
  0xcd   : > { %v2920_v8 = vadd.f32 %v2896_v13, %v2819_v41  ;;  %4216 = vmatmul.msk.bf16.gmra.mxu0 %vm388_vm1, %v3187_v24  ;;  %v2921_v55 = vadd.f32 %v2897_v27, %v2820_v52  ;;  %v1511_v34 = vadd.f32 %v1487_v7, %v1409_v5  ;;  %v1891_v16 = vmul.f32 %v5443_v53, %v3959_v58  ;;  %v4035_v13 = vld [vmem:[%s4756_s12 + $0x12a] sm:$0xff]  ;;  %v506_v7 = vld [vmem:[#allocation2 + $0x20] sm:$0xff] }
  0xce   : > { %v1892_v39 = vmul.f32 %v5443_v53, %v3960_v37  ;;  %v1612_v3 = vadd.f32 %v1588_v54, %v1510_v4  ;;  %v1993_v45 = vmul.f32 %v5450_v22, %v3984_v28  ;;  %v1994_v63 = vmul.f32 %v5450_v22, %v3985_v38  ;;  %v4060_v27 = vld [vmem:[%s4756_s12 + $0x12b] sm:$0xff]  ;;  %v606_v33 = vld [vmem:[#allocation2 + $0x19] sm:$0xff]  ;;  %v607_v54 = vld [vmem:[#allocation2 + $0x21] sm:$0xff] }
  0xcf   : > { %v5912_v6 = vadd.f32 %v5641_v60, %v2920_v8  ;;  %v5919_v47 = vadd.f32 %v5641_v60, %v2921_v55  ;;  %v1613_v46 = vadd.f32 %v1589_v32, %v1511_v34  ;;  %v2095_v53 = vmul.f32 %v5461_v31, %v4009_v1  ;;  %v707_v48 = vld [vmem:[#allocation2 + $0x1a] sm:$0xff]  ;;  %v708_v32 = vld [vmem:[#allocation2 + $0x22] sm:$0xff] }
  0xd0   : > { %v2096_v18 = vmul.f32 %v5461_v31, %v4010_v23  ;;  %v1713_v50 = vadd.f32 %v1689_v0, %v1612_v3  ;;  %v5927_v29 = vmul.f32 %v5472_v19, %v4034_v43  ;;  %v5930_v22 = vmul.f32 %v5472_v19, %v4035_v13  ;;  %v808_v0 = vld [vmem:[#allocation2 + $0x1b] sm:$0xff]  ;;  %v809_v52 = vld [vmem:[#allocation2 + $0x23] sm:$0xff] }
  0xd1   : > { %v3004_v25 = vsub.f32 0.0, %v5912_v6  ;;  %v3005_v17 = vsub.f32 0.0, %v5919_v47  ;;  %v1714_v49 = vadd.f32 %v1690_v35, %v1613_v46  ;;  %v5936_v62 = vmul.f32 %v5483_v9, %v4059_v59  ;;  %v4135_v35 = vld [vmem:[%s4756_s12 + $0x141] sm:$0xff]  ;;  %v1012_v59 = vld [vmem:[#allocation2 + $0x30] sm:$0xff] }
  0xd2   : > { %v5939_v31 = vmul.f32 %v5483_v9, %v4060_v27  ;;  %v1814_v2 = vadd.f32 %v1790_v11, %v1713_v50  ;;  %v5942_v36 = vmul.f32 %v7611_v26, %v4084_v61  ;;  %v5945_v19 = vmul.f32 %v7611_v26, %v4085_v20  ;;  %v5956_v26 = vld [vmem:[%s7535_s2] ss:$0 sm:$0xff]  ;;  %v5965_v28 = vld [vmem:[%s7535_s2 + $0x1] ss:$0 sm:$0xff]  ;;  %v5979_v55 = vld [vmem:[%s7535_s2 + $0x3] ss:$0 sm:$0xff] }
  0xd3   : > { %v3046_v40 = vmul.f32 1.442695, %v3004_v25  ;;  %v3048_v42 = vmul.f32 1.442695, %v3005_v17  ;;  %v1815_v10 = vadd.f32 %v1791_v56, %v1714_v49  ;;  %v5948_v41 = vmul.f32 %v7612_v14, %v4109_v21  ;;  %7616 = vst [vmem:[#allocation8_spill] sm:$0xff] %v5956_v26  ;;  %v909_v4 = vld [vmem:[#allocation2 + $0x1c] sm:$0xff] }
  0xd4   : > { %v5951_v9 = vmul.f32 %v7612_v14, %v4110_v51  ;;  %v1915_v58 = vadd.f32 %v1891_v16, %v1814_v2  ;;  %v513_v37 = vmul.f32 %v5956_v26, %v505_v44  ;;  %v514_v24 = vmul.f32 %v5956_v26, %v506_v7  ;;  %v4134_v14 = vld [vmem:[%s4756_s12 + $0x139] sm:$0xff]  ;;  %7617 = vst [vmem:[#allocation10_spill] sm:$0xff] %v5965_v28  ;;  %v5972_v56 = vld [vmem:[%s7535_s2 + $0x2] ss:$0 sm:$0xff]  ;;  %v910_v16 = vld [vmem:[#allocation2 + $0x24] sm:$0xff] }
  0xd5   : > { %4333 = vpow2.f32 %v3046_v40  ;;  %v1916_v5 = vadd.f32 %v1892_v39, %v1815_v10  ;;  %v614_v38 = vmul.f32 %v5965_v28, %v606_v33  ;;  %v615_v8 = vmul.f32 %v5965_v28, %v607_v54  ;;  %7618 = vst [vmem:[#allocation3_spill] sm:$0xff] %v5972_v56  ;;  %v4159_v43 = vld [vmem:[%s4756_s12 + $0x13a] sm:$0xff]  ;;  %v5991_v25 = vld [vmem:[%s7535_s2 + $0x4] ss:$0 sm:$0xff]  ;;  %v1113_v49 = vld [vmem:[#allocation2 + $0x31] sm:$0xff] }
  0xd6   : > { %4335 = vpow2.f32 %v3048_v42  ;;  %v2017_v11 = vadd.f32 %v1993_v45, %v1915_v58  ;;  %v715_v1 = vmul.f32 %v5972_v56, %v707_v48  ;;  %v716_v23 = vmul.f32 %v5972_v56, %v708_v32  ;;  %7619 = vst [vmem:[#allocation7_spill] sm:$0xff] %v5979_v55  ;;  %v1013_v27 = vld [vmem:[#allocation2 + $0x38] sm:$0xff]  ;;  %v6002_v40 = vld [vmem:[%s7535_s2 + $0x5] ss:$0 sm:$0xff]  ;;  %v6012_v58 = vld [vmem:[%s7535_s2 + $0x6] ss:$0 sm:$0xff] }
  0xd7   : > { %v816_v34 = vmul.f32 %v5979_v55, %v808_v0  ;;  %v2018_v39 = vadd.f32 %v1994_v63, %v1916_v5  ;;  %v622_v13 = vadd.f32 %v614_v38, %v513_v37  ;;  %v623_v3 = vadd.f32 %v615_v8, %v514_v24  ;;  %v4160_v10 = vld [vmem:[%s4756_s12 + $0x142] sm:$0xff] }
  0xd8   : > { %v817_v45 = vmul.f32 %v5979_v55, %v809_v52  ;;  %v2119_v46 = vadd.f32 %v2095_v53, %v2017_v11  ;;  %v2601_v61 = vmul.f32 %v5529_v30, %v4134_v14  ;;  %v5986_v20 = vmul.f32 %v5529_v30, %v4135_v35  ;;  %v1114_v53 = vld [vmem:[#allocation2 + $0x39] sm:$0xff]  ;;  %v4185_v14 = vld [vmem:[%s4756_s12 + $0x143] sm:$0xff] }
  0xd9   : > { %v917_v63 = vmul.f32 %v5991_v25, %v909_v4  ;;  %v2120_v50 = vadd.f32 %v2096_v18, %v2018_v39  ;;  %v723_v21 = vadd.f32 %v715_v1, %v622_v13  ;;  %v724_v51 = vadd.f32 %v716_v23, %v623_v3  ;;  %v1215_v52 = vld [vmem:[#allocation2 + $0x3a] sm:$0xff]  ;;  %v6023_v4 = vld [vmem:[%s7535_s2 + $0x16] ss:$0 sm:$0xff]  ;;  %v6029_v1 = vld [vmem:[%s7535_s2 + $0x7] ss:$0 sm:$0xff] }
  0xda   : > { %v918_v17 = vmul.f32 %v5991_v25, %v910_v16  ;;  %v2220_v7 = vadd.f32 %v5927_v29, %v2119_v46  ;;  %v5997_v30 = vmul.f32 %v5547_v15, %v4159_v43  ;;  %v1020_v2 = vmul.f32 %v6002_v40, %v1012_v59  ;;  %v1214_v15 = vld [vmem:[#allocation2 + $0x32] sm:$0xff]  ;;  %v4184_v5 = vld [vmem:[%s4756_s12 + $0x13b] sm:$0xff]  ;;  %v4210_v39 = vld [vmem:[%s4756_s12 + $0x144] sm:$0xff] }
  0xdb   : > { %v4334_v44 = vpop.eup %4333  ;;  %v1021_v18 = vmul.f32 %v6002_v40, %v1013_v27  ;;  %v2221_v42 = vadd.f32 %v5930_v22, %v2120_v50  ;;  %v824_v29 = vadd.f32 %v816_v34, %v723_v21  ;;  %v825_v48 = vadd.f32 %v817_v45, %v724_v51  ;;  %v1316_v23 = vld [vmem:[#allocation2 + $0x3b] sm:$0xff]  ;;  %v6042_v46 = vld [vmem:[%s7535_s2 + $0x8] ss:$0 sm:$0xff] }
  0xdc   : > { %v4336_v33 = vpop.eup %4335  ;;  %v3100_v54 = vadd.f32 1.0, %v4334_v44  ;;  %v2321_v0 = vadd.f32 %v5936_v62, %v2220_v7  ;;  %v1121_v37 = vmul.f32 %v6012_v58, %v1113_v49  ;;  %v1122_v24 = vmul.f32 %v6012_v58, %v1114_v53  ;;  %v1315_v62 = vld [vmem:[#allocation2 + $0x33] sm:$0xff]  ;;  %v4209_v16 = vld [vmem:[%s4756_s12 + $0x13c] sm:$0xff]  ;;  %v1519_v49 = vld [vmem:[#allocation2 + $0x48] sm:$0xff] }
  0xdd   : > { %v3101_v32 = vadd.f32 1.0, %v4336_v33  ;;  %v2322_v22 = vadd.f32 %v5939_v31, %v2221_v42  ;;  %v925_v35 = vadd.f32 %v917_v63, %v824_v29  ;;  %v926_v38 = vadd.f32 %v918_v17, %v825_v48  ;;  %v1416_v3 = vld [vmem:[#allocation2 + $0x34] sm:$0xff]  ;;  %v1417_v63 = vld [vmem:[#allocation2 + $0x3c] sm:$0xff]  ;;  %v6052_v7 = vld [vmem:[%s7535_s2 + $0x9] ss:$0 sm:$0xff] }
  0xde   : > { %4337 = vrcp.f32 %v3100_v54  ;;  %v2422_v8 = vadd.f32 %v5942_v36, %v2321_v0  ;;  %v2703_v11 = vmul.f32 %v6023_v4, %v4160_v10  ;;  %v1222_v31 = vmul.f32 %v6029_v1, %v1214_v15  ;;  %v1620_v10 = vld [vmem:[#allocation2 + $0x49] sm:$0xff] }
  0xdf   : > { %4339 = vrcp.f32 %v3101_v32  ;;  %v2423_v34 = vadd.f32 %v5945_v19, %v2322_v22  ;;  %v1028_v36 = vadd.f32 %v1020_v2, %v925_v35  ;;  %v1029_v43 = vadd.f32 %v1021_v18, %v926_v38  ;;  %v1721_v29 = vld [vmem:[#allocation2 + $0x4a] sm:$0xff]  ;;  %v1823_v35 = vld [vmem:[#allocation2 + $0x53] sm:$0xff] }
  0xe0   : > { %v1223_v13 = vmul.f32 %v6029_v1, %v1215_v52  ;;  %v2524_v45 = vadd.f32 %v5948_v41, %v2422_v8  ;;  %v2803_v59 = vmul.f32 %v5573_v12, %v4184_v5  ;;  %v2804_v27 = vmul.f32 %v5573_v12, %v4185_v14  ;;  %v1520_v41 = vld [vmem:[#allocation2 + $0x50] sm:$0xff]  ;;  %v6062_v32 = vld [vmem:[%s7535_s2 + $0xa] ss:$0 sm:$0xff] }
  0xe1   : > { %v1323_v19 = vmul.f32 %v6042_v46, %v1315_v62  ;;  %v2525_v50 = vadd.f32 %v5951_v9, %v2423_v34  ;;  %v1129_v21 = vadd.f32 %v1121_v37, %v1028_v36  ;;  %v1130_v51 = vadd.f32 %v1122_v24, %v1029_v43  ;;  %v1722_v5 = vld [vmem:[#allocation2 + $0x52] sm:$0xff]  ;;  %v2026_v36 = vld [vmem:[#allocation2 + $0x60] sm:$0xff]  ;;  %v2027_v43 = vld [vmem:[#allocation2 + $0x68] sm:$0xff] }
  0xe2   : > { %v1324_v17 = vmul.f32 %v6042_v46, %v1316_v23  ;;  %v2625_v53 = vadd.f32 %v2601_v61, %v2524_v45  ;;  %v2904_v44 = vmul.f32 %v5587_v57, %v4209_v16  ;;  %v2905_v12 = vmul.f32 %v5587_v57, %v4210_v39  ;;  %v1621_v61 = vld [vmem:[#allocation2 + $0x51] sm:$0xff]  ;;  %v6084_v45 = vld [vmem:[%s7535_s2 + $0xd] ss:$0 sm:$0xff] }
  0xe3   : > { %v1424_v2 = vmul.f32 %v6052_v7, %v1416_v3  ;;  %v2626_v9 = vadd.f32 %v5986_v20, %v2525_v50  ;;  %v1230_v33 = vadd.f32 %v1222_v31, %v1129_v21  ;;  %v1231_v54 = vadd.f32 %v1223_v13, %v1130_v51  ;;  %v1822_v14 = vld [vmem:[#allocation2 + $0x4b] sm:$0xff]  ;;  %v1924_v39 = vld [vmem:[#allocation2 + $0x54] sm:$0xff] }
  0xe4   : > { %v4338_v18 = vpop.eup %4337  ;;  %v1425_v42 = vmul.f32 %v6052_v7, %v1417_v63  ;;  %v2726_v15 = vadd.f32 %v5997_v30, %v2625_v53  ;;  %v1527_v0 = vmul.f32 %v6062_v32, %v1519_v49  ;;  %v1528_v20 = vmul.f32 %v6062_v32, %v1520_v41  ;;  %v6070_v30 = vld [vmem:[%s7535_s2 + $0xb] ss:$0 sm:$0xff]  ;;  %v2127_v63 = vld [vmem:[#allocation2 + $0x61] sm:$0xff]  ;;  %v6092_v51 = vld [vmem:[%s7535_s2 + $0xe] ss:$0 sm:$0xff] }
  0xe5   : > { %v4340_v48 = vpop.eup %4339  ;;  %v3164_v57 = vmul.f32 %v4338_v18, %v5912_v6  ;;  %v2727_v24 = vadd.f32 %v2703_v11, %v2626_v9  ;;  %v1331_v52 = vadd.f32 %v1323_v19, %v1230_v33  ;;  %v1332_v22 = vadd.f32 %v1324_v17, %v1231_v54  ;;  %v1923_v11 = vld [vmem:[#allocation2 + $0x4c] sm:$0xff]  ;;  %v2228_v41 = vld [vmem:[#allocation2 + $0x62] sm:$0xff] }
  0xe6   : > { %v3165_v37 = vmul.f32 %v4340_v48, %v5919_v47  ;;  %v2827_v6 = vadd.f32 %v2803_v59, %v2726_v15  ;;  %v1628_v38 = vmul.f32 %v6070_v30, %v1620_v10  ;;  %v1629_v62 = vmul.f32 %v6070_v30, %v1621_v61  ;;  %v6077_v47 = vld [vmem:[%s7535_s2 + $0xc] ss:$0 sm:$0xff]  ;;  %v2329_v33 = vld [vmem:[#allocation2 + $0x63] sm:$0xff]  ;;  %v6112_v61 = vld [vmem:[%s7535_s2 + $0x10] ss:$0 sm:$0xff] }
  0xe7   : > { %v1729_v8 = vmul.f32 %v6077_v47, %v1721_v29  ;;  %v2828_v23 = vadd.f32 %v2804_v27, %v2727_v24  ;;  %v1432_v34 = vadd.f32 %v1424_v2, %v1331_v52  ;;  %v1433_v16 = vadd.f32 %v1425_v42, %v1332_v22  ;;  %v2128_v49 = vld [vmem:[#allocation2 + $0x69] sm:$0xff]  ;;  %v2532_v52 = vld [vmem:[#allocation2 + $0x78] sm:$0xff] }
  0xe8   : > { %v3191_v31 = vpack.c.bf16 %v3165_v37, %v3164_v57  ;;  %v2928_v13 = vadd.f32 %v2904_v44, %v2827_v6  ;;  %v1730_v3 = vmul.f32 %v6077_v47, %v1722_v5  ;;  %v1830_v59 = vmul.f32 %v6084_v45, %v1822_v14  ;;  %v2229_v53 = vld [vmem:[#allocation2 + $0x6a] sm:$0xff] }
  0xe9   : > { %v1831_v19 = vmul.f32 %v6084_v45, %v1823_v35  ;;  %v2929_v27 = vadd.f32 %v2905_v12, %v2828_v23  ;;  %v1535_v50 = vadd.f32 %v1527_v0, %v1432_v34  ;;  %v1536_v21 = vadd.f32 %v1528_v20, %v1433_v16  ;;  %v6102_v12 = vld [vmem:[%s7535_s2 + $0xf] ss:$0 sm:$0xff]  ;;  %v2430_v57 = vld [vmem:[#allocation2 + $0x64] sm:$0xff]  ;;  %v6132_v35 = vld [vmem:[%s7535_s2 + $0x12] ss:$0 sm:$0xff] }
  0xea   : > { %4220 = vmatmul.msk.bf16.gmra.mxu1 %vm388_vm1, %v3191_v31  ;;  %v1931_v17 = vmul.f32 %v6092_v51, %v1923_v11  ;;  %v6096_v44 = vadd.f32 %v5641_v60, %v2928_v13  ;;  %v1932_v2 = vmul.f32 %v6092_v51, %v1924_v39  ;;  %v2034_v18 = vmul.f32 %v6102_v12, %v2026_v36  ;;  %v2330_v48 = vld [vmem:[#allocation2 + $0x6b] sm:$0xff]  ;;  %v433_v11 = vld [vmem:[%s4756_s12 + $0x38] sm:$0xff] }
  0xeb   : > { %v2035_v9 = vmul.f32 %v6102_v12, %v2027_v43  ;;  %v6107_v54 = vadd.f32 %v5641_v60, %v2929_v27  ;;  %v1636_v42 = vadd.f32 %v1628_v38, %v1535_v50  ;;  %v1637_v10 = vadd.f32 %v1629_v62, %v1536_v21  ;;  %v2431_v15 = vld [vmem:[#allocation2 + $0x6c] sm:$0xff]  ;;  %v2533_v38 = vld [vmem:[#allocation2 + $0x80] sm:$0xff] }
  0xec   : > { %v2135_v29 = vmul.f32 %v6112_v61, %v2127_v63  ;;  %v3012_v0 = vsub.f32 0.0, %v6096_v44  ;;  %v2136_v20 = vmul.f32 %v6112_v61, %v2128_v49  ;;  %v6120_v60 = vld [vmem:[%s7535_s2 + $0x11] ss:$0 sm:$0xff]  ;;  %v6135_v6 = vmul.f32 %v6132_v35, %v2329_v33  ;;  %v534_v36 = vld [vmem:[%s4756_s12 + $0x39] sm:$0xff]  ;;  %v6158_v63 = vld [vmem:[%s7535_s2 + $0x14] ss:$0 sm:$0xff] }
  0xed   : > { %v6123_v37 = vmul.f32 %v6120_v60, %v2228_v41  ;;  %v6126_v24 = vmul.f32 %v6120_v60, %v2229_v53  ;;  %v3013_v22 = vsub.f32 0.0, %v6107_v54  ;;  %v1737_v5 = vadd.f32 %v1729_v8, %v1636_v42  ;;  %v432_v62 = vld [vmem:[%s4756_s12 + $0x30] sm:$0xff]  ;;  %7621 = vst [vmem:[#allocation4_spill] sm:$0xff] %v6158_v63  ;;  %v2633_v50 = vld [vmem:[#allocation2 + $0x79] sm:$0xff] }
  0xee   : > { %v1738_v14 = vadd.f32 %v1730_v3, %v1637_v10  ;;  %v3062_v31 = vmul.f32 1.442695, %v3012_v0  ;;  %v6140_v23 = vmul.f32 %v6132_v35, %v2330_v48  ;;  %v6145_v8 = vld [vmem:[%s7535_s2 + $0x13] ss:$0 sm:$0xff]  ;;  %v6161_v27 = vmul.f32 %v6158_v63, %v2532_v52  ;;  %v635_v49 = vld [vmem:[%s4756_s12 + $0x3a] sm:$0xff] }
  0xef   : > { %7620 = vst [vmem:[#allocation9_spill] sm:$0xff] %v6145_v8  ;;  %v6148_v34 = vmul.f32 %v6145_v8, %v2430_v57  ;;  %v6151_v16 = vmul.f32 %v6145_v8, %v2431_v15  ;;  %v533_v39 = vld [vmem:[%s4756_s12 + $0x31] sm:$0xff]  ;;  %v3064_v43 = vmul.f32 1.442695, %v3013_v22  ;;  %v1838_v13 = vadd.f32 %v1830_v59, %v1737_v5  ;;  %v2634_v10 = vld [vmem:[#allocation2 + $0x81] sm:$0xff] }
  0xf0   : > { %v1839_v3 = vadd.f32 %v1831_v19, %v1738_v14  ;;  %v634_v21 = vld [vmem:[%s4756_s12 + $0x32] sm:$0xff]  ;;  %4341 = vpow2.f32 %v3062_v31  ;;  %v6166_v41 = vmul.f32 %v6158_v63, %v2533_v38  ;;  %v459_v59 = vmul.f32 %v5956_v26, %v432_v62  ;;  %v2734_v48 = vld [vmem:[#allocation2 + $0x7a] sm:$0xff]  ;;  %v2735_v62 = vld [vmem:[#allocation2 + $0x82] sm:$0xff] }
  0xf1   : > { %v460_v19 = vmul.f32 %v5956_v26, %v433_v11  ;;  %v735_v53 = vld [vmem:[%s4756_s12 + $0x33] sm:$0xff]  ;;  %4343 = vpow2.f32 %v3064_v43  ;;  %v1939_v33 = vadd.f32 %v1931_v17, %v1838_v13  ;;  %v560_v57 = vmul.f32 %v5965_v28, %v533_v39  ;;  %v736_v15 = vld [vmem:[%s4756_s12 + $0x3b] sm:$0xff]  ;;  %v3720_v43 = vld [vmem:[%s4756_s12 + $0x48] sm:$0xff] }
  0xf2   : > { %v1940_v42 = vadd.f32 %v1932_v2, %v1839_v3  ;;  %v6176_v0 = vld [vmem:[%s7535_s2 + $0x15] ss:$0 sm:$0xff]  ;;  %v561_v22 = vmul.f32 %v5965_v28, %v534_v36  ;;  %v661_v17 = vmul.f32 %v5972_v56, %v634_v21  ;;  %v662_v2 = vmul.f32 %v5972_v56, %v635_v49  ;;  %v837_v39 = vld [vmem:[%s4756_s12 + $0x3c] sm:$0xff] }
  0xf3   : > { %7622 = vst [vmem:[#allocation5_spill] sm:$0xff] %v6176_v0  ;;  %v6179_v52 = vmul.f32 %v6176_v0, %v2633_v50  ;;  %v836_v5 = vld [vmem:[%s4756_s12 + $0x34] sm:$0xff]  ;;  %v2042_v14 = vadd.f32 %v2034_v18, %v1939_v33  ;;  %v584_v11 = vadd.f32 %v560_v57, %v459_v59  ;;  %v762_v31 = vmul.f32 %v5979_v55, %v735_v53  ;;  %v3745_v33 = vld [vmem:[%s4756_s12 + $0x49] sm:$0xff] }
  0xf4   : > { %v2043_v38 = vadd.f32 %v2035_v9, %v1940_v42  ;;  %v6189_v13 = vmul.f32 %v6176_v0, %v2634_v10  ;;  %v6192_v36 = vmul.f32 %v6023_v4, %v2734_v48  ;;  %v585_v3 = vadd.f32 %v561_v22, %v460_v19  ;;  %v3721_v59 = vld [vmem:[%s4756_s12 + $0x50] sm:$0xff]  ;;  %v2835_v22 = vld [vmem:[#allocation2 + $0x7b] sm:$0xff] }
  0xf5   : > { %v763_v50 = vmul.f32 %v5979_v55, %v736_v15  ;;  %v2143_v21 = vadd.f32 %v2135_v29, %v2042_v14  ;;  %v685_v18 = vadd.f32 %v661_v17, %v584_v11  ;;  %v863_v9 = vmul.f32 %v5991_v25, %v836_v5  ;;  %v3746_v5 = vld [vmem:[%s4756_s12 + $0x51] sm:$0xff] }
  0xf6   : > { %v2144_v49 = vadd.f32 %v2136_v20, %v2043_v38  ;;  %v4342_v53 = vpop.eup %4341  ;;  %v6199_v42 = vmul.f32 %v6023_v4, %v2735_v62  ;;  %v686_v10 = vadd.f32 %v662_v2, %v585_v3  ;;  %v864_v48 = vmul.f32 %v5991_v25, %v837_v39  ;;  %v3770_v11 = vld [vmem:[%s4756_s12 + $0x4a] sm:$0xff] }
  0xf7   : > { %v965_v19 = vmul.f32 %v6002_v40, %v3720_v43  ;;  %v4344_v57 = vpop.eup %4343  ;;  %v3108_v15 = vadd.f32 1.0, %v4342_v53  ;;  %v2244_v29 = vadd.f32 %v6123_v37, %v2143_v21  ;;  %v786_v17 = vadd.f32 %v762_v31, %v685_v18  ;;  %v2836_v37 = vld [vmem:[#allocation2 + $0x83] sm:$0xff]  ;;  %v3771_v31 = vld [vmem:[%s4756_s12 + $0x52] sm:$0xff] }
  0xf8   : > { %v2245_v20 = vadd.f32 %v6126_v24, %v2144_v49  ;;  %v3109_v14 = vadd.f32 1.0, %v4344_v57  ;;  %v787_v38 = vadd.f32 %v763_v50, %v686_v10  ;;  %v966_v62 = vmul.f32 %v6002_v40, %v3721_v59  ;;  %v2936_v24 = vld [vmem:[#allocation2 + $0x7c] sm:$0xff]  ;;  %v6215_v50 = vld [vmem:[%s7535_s2 + $0x17] ss:$0 sm:$0xff]  ;;  %v3795_v18 = vld [vmem:[%s4756_s12 + $0x4b] sm:$0xff] }
  0xf9   : > { %v1067_v2 = vmul.f32 %v6012_v58, %v3745_v33  ;;  %4345 = vrcp.f32 %v3108_v15  ;;  %v2345_v39 = vadd.f32 %v6135_v6, %v2244_v29  ;;  %v887_v3 = vadd.f32 %v863_v9, %v786_v17  ;;  %v2937_v9 = vld [vmem:[#allocation2 + $0x84] sm:$0xff]  ;;  %v3796_v10 = vld [vmem:[%s4756_s12 + $0x53] sm:$0xff] }
  0xfa   : > { %v2346_v43 = vadd.f32 %v6140_v23, %v2245_v20  ;;  %4347 = vrcp.f32 %v3109_v14  ;;  %v2843_v21 = vmul.f32 %v6215_v50, %v2835_v22  ;;  %v888_v49 = vadd.f32 %v864_v48, %v787_v38  ;;  %v3820_v57 = vld [vmem:[%s4756_s12 + $0x4c] sm:$0xff]  ;;  %v6229_v48 = vld [vmem:[%s7535_s2 + $0x18] ss:$0 sm:$0xff]  ;;  %v3845_v14 = vld [vmem:[%s4756_s12 + $0x60] sm:$0xff] }
  0xfb   : > { %v1068_v6 = vmul.f32 %v6012_v58, %v3746_v5  ;;  %v2446_v23 = vadd.f32 %v6148_v34, %v2345_v39  ;;  %v989_v33 = vadd.f32 %v965_v19, %v887_v3  ;;  %v1168_v53 = vmul.f32 %v6029_v1, %v3770_v11  ;;  %v3821_v20 = vld [vmem:[%s4756_s12 + $0x54] sm:$0xff]  ;;  %v3846_v38 = vld [vmem:[%s4756_s12 + $0x68] sm:$0xff] }
  0xfc   : > { %v2447_v59 = vadd.f32 %v6151_v16, %v2346_v43  ;;  %v2844_v15 = vmul.f32 %v6215_v50, %v2836_v37  ;;  %v2944_v29 = vmul.f32 %v6229_v48, %v2936_v24  ;;  %v990_v34 = vadd.f32 %v966_v62, %v888_v49  ;;  %v3870_v3 = vld [vmem:[%s4756_s12 + $0x61] sm:$0xff] }
  0xfd   : > { %v1169_v16 = vmul.f32 %v6029_v1, %v3771_v31  ;;  %v2548_v19 = vadd.f32 %v6161_v27, %v2446_v23  ;;  %v1091_v17 = vadd.f32 %v1067_v2, %v989_v33  ;;  %v1269_v5 = vmul.f32 %v6042_v46, %v3795_v18  ;;  %v3871_v31 = vld [vmem:[%s4756_s12 + $0x69] sm:$0xff] }
  0xfe   : > { %v2549_v22 = vadd.f32 %v6166_v41, %v2447_v59  ;;  %v2945_v11 = vmul.f32 %v6229_v48, %v2937_v9  ;;  %v1092_v39 = vadd.f32 %v1068_v6, %v990_v34  ;;  %v1270_v62 = vmul.f32 %v6042_v46, %v3796_v10  ;;  %v3895_v49 = vld [vmem:[%s4756_s12 + $0x62] sm:$0xff]  ;;  %v3896_v10 = vld [vmem:[%s4756_s12 + $0x6a] sm:$0xff] }
  0xff   : > { %v1370_v43 = vmul.f32 %v6052_v7, %v3820_v57  ;;  %v4346_v37 = vpop.eup %4345  ;;  %v2649_v24 = vadd.f32 %v6179_v52, %v2548_v19  ;;  %v1192_v41 = vadd.f32 %v1168_v53, %v1091_v17  ;;  %v1371_v2 = vmul.f32 %v6052_v7, %v3821_v20  ;;  %v3920_v57 = vld [vmem:[%s4756_s12 + $0x63] sm:$0xff]  ;;  %v3921_v34 = vld [vmem:[%s4756_s12 + $0x6b] sm:$0xff] }
 0x100   : > { %v2650_v27 = vadd.f32 %v6189_v13, %v2549_v22  ;;  %v4348_v18 = vpop.eup %4347  ;;  %v3172_v6 = vmul.f32 %v4346_v37, %v6096_v44  ;;  %v1193_v23 = vadd.f32 %v1169_v16, %v1092_v39  ;;  %v1472_v59 = vmul.f32 %v6062_v32, %v3845_v14  ;;  %v3970_v14 = vld [vmem:[%s4756_s12 + $0x78] sm:$0xff] }
 0x101   : > { %v1473_v52 = vmul.f32 %v6062_v32, %v3846_v38  ;;  %v3173_v9 = vmul.f32 %v4348_v18, %v6107_v54  ;;  %v2750_v13 = vadd.f32 %v6192_v36, %v2649_v24  ;;  %v1293_v53 = vadd.f32 %v1269_v5, %v1192_v41  ;;  %v3945_v54 = vld [vmem:[%s4756_s12 + $0x64] sm:$0xff]  ;;  %v3946_v5 = vld [vmem:[%s4756_s12 + $0x6c] sm:$0xff] }
 0x102   : > { %v2751_v33 = vadd.f32 %v6199_v42, %v2650_v27  ;;  %v1294_v20 = vadd.f32 %v1270_v62, %v1193_v23  ;;  %v1574_v44 = vmul.f32 %v6070_v30, %v3870_v3  ;;  %v1575_v16 = vmul.f32 %v6070_v30, %v3871_v31  ;;  %v3971_v38 = vld [vmem:[%s4756_s12 + $0x80] sm:$0xff] }
 0x103   : > { %v1675_v19 = vmul.f32 %v6077_v47, %v3895_v49  ;;  %v3195_v22 = vpack.c.bf16 %v3173_v9, %v3172_v6  ;;  %v2851_v17 = vadd.f32 %v2843_v21, %v2750_v13  ;;  %v1394_v42 = vadd.f32 %v1370_v43, %v1293_v53  ;;  %v3995_v27 = vld [vmem:[%s4756_s12 + $0x79] sm:$0xff]  ;;  %v3996_v3 = vld [vmem:[%s4756_s12 + $0x81] sm:$0xff] }
 0x104   : > { %v2852_v36 = vadd.f32 %v2844_v15, %v2751_v33  ;;  %v1395_v39 = vadd.f32 %v1371_v2, %v1294_v20  ;;  %v1676_v62 = vmul.f32 %v6077_v47, %v3896_v10  ;;  %v1776_v37 = vmul.f32 %v6084_v45, %v3920_v57  ;;  %v4020_v2 = vld [vmem:[%s4756_s12 + $0x7a] sm:$0xff]  ;;  %v4021_v31 = vld [vmem:[%s4756_s12 + $0x82] sm:$0xff] }
 0x105   : > { %v1777_v24 = vmul.f32 %v6084_v45, %v3921_v34  ;;  %4224 = vmatmul.msk.bf16.gmra.mxu2 %vm388_vm1, %v3195_v22  ;;  %v2952_v21 = vadd.f32 %v2944_v29, %v2851_v17  ;;  %v1496_v15 = vadd.f32 %v1472_v59, %v1394_v42  ;;  %v1877_v43 = vmul.f32 %v6092_v51, %v3945_v54  ;;  %v4045_v9 = vld [vmem:[%s4756_s12 + $0x7b] sm:$0xff]  ;;  %v4046_v33 = vld [vmem:[%s4756_s12 + $0x83] sm:$0xff]  ;;  %v4095_v42 = vld [vmem:[%s4756_s12 + $0x90] sm:$0xff] }
 0x106   : > { %v2953_v41 = vadd.f32 %v2945_v11, %v2852_v36  ;;  %v1497_v49 = vadd.f32 %v1473_v52, %v1395_v39  ;;  %v1878_v18 = vmul.f32 %v6092_v51, %v3946_v5  ;;  %v1979_v6 = vmul.f32 %v6102_v12, %v3970_v14  ;;  %v6280_v29 = vld [vmem:[%s7536_s3] ss:$0 sm:$0xff]  ;;  %v4071_v10 = vld [vmem:[%s4756_s12 + $0x84] sm:$0xff] }
 0x107   : > { %v1980_v23 = vmul.f32 %v6102_v12, %v3971_v38  ;;  %v6283_v11 = vadd.f32 %v6280_v29, %v2952_v21  ;;  %v1598_v52 = vadd.f32 %v1574_v44, %v1496_v15  ;;  %v2081_v13 = vmul.f32 %v6112_v61, %v3995_v27  ;;  %v4070_v53 = vld [vmem:[%s4756_s12 + $0x7c] sm:$0xff]  ;;  %v4120_v27 = vld [vmem:[%s4756_s12 + $0x91] sm:$0xff] }
 0x108   : > { %v6286_v59 = vadd.f32 %v6280_v29, %v2953_v41  ;;  %v1599_v57 = vadd.f32 %v1575_v16, %v1497_v49  ;;  %v2082_v34 = vmul.f32 %v6112_v61, %v3996_v3  ;;  %v2182_v20 = vmul.f32 %v6120_v60, %v4020_v2  ;;  %v4096_v16 = vld [vmem:[%s4756_s12 + $0x98] sm:$0xff] }
 0x109   : > { %v6295_v54 = vmul.f32 %v6120_v60, %v4021_v31  ;;  %v3020_v22 = vsub.f32 0.0, %v6283_v11  ;;  %v1699_v17 = vadd.f32 %v1675_v19, %v1598_v52  ;;  %v6300_v36 = vmul.f32 %v6132_v35, %v4045_v9  ;;  %v4121_v19 = vld [vmem:[%s4756_s12 + $0x99] sm:$0xff] }
 0x10a   : > { %v3021_v44 = vsub.f32 0.0, %v6286_v59  ;;  %v1700_v5 = vadd.f32 %v1676_v62, %v1599_v57  ;;  %v6305_v14 = vmul.f32 %v6132_v35, %v4046_v33  ;;  %v6308_v38 = vmul.f32 %v6145_v8, %v4070_v53  ;;  %v4145_v62 = vld [vmem:[%s4756_s12 + $0x92] sm:$0xff]  ;;  %v6320_v2 = vld [vmem:[%s4756_s12 + $0x9a] sm:$0xff] }
 0x10b   : > { %v6311_v39 = vmul.f32 %v6145_v8, %v4071_v10  ;;  %v3078_v21 = vmul.f32 1.442695, %v3020_v22  ;;  %v1800_v15 = vadd.f32 %v1776_v37, %v1699_v17  ;;  %v6316_v3 = vmul.f32 %v6158_v63, %v4095_v42  ;;  %v6326_v9 = vld [vmem:[%s4756_s12 + $0x93] sm:$0xff]  ;;  %v6331_v53 = vld [vmem:[%s4756_s12 + $0x9b] sm:$0xff] }
 0x10c   : > { %v3080_v41 = vmul.f32 1.442695, %v3021_v44  ;;  %v1801_v31 = vadd.f32 %v1777_v24, %v1700_v5  ;;  %v6323_v49 = vmul.f32 %v6158_v63, %v4096_v16  ;;  %v467_v52 = vmul.f32 %v5956_v26, %v4095_v42  ;;  %v6334_v10 = vld [vmem:[%s4756_s12 + $0x94] sm:$0xff]  ;;  %v6339_v44 = vld [vmem:[%s4756_s12 + $0x9c] sm:$0xff] }
 0x10d   : > { %v468_v33 = vmul.f32 %v5956_v26, %v4096_v16  ;;  %4349 = vpow2.f32 %v3078_v21  ;;  %v1901_v37 = vadd.f32 %v1877_v43, %v1800_v15  ;;  %v568_v57 = vmul.f32 %v5965_v28, %v4120_v27  ;;  %v3728_v15 = vld [vmem:[%s4756_s12 + $0xa8] sm:$0xff] }
 0x10e   : > { %v569_v24 = vmul.f32 %v5965_v28, %v4121_v19  ;;  %4351 = vpow2.f32 %v3080_v41  ;;  %v1902_v22 = vadd.f32 %v1878_v18, %v1801_v31  ;;  %v669_v17 = vmul.f32 %v5972_v56, %v4145_v62  ;;  %v3729_v28 = vld [vmem:[%s4756_s12 + $0xb0] sm:$0xff] }
 0x10f   : > { %v670_v42 = vmul.f32 %v5972_v56, %v6320_v2  ;;  %v2003_v43 = vadd.f32 %v1979_v6, %v1901_v37  ;;  %v592_v16 = vadd.f32 %v568_v57, %v467_v52  ;;  %v770_v21 = vmul.f32 %v5979_v55, %v6326_v9  ;;  %v3753_v37 = vld [vmem:[%s4756_s12 + $0xa9] sm:$0xff]  ;;  %v3754_v57 = vld [vmem:[%s4756_s12 + $0xb1] sm:$0xff] }
 0x110   : > { %v593_v5 = vadd.f32 %v569_v24, %v468_v33  ;;  %v2004_v26 = vadd.f32 %v1980_v23, %v1902_v22  ;;  %v2587_v41 = vmul.f32 %v6176_v0, %v4120_v27  ;;  %v771_v18 = vmul.f32 %v5979_v55, %v6331_v53 }
 0x111   : > { %v871_v31 = vmul.f32 %v5991_v25, %v6334_v10  ;;  %v2105_v56 = vadd.f32 %v2081_v13, %v2003_v43  ;;  %v693_v6 = vadd.f32 %v669_v17, %v592_v16  ;;  %v872_v33 = vmul.f32 %v5991_v25, %v6339_v44  ;;  %v3779_v43 = vld [vmem:[%s4756_s12 + $0xb2] sm:$0xff] }
 0x112   : > { %v694_v52 = vadd.f32 %v670_v42, %v593_v5  ;;  %v2106_v23 = vadd.f32 %v2082_v34, %v2004_v26  ;;  %v2588_v27 = vmul.f32 %v6176_v0, %v4121_v19  ;;  %v2688_v24 = vmul.f32 %v6023_v4, %v4145_v62  ;;  %v3778_v42 = vld [vmem:[%s4756_s12 + $0xaa] sm:$0xff] }
 0x113   : > { %v973_v22 = vmul.f32 %v6002_v40, %v3728_v15  ;;  %v4350_v55 = vpop.eup %4349  ;;  %v2206_v63 = vadd.f32 %v2182_v20, %v2105_v56  ;;  %v794_v8 = vadd.f32 %v770_v21, %v693_v6  ;;  %v974_v17 = vmul.f32 %v6002_v40, %v3729_v28  ;;  %v3803_v21 = vld [vmem:[%s4756_s12 + $0xab] sm:$0xff] }
 0x114   : > { %v795_v13 = vadd.f32 %v771_v18, %v694_v52  ;;  %v4352_v16 = vpop.eup %4351  ;;  %v3116_v5 = vadd.f32 1.0, %v4350_v55  ;;  %v2207_v26 = vadd.f32 %v6295_v54, %v2106_v23  ;;  %v1075_v34 = vmul.f32 %v6012_v58, %v3753_v37  ;;  %v3804_v54 = vld [vmem:[%s4756_s12 + $0xb3] sm:$0xff] }
 0x115   : > { %v1076_v19 = vmul.f32 %v6012_v58, %v3754_v57  ;;  %v3117_v62 = vadd.f32 1.0, %v4352_v16  ;;  %v2307_v15 = vadd.f32 %v6300_v36, %v2206_v63  ;;  %v895_v56 = vadd.f32 %v871_v31, %v794_v8  ;;  %v3828_v63 = vld [vmem:[%s4756_s12 + $0xac] sm:$0xff] }
 0x116   : > { %v896_v20 = vadd.f32 %v872_v33, %v795_v13  ;;  %4353 = vrcp.f32 %v3116_v5  ;;  %v2308_v28 = vadd.f32 %v6305_v14, %v2207_v26  ;;  %v1176_v18 = vmul.f32 %v6029_v1, %v3778_v42  ;;  %v3829_v33 = vld [vmem:[%s4756_s12 + $0xb4] sm:$0xff]  ;;  %v3853_v13 = vld [vmem:[%s4756_s12 + $0xc0] sm:$0xff] }
 0x117   : > { %v1177_v55 = vmul.f32 %v6029_v1, %v3779_v43  ;;  %4355 = vrcp.f32 %v3117_v62  ;;  %v2408_v6 = vadd.f32 %v6308_v38, %v2307_v15  ;;  %v997_v52 = vadd.f32 %v973_v22, %v895_v56  ;;  %v3878_v26 = vld [vmem:[%s4756_s12 + $0xc1] sm:$0xff] }
 0x118   : > { %v998_v37 = vadd.f32 %v974_v17, %v896_v20  ;;  %v2409_v8 = vadd.f32 %v6311_v39, %v2308_v28  ;;  %v2689_v36 = vmul.f32 %v6023_v4, %v6320_v2  ;;  %v2789_v14 = vmul.f32 %v6215_v50, %v6326_v9  ;;  %v3854_v17 = vld [vmem:[%s4756_s12 + $0xc8] sm:$0xff] }
 0x119   : > { %v1277_v31 = vmul.f32 %v6042_v46, %v3803_v21  ;;  %v2510_v57 = vadd.f32 %v6316_v3, %v2408_v6  ;;  %v1099_v23 = vadd.f32 %v1075_v34, %v997_v52  ;;  %v1278_v22 = vmul.f32 %v6042_v46, %v3804_v54  ;;  %v3879_v34 = vld [vmem:[%s4756_s12 + $0xc9] sm:$0xff] }
 0x11a   : > { %v1100_v38 = vadd.f32 %v1076_v19, %v998_v37  ;;  %v2511_v39 = vadd.f32 %v6323_v49, %v2409_v8  ;;  %v2790_v2 = vmul.f32 %v6215_v50, %v6331_v53  ;;  %v2890_v9 = vmul.f32 %v6229_v48, %v6334_v10  ;;  %v3903_v15 = vld [vmem:[%s4756_s12 + $0xc2] sm:$0xff]  ;;  %v3929_v52 = vld [vmem:[%s4756_s12 + $0xcb] sm:$0xff] }
 0x11b   : > { %v1378_v42 = vmul.f32 %v6052_v7, %v3828_v63  ;;  %v2611_v43 = vadd.f32 %v2587_v41, %v2510_v57  ;;  %v1200_v16 = vadd.f32 %v1176_v18, %v1099_v23  ;;  %v1379_v5 = vmul.f32 %v6052_v7, %v3829_v33  ;;  %v3904_v18 = vld [vmem:[%s4756_s12 + $0xca] sm:$0xff]  ;;  %v3978_v33 = vld [vmem:[%s4756_s12 + $0xd8] sm:$0xff] }
 0x11c   : > { %v1201_v3 = vadd.f32 %v1177_v55, %v1100_v38  ;;  %v4354_v19 = vpop.eup %4353  ;;  %v2612_v62 = vadd.f32 %v2588_v27, %v2511_v39  ;;  %v2891_v49 = vmul.f32 %v6229_v48, %v6339_v44  ;;  %v1480_v53 = vmul.f32 %v6062_v32, %v3853_v13  ;;  %v3928_v27 = vld [vmem:[%s4756_s12 + $0xc3] sm:$0xff]  ;;  %v4003_v39 = vld [vmem:[%s4756_s12 + $0xd9] sm:$0xff] }
 0x11d   : > { %v1481_v10 = vmul.f32 %v6062_v32, %v3854_v17  ;;  %v4356_v41 = vpop.eup %4355  ;;  %v3180_v56 = vmul.f32 %v4354_v19, %v6283_v11  ;;  %v2712_v20 = vadd.f32 %v2688_v24, %v2611_v43  ;;  %v1301_v21 = vadd.f32 %v1277_v31, %v1200_v16  ;;  %v3953_v8 = vld [vmem:[%s4756_s12 + $0xc4] sm:$0xff]  ;;  %v3954_v31 = vld [vmem:[%s4756_s12 + $0xcc] sm:$0xff]  ;;  %v4028_v43 = vld [vmem:[%s4756_s12 + $0xda] sm:$0xff] }
 0x11e   : > { %v1302_v28 = vadd.f32 %v1278_v22, %v1201_v3  ;;  %v3181_v55 = vmul.f32 %v4356_v41, %v6286_v59  ;;  %v2713_v44 = vadd.f32 %v2689_v36, %v2612_v62  ;;  %v1582_v54 = vmul.f32 %v6070_v30, %v3878_v26  ;;  %v3979_v38 = vld [vmem:[%s4756_s12 + $0xe0] sm:$0xff] }
 0x11f   : > { %v1583_v6 = vmul.f32 %v6070_v30, %v3879_v34  ;;  %v2813_v37 = vadd.f32 %v2789_v14, %v2712_v20  ;;  %v1402_v63 = vadd.f32 %v1378_v42, %v1301_v21  ;;  %v1683_v24 = vmul.f32 %v6077_v47, %v3903_v15  ;;  %v4004_v42 = vld [vmem:[%s4756_s12 + $0xe1] sm:$0xff] }
 0x120   : > { %v1403_v11 = vadd.f32 %v1379_v5, %v1302_v28  ;;  %v3199_v57 = vpack.c.bf16 %v3181_v55, %v3180_v56  ;;  %v2814_v59 = vadd.f32 %v2790_v2, %v2713_v44  ;;  %v1684_v36 = vmul.f32 %v6077_v47, %v3904_v18  ;;  %v4029_v5 = vld [vmem:[%s4756_s12 + $0xe2] sm:$0xff]  ;;  %v4103_v44 = vld [vmem:[%s4756_s12 + $0xf0] sm:$0xff] }
 0x121   : > { %v1784_v23 = vmul.f32 %v6084_v45, %v3928_v27  ;;  %v2914_v22 = vadd.f32 %v2890_v9, %v2813_v37  ;;  %v1504_v14 = vadd.f32 %v1480_v53, %v1402_v63  ;;  %v1785_v17 = vmul.f32 %v6084_v45, %v3929_v52  ;;  %v4053_v53 = vld [vmem:[%s4756_s12 + $0xdb] sm:$0xff]  ;;  %v4079_v21 = vld [vmem:[%s4756_s12 + $0xe4] sm:$0xff]  ;;  %v7623_v37 = vld [vmem:[#allocation9_spill] sm:$0xff] }
 0x122   : > { %v1505_v13 = vadd.f32 %v1481_v10, %v1403_v11  ;;  %4228 = vmatmul.msk.bf16.gmra.mxu3 %vm388_vm1, %v3199_v57  ;;  %v2915_v2 = vadd.f32 %v2891_v49, %v2814_v59  ;;  %v1885_v16 = vmul.f32 %v6092_v51, %v3953_v8  ;;  %v1886_v3 = vmul.f32 %v6092_v51, %v3954_v31  ;;  %v4054_v10 = vld [vmem:[%s4756_s12 + $0xe3] sm:$0xff]  ;;  %v4104_v11 = vld [vmem:[%s4756_s12 + $0xf8] sm:$0xff] }
 0x123   : > { %v1987_v9 = vmul.f32 %v6102_v12, %v3978_v33  ;;  %v6423_v26 = vadd.f32 %v6280_v29, %v2914_v22  ;;  %v1606_v34 = vadd.f32 %v1582_v54, %v1504_v14  ;;  %v1988_v62 = vmul.f32 %v6102_v12, %v3979_v38  ;;  %v4078_v49 = vld [vmem:[%s4756_s12 + $0xdc] sm:$0xff]  ;;  %v4128_v57 = vld [vmem:[%s4756_s12 + $0xf1] sm:$0xff]  ;;  %v7624_v22 = vld [vmem:[#allocation4_spill] sm:$0xff] }
 0x124   : > { %v1607_v19 = vadd.f32 %v1583_v6, %v1505_v13  ;;  %v6430_v15 = vadd.f32 %v6280_v29, %v2915_v2  ;;  %v2089_v41 = vmul.f32 %v6112_v61, %v4003_v39  ;;  %v2090_v56 = vmul.f32 %v6112_v61, %v4004_v42  ;;  %v4129_v59 = vld [vmem:[%s4756_s12 + $0xf9] sm:$0xff]  ;;  %v7625_v42 = vld [vmem:[#allocation8_spill] sm:$0xff] }
 0x125   : > { %v2190_v20 = vmul.f32 %v6120_v60, %v4028_v43  ;;  %v2998_v28 = vsub.f32 0.0, %v6423_v26  ;;  %v1707_v18 = vadd.f32 %v1683_v24, %v1606_v34  ;;  %v2191_v55 = vmul.f32 %v6120_v60, %v4029_v5  ;;  %v4154_v39 = vld [vmem:[%s4756_s12 + $0xfa] sm:$0xff] }
 0x126   : > { %v1708_v27 = vadd.f32 %v1684_v36, %v1607_v19  ;;  %v2999_v54 = vsub.f32 0.0, %v6430_v15  ;;  %v2291_v6 = vmul.f32 %v6132_v35, %v4053_v53  ;;  %v2292_v52 = vmul.f32 %v6132_v35, %v4054_v10  ;;  %v4153_v36 = vld [vmem:[%s4756_s12 + $0xf2] sm:$0xff]  ;;  %v6462_v5 = vld [vmem:[%s4756_s12 + $0xfb] sm:$0xff] }
 0x127   : > { %v6443_v63 = vmul.f32 %v7623_v37, %v4078_v49  ;;  %v3034_v8 = vmul.f32 1.442695, %v2998_v28  ;;  %v1808_v31 = vadd.f32 %v1784_v23, %v1707_v18  ;;  %v6447_v33 = vmul.f32 %v7623_v37, %v4079_v21  ;;  %v4178_v2 = vld [vmem:[%s4756_s12 + $0xf3] sm:$0xff]  ;;  %v7627_v49 = vld [vmem:[#allocation3_spill] sm:$0xff] }
 0x128   : > { %v1809_v24 = vadd.f32 %v1785_v17, %v1708_v27  ;;  %v3036_v38 = vmul.f32 1.442695, %v2999_v54  ;;  %v6453_v14 = vmul.f32 %v7624_v22, %v4103_v44  ;;  %v6456_v13 = vmul.f32 %v7624_v22, %v4104_v11  ;;  %v7626_v19 = vld [vmem:[#allocation10_spill] sm:$0xff] }
 0x129   : > { %v475_v43 = vmul.f32 %v7625_v42, %v4103_v44  ;;  %4357 = vpow2.f32 %v3034_v8  ;;  %v1909_v23 = vadd.f32 %v1885_v16, %v1808_v31  ;;  %v476_v34 = vmul.f32 %v7625_v42, %v4104_v11  ;;  %v4203_v16 = vld [vmem:[%s4756_s12 + $0xf4] sm:$0xff]  ;;  %v7628_v8 = vld [vmem:[#allocation7_spill] sm:$0xff] }
 0x12a   : > { %v1910_v17 = vadd.f32 %v1886_v3, %v1809_v24  ;;  %4359 = vpow2.f32 %v3036_v38  ;;  %v576_v53 = vmul.f32 %v7626_v19, %v4128_v57  ;;  %v577_v10 = vmul.f32 %v7626_v19, %v4129_v59  ;;  %v6473_v3 = vld [vmem:[%s4756_s12 + $0xfc] sm:$0xff]  ;;  %v3736_v38 = vld [vmem:[%s4756_s12 + $0x108] sm:$0xff] }
 0x12b   : > { %v677_v21 = vmul.f32 %v7627_v49, %v4153_v36  ;;  %v2011_v28 = vadd.f32 %v1987_v9, %v1909_v23  ;;  %v6469_v27 = vmul.f32 %v6176_v0, %v4128_v57  ;;  %v678_v44 = vmul.f32 %v7627_v49, %v4154_v39  ;;  %v3737_v23 = vld [vmem:[%s4756_s12 + $0x110] sm:$0xff] }
 0x12c   : > { %v2012_v18 = vadd.f32 %v1988_v62, %v1910_v17  ;;  %v600_v54 = vadd.f32 %v576_v53, %v475_v43  ;;  %v601_v11 = vadd.f32 %v577_v10, %v476_v34  ;;  %v778_v31 = vmul.f32 %v7628_v8, %v4178_v2  ;;  %v3761_v53 = vld [vmem:[%s4756_s12 + $0x109] sm:$0xff] }
 0x12d   : > { %v779_v24 = vmul.f32 %v7628_v8, %v6462_v5  ;;  %v2113_v9 = vadd.f32 %v2089_v41, %v2011_v28  ;;  %v2596_v57 = vmul.f32 %v6176_v0, %v4129_v59  ;;  %v6482_v42 = vmul.f32 %v6023_v4, %v4153_v36  ;;  %v3762_v36 = vld [vmem:[%s4756_s12 + $0x111] sm:$0xff] }
 0x12e   : > { %v2114_v62 = vadd.f32 %v2090_v56, %v2012_v18  ;;  %v701_v17 = vadd.f32 %v677_v21, %v600_v54  ;;  %v702_v19 = vadd.f32 %v678_v44, %v601_v11  ;;  %v879_v43 = vmul.f32 %v5991_v25, %v4203_v16  ;;  %v408_v11 = vld [vmem:[%s5193_s30 + $0x30] sm:$0xff] }
 0x12f   : > { %v880_v34 = vmul.f32 %v5991_v25, %v6473_v3  ;;  %v4358_v10 = vpop.eup %4357  ;;  %v2214_v49 = vadd.f32 %v2190_v20, %v2113_v9  ;;  %v2697_v56 = vmul.f32 %v6023_v4, %v4154_v39  ;;  %v981_v59 = vmul.f32 %v6002_v40, %v3736_v38  ;;  %v409_v25 = vld [vmem:[%s5193_s30 + $0x38] sm:$0xff]  ;;  %v3786_v4 = vld [vmem:[%s4756_s12 + $0x10a] sm:$0xff]  ;;  %421 = vst.msk [vmem:[#allocation2 + $0x90] sm:$0xff] %vm388_vm1, %v408_v11 }
 0x130   : > { %v2215_v41 = vadd.f32 %v2191_v55, %v2114_v62  ;;  %v4360_v21 = vpop.eup %4359  ;;  %v3094_v28 = vadd.f32 1.0, %v4358_v10  ;;  %v802_v18 = vadd.f32 %v778_v31, %v701_v17  ;;  %v803_v44 = vadd.f32 %v779_v24, %v702_v19  ;;  %v3787_v39 = vld [vmem:[%s4756_s12 + $0x112] sm:$0xff]  ;;  %422 = vst.msk [vmem:[#allocation2 + $0x98] sm:$0xff] %vm388_vm1, %v409_v25  ;;  %v3861_v10 = vld [vmem:[%s4756_s12 + $0x120] sm:$0xff]  ;;  %v3887_v11 = vld [vmem:[%s4756_s12 + $0x129] sm:$0xff] }
 0x131   : > { %v982_v54 = vmul.f32 %v6002_v40, %v3737_v23  ;;  %v3095_v8 = vadd.f32 1.0, %v4360_v21  ;;  %v2315_v0 = vadd.f32 %v2291_v6, %v2214_v49  ;;  %v1083_v55 = vmul.f32 %v6012_v58, %v3761_v53  ;;  %v410_v40 = vld [vmem:[%s5193_s30 + $0x40] sm:$0xf]  ;;  %v3811_v62 = vld [vmem:[%s4756_s12 + $0x10b] sm:$0xff]  ;;  %v3812_v23 = vld [vmem:[%s4756_s12 + $0x113] sm:$0xff] }
 0x132   : > { %v2316_v20 = vadd.f32 %v2292_v52, %v2215_v41  ;;  %4361 = vrcp.f32 %v3094_v28  ;;  %v903_v38 = vadd.f32 %v879_v43, %v802_v18  ;;  %v904_v31 = vadd.f32 %v880_v34, %v803_v44  ;;  %423 = vst.msk [vmem:[#allocation2 + $0xa0] sm:$0xf] %vm391_vm2, %v410_v40  ;;  %v3836_v34 = vld [vmem:[%s4756_s12 + $0x10c] sm:$0xff]  ;;  %v3837_v53 = vld [vmem:[%s4756_s12 + $0x114] sm:$0xff]  ;;  %v3911_v25 = vld [vmem:[%s4756_s12 + $0x122] sm:$0xff] }
 0x133   : > { %v1084_v24 = vmul.f32 %v6012_v58, %v3762_v36  ;;  %4363 = vrcp.f32 %v3095_v8  ;;  %v2416_v6 = vadd.f32 %v6443_v63, %v2315_v0  ;;  %v2797_v9 = vmul.f32 %v6215_v50, %v4178_v2  ;;  %v3862_v36 = vld [vmem:[%s4756_s12 + $0x128] sm:$0xff] }
 0x134   : > { %v2417_v52 = vadd.f32 %v6447_v33, %v2316_v20  ;;  %v1005_v17 = vadd.f32 %v981_v59, %v903_v38  ;;  %v1006_v19 = vadd.f32 %v982_v54, %v904_v31  ;;  %v1184_v58 = vmul.f32 %v6029_v1, %v3786_v4  ;;  %v3936_v31 = vld [vmem:[%s4756_s12 + $0x123] sm:$0xff] }
 0x135   : > { %v1185_v43 = vmul.f32 %v6029_v1, %v3787_v39  ;;  %v2518_v0 = vadd.f32 %v6453_v14, %v2416_v6  ;;  %v2798_v33 = vmul.f32 %v6215_v50, %v6462_v5  ;;  %v2898_v2 = vmul.f32 %v6229_v48, %v4203_v16  ;;  %v3886_v16 = vld [vmem:[%s4756_s12 + $0x121] sm:$0xff]  ;;  %v3962_v6 = vld [vmem:[%s4756_s12 + $0x12c] sm:$0xff] }
 0x136   : > { %v2519_v63 = vadd.f32 %v6456_v13, %v2417_v52  ;;  %v1107_v49 = vadd.f32 %v1083_v55, %v1005_v17  ;;  %v1108_v41 = vadd.f32 %v1084_v24, %v1006_v19  ;;  %v1285_v59 = vmul.f32 %v6042_v46, %v3811_v62  ;;  %v3912_v55 = vld [vmem:[%s4756_s12 + $0x12a] sm:$0xff]  ;;  %v3986_v17 = vld [vmem:[%s4756_s12 + $0x138] sm:$0xff]  ;;  %v3987_v19 = vld [vmem:[%s4756_s12 + $0x140] sm:$0xff] }
 0x137   : > { %v1286_v1 = vmul.f32 %v6042_v46, %v3812_v23  ;;  %v2619_v14 = vadd.f32 %v6469_v27, %v2518_v0  ;;  %v2899_v13 = vmul.f32 %v6229_v48, %v6473_v3  ;;  %v1386_v5 = vmul.f32 %v6052_v7, %v3836_v34  ;;  %v3937_v24 = vld [vmem:[%s4756_s12 + $0x12b] sm:$0xff]  ;;  %v4011_v34 = vld [vmem:[%s4756_s12 + $0x139] sm:$0xff]  ;;  %v4012_v0 = vld [vmem:[%s4756_s12 + $0x141] sm:$0xff] }
 0x138   : > { %v2620_v21 = vadd.f32 %v2596_v57, %v2519_v63  ;;  %v4362_v28 = vpop.eup %4361  ;;  %v1208_v18 = vadd.f32 %v1184_v58, %v1107_v49  ;;  %v1209_v44 = vadd.f32 %v1185_v43, %v1108_v41  ;;  %v1387_v54 = vmul.f32 %v6052_v7, %v3837_v53 }
 0x139   : > { %v1488_v46 = vmul.f32 %v6062_v32, %v3861_v10  ;;  %v4364_v27 = vpop.eup %4363  ;;  %v3158_v57 = vmul.f32 %v4362_v28, %v6423_v26  ;;  %v2720_v3 = vadd.f32 %v6482_v42, %v2619_v14  ;;  %v1489_v20 = vmul.f32 %v6062_v32, %v3862_v36  ;;  %v3961_v32 = vld [vmem:[%s4756_s12 + $0x124] sm:$0xff] }
 0x13a   : > { %v2721_v8 = vadd.f32 %v2697_v56, %v2620_v21  ;;  %v3159_v4 = vmul.f32 %v4364_v27, %v6430_v15  ;;  %v1309_v39 = vadd.f32 %v1285_v59, %v1208_v18  ;;  %v1310_v7 = vadd.f32 %v1286_v1, %v1209_v44  ;;  %v4037_v10 = vld [vmem:[%s4756_s12 + $0x142] sm:$0xff] }
 0x13b   : > { %v1590_v38 = vmul.f32 %v6070_v30, %v3886_v16  ;;  %v2821_v40 = vadd.f32 %v2797_v9, %v2720_v3  ;;  %v1591_v42 = vmul.f32 %v6070_v30, %v3887_v11  ;;  %v1691_v56 = vmul.f32 %v6077_v47, %v3911_v25  ;;  %v4061_v1 = vld [vmem:[%s4756_s12 + $0x13b] sm:$0xff]  ;;  %v4062_v36 = vld [vmem:[%s4756_s12 + $0x143] sm:$0xff] }
 0x13c   : > { %v2822_v26 = vadd.f32 %v2798_v33, %v2721_v8  ;;  %v3188_v52 = vpack.c.bf16 %v3159_v4, %v3158_v57  ;;  %v1410_v15 = vadd.f32 %v1386_v5, %v1309_v39  ;;  %v1411_v62 = vadd.f32 %v1387_v54, %v1310_v7  ;;  %v4086_v5 = vld [vmem:[%s4756_s12 + $0x13c] sm:$0xff]  ;;  %v4087_v16 = vld [vmem:[%s4756_s12 + $0x144] sm:$0xff]  ;;  %v507_v57 = vld [vmem:[#allocation2 + $0x30] sm:$0xff] }
 0x13d   : > { %v1692_v23 = vmul.f32 %v6077_v47, %v3912_v55  ;;  %v2922_v58 = vadd.f32 %v2898_v2, %v2821_v40  ;;  %v1792_v43 = vmul.f32 %v6084_v45, %v3936_v31  ;;  %v1793_v30 = vmul.f32 %v6084_v45, %v3937_v24  ;;  %v4036_v2 = vld [vmem:[%s4756_s12 + $0x13a] sm:$0xff]  ;;  %v608_v8 = vld [vmem:[#allocation2 + $0x31] sm:$0xff] }
 0x13e   : > { %v2923_v9 = vadd.f32 %v2899_v13, %v2822_v26  ;;  %4217 = vmatmul.msk.bf16.gmra.mxu0 %vm388_vm1, %v3188_v52  ;;  %v1512_v63 = vadd.f32 %v1488_v46, %v1410_v15  ;;  %v1513_v33 = vadd.f32 %v1489_v20, %v1411_v62  ;;  %v1893_v47 = vmul.f32 %v6092_v51, %v3961_v32  ;;  %v4112_v46 = vld [vmem:[%s4756_s12 + $0x158] sm:$0xff]  ;;  %v6606_v32 = vld [vmem:[%s7535_s2 + $0x1] ss:$0 sm:$0xff] }
 0x13f   : > { %v1894_v53 = vmul.f32 %v6092_v51, %v3962_v6  ;;  %v6555_v49 = vadd.f32 %v6280_v29, %v2922_v58  ;;  %v1995_v41 = vmul.f32 %v6102_v12, %v3986_v17  ;;  %v1996_v59 = vmul.f32 %v6102_v12, %v3987_v19  ;;  %v4111_v12 = vld [vmem:[%s4756_s12 + $0x150] sm:$0xff]  ;;  %v508_v3 = vld [vmem:[#allocation2 + $0x38] sm:$0xff]  ;;  %7630 = vst [vmem:[#allocation9_spill] sm:$0xff] %v6606_v32 }
 0x140   : > { %v6558_v45 = vadd.f32 %v6280_v29, %v2923_v9  ;;  %v1614_v14 = vadd.f32 %v1590_v38, %v1512_v63  ;;  %v1615_v21 = vadd.f32 %v1591_v42, %v1513_v33  ;;  %v2097_v51 = vmul.f32 %v6112_v61, %v4011_v34  ;;  %v609_v39 = vld [vmem:[#allocation2 + $0x39] sm:$0xff]  ;;  %v4136_v62 = vld [vmem:[%s4756_s12 + $0x151] sm:$0xff]  ;;  %v6615_v9 = vld [vmem:[%s7535_s2 + $0x2] ss:$0 sm:$0xff] }
 0x141   : > { %v2098_v13 = vmul.f32 %v6112_v61, %v4012_v0  ;;  %v3006_v28 = vsub.f32 0.0, %v6555_v49  ;;  %v6571_v44 = vmul.f32 %v6120_v60, %v4036_v2  ;;  %v6574_v54 = vmul.f32 %v6120_v60, %v4037_v10  ;;  %v709_v24 = vld [vmem:[#allocation2 + $0x32] sm:$0xff]  ;;  %v710_v40 = vld [vmem:[#allocation2 + $0x3a] sm:$0xff]  ;;  %7631 = vst [vmem:[#allocation4_spill] sm:$0xff] %v6615_v9  ;;  %v6622_v34 = vld [vmem:[%s7535_s2 + $0x3] ss:$0 sm:$0xff] }
 0x142   : > { %v3007_v18 = vsub.f32 0.0, %v6558_v45  ;;  %v1715_v11 = vadd.f32 %v1691_v56, %v1614_v14  ;;  %v1716_v25 = vadd.f32 %v1692_v23, %v1615_v21  ;;  %v6579_v27 = vmul.f32 %v6132_v35, %v4061_v1  ;;  %v810_v26 = vld [vmem:[#allocation2 + $0x33] sm:$0xff]  ;;  %v811_v6 = vld [vmem:[#allocation2 + $0x3b] sm:$0xff]  ;;  %7632 = vst [vmem:[#allocation8_spill] sm:$0xff] %v6622_v34  ;;  %v1014_v1 = vld [vmem:[#allocation2 + $0x48] sm:$0xff] }
 0x143   : > { %v6582_v61 = vmul.f32 %v6132_v35, %v4062_v36  ;;  %v3050_v20 = vmul.f32 1.442695, %v3006_v28  ;;  %v6585_v4 = vmul.f32 %v7623_v37, %v4086_v5  ;;  %v6588_v60 = vmul.f32 %v7623_v37, %v4087_v16  ;;  %v6599_v37 = vld [vmem:[%s7535_s2] ss:$0 sm:$0xff]  ;;  %v911_v19 = vld [vmem:[#allocation2 + $0x34] sm:$0xff] }
 0x144   : > { %v3052_v55 = vmul.f32 1.442695, %v3007_v18  ;;  %v1816_v7 = vadd.f32 %v1792_v43, %v1715_v11  ;;  %v1817_v38 = vadd.f32 %v1793_v30, %v1716_v25  ;;  %v6591_v31 = vmul.f32 %v7624_v22, %v4111_v12  ;;  %7629 = vst [vmem:[#allocation6_spill] sm:$0xff] %v6599_v37  ;;  %v4137_v23 = vld [vmem:[%s4756_s12 + $0x159] sm:$0xff]  ;;  %v1015_v36 = vld [vmem:[#allocation2 + $0x50] sm:$0xff] }
 0x145   : > { %v6594_v35 = vmul.f32 %v7624_v22, %v4112_v46  ;;  %4365 = vpow2.f32 %v3050_v20  ;;  %v515_v42 = vmul.f32 %v6599_v37, %v507_v57  ;;  %v516_v56 = vmul.f32 %v6599_v37, %v508_v3  ;;  %v912_v63 = vld [vmem:[#allocation2 + $0x3c] sm:$0xff]  ;;  %v7633_v14 = vld [vmem:[#allocation5_spill] sm:$0xff]  ;;  %v6636_v28 = vld [vmem:[%s7535_s2 + $0x4] ss:$0 sm:$0xff] }
 0x146   : > { %v616_v22 = vmul.f32 %v6606_v32, %v608_v8  ;;  %4367 = vpow2.f32 %v3052_v55  ;;  %v1917_v52 = vadd.f32 %v1893_v47, %v1816_v7  ;;  %v1918_v15 = vadd.f32 %v1894_v53, %v1817_v38  ;;  %v4161_v53 = vld [vmem:[%s4756_s12 + $0x152] sm:$0xff]  ;;  %7634 = vst [vmem:[#allocation10_spill] sm:$0xff] %v6636_v28  ;;  %v1115_v11 = vld [vmem:[#allocation2 + $0x49] sm:$0xff] }
 0x147   : > { %v617_v17 = vmul.f32 %v6606_v32, %v609_v39  ;;  %v717_v43 = vmul.f32 %v6615_v9, %v709_v24  ;;  %v718_v30 = vmul.f32 %v6615_v9, %v710_v40  ;;  %v818_v0 = vmul.f32 %v6622_v34, %v810_v26  ;;  %v1116_v25 = vld [vmem:[#allocation2 + $0x51] sm:$0xff]  ;;  %v4162_v40 = vld [vmem:[%s4756_s12 + $0x15a] sm:$0xff] }
 0x148   : > { %v624_v58 = vadd.f32 %v616_v22, %v515_v42  ;;  %v2019_v33 = vadd.f32 %v1995_v41, %v1917_v52  ;;  %v2020_v47 = vadd.f32 %v1996_v59, %v1918_v15  ;;  %v819_v10 = vmul.f32 %v6622_v34, %v811_v6  ;;  %v6643_v3 = vld [vmem:[%s7535_s2 + $0x16] ss:$0 sm:$0xff]  ;;  %v1216_v42 = vld [vmem:[#allocation2 + $0x4a] sm:$0xff]  ;;  %v6661_v6 = vld [vmem:[%s7535_s2 + $0x6] ss:$0 sm:$0xff] }
 0x149   : > { %v625_v2 = vadd.f32 %v617_v17, %v516_v56  ;;  %v6628_v21 = vmul.f32 %v7633_v14, %v4136_v62  ;;  %v6631_v5 = vmul.f32 %v7633_v14, %v4137_v23  ;;  %v919_v41 = vmul.f32 %v6636_v28, %v911_v19  ;;  %v1217_v62 = vld [vmem:[#allocation2 + $0x52] sm:$0xff]  ;;  %v4187_v17 = vld [vmem:[%s4756_s12 + $0x15b] sm:$0xff] }
 0x14a   : > { %v725_v16 = vadd.f32 %v717_v43, %v624_v58  ;;  %v2121_v59 = vadd.f32 %v2097_v51, %v2019_v33  ;;  %v2122_v18 = vadd.f32 %v2098_v13, %v2020_v47  ;;  %v920_v46 = vmul.f32 %v6636_v28, %v912_v63  ;;  %v6651_v51 = vld [vmem:[%s7535_s2 + $0x5] ss:$0 sm:$0xff]  ;;  %v4186_v23 = vld [vmem:[%s4756_s12 + $0x153] sm:$0xff]  ;;  %v1317_v58 = vld [vmem:[#allocation2 + $0x4b] sm:$0xff] }
 0x14b   : > { %v726_v12 = vadd.f32 %v718_v30, %v625_v2  ;;  %v4366_v57 = vpop.eup %4365  ;;  %v6646_v8 = vmul.f32 %v6643_v3, %v4161_v53  ;;  %v1022_v13 = vmul.f32 %v6651_v51, %v1014_v1  ;;  %v1023_v55 = vmul.f32 %v6651_v51, %v1015_v36  ;;  %v1318_v33 = vld [vmem:[#allocation2 + $0x53] sm:$0xff]  ;;  %v4212_v53 = vld [vmem:[%s4756_s12 + $0x15c] sm:$0xff] }
 0x14c   : > { %v826_v20 = vadd.f32 %v818_v0, %v725_v16  ;;  %v4368_v39 = vpop.eup %4367  ;;  %v3102_v7 = vadd.f32 1.0, %v4366_v57  ;;  %v2222_v38 = vadd.f32 %v6571_v44, %v2121_v59  ;;  %v2223_v24 = vadd.f32 %v6574_v54, %v2122_v18  ;;  %v6673_v0 = vld [vmem:[%s7535_s2 + $0x7] ss:$0 sm:$0xff]  ;;  %v4211_v47 = vld [vmem:[%s4756_s12 + $0x154] sm:$0xff]  ;;  %v1418_v1 = vld [vmem:[#allocation2 + $0x4c] sm:$0xff] }
 0x14d   : > { %v827_v26 = vadd.f32 %v819_v10, %v726_v12  ;;  %v3103_v56 = vadd.f32 1.0, %v4368_v39  ;;  %v1123_v52 = vmul.f32 %v6661_v6, %v1115_v11  ;;  %v1124_v15 = vmul.f32 %v6661_v6, %v1116_v25  ;;  %v1419_v59 = vld [vmem:[#allocation2 + $0x54] sm:$0xff]  ;;  %v1521_v11 = vld [vmem:[#allocation2 + $0x60] sm:$0xff]  ;;  %v1522_v25 = vld [vmem:[#allocation2 + $0x68] sm:$0xff] }
 0x14e   : > { %v927_v22 = vadd.f32 %v919_v41, %v826_v20  ;;  %4369 = vrcp.f32 %v3102_v7  ;;  %v2323_v44 = vadd.f32 %v6579_v27, %v2222_v38  ;;  %v2324_v54 = vadd.f32 %v6582_v61, %v2223_v24  ;;  %v6686_v41 = vld [vmem:[%s7535_s2 + $0x8] ss:$0 sm:$0xff] }
 0x14f   : > { %v928_v19 = vadd.f32 %v920_v46, %v827_v26  ;;  %4371 = vrcp.f32 %v3103_v56  ;;  %v2705_v43 = vmul.f32 %v6643_v3, %v4162_v40  ;;  %v1224_v63 = vmul.f32 %v6673_v0, %v1216_v42  ;;  %v1622_v24 = vld [vmem:[#allocation2 + $0x61] sm:$0xff]  ;;  %v1623_v40 = vld [vmem:[#allocation2 + $0x69] sm:$0xff] }
 0x150   : > { %v1030_v30 = vadd.f32 %v1022_v13, %v927_v22  ;;  %v2424_v27 = vadd.f32 %v6585_v4, %v2323_v44  ;;  %v2425_v61 = vadd.f32 %v6588_v60, %v2324_v54  ;;  %v1225_v10 = vmul.f32 %v6673_v0, %v1217_v62  ;;  %v6697_v13 = vld [vmem:[%s7535_s2 + $0x9] ss:$0 sm:$0xff]  ;;  %v6707_v22 = vld [vmem:[%s7535_s2 + $0xa] ss:$0 sm:$0xff] }
 0x151   : > { %v1031_v2 = vadd.f32 %v1023_v55, %v928_v19  ;;  %v2805_v36 = vmul.f32 %v6215_v50, %v4186_v23  ;;  %v2806_v14 = vmul.f32 %v6215_v50, %v4187_v17  ;;  %v1325_v4 = vmul.f32 %v6686_v41, %v1317_v58  ;;  %v1723_v26 = vld [vmem:[#allocation2 + $0x62] sm:$0xff]  ;;  %v1724_v54 = vld [vmem:[#allocation2 + $0x6a] sm:$0xff] }
 0x152   : > { %v1131_v16 = vadd.f32 %v1123_v52, %v1030_v30  ;;  %v2526_v60 = vadd.f32 %v6591_v31, %v2424_v27  ;;  %v2527_v18 = vadd.f32 %v6594_v35, %v2425_v61  ;;  %v1326_v46 = vmul.f32 %v6686_v41, %v1318_v33  ;;  %v1824_v23 = vld [vmem:[#allocation2 + $0x63] sm:$0xff]  ;;  %v1825_v17 = vld [vmem:[#allocation2 + $0x6b] sm:$0xff] }
 0x153   : > { %v1132_v12 = vadd.f32 %v1124_v15, %v1031_v2  ;;  %v2906_v50 = vmul.f32 %v6229_v48, %v4211_v47  ;;  %v2907_v57 = vmul.f32 %v6229_v48, %v4212_v53  ;;  %v1426_v55 = vmul.f32 %v6697_v13, %v1418_v1  ;;  %v6716_v19 = vld [vmem:[%s7535_s2 + $0xb] ss:$0 sm:$0xff]  ;;  %v1926_v47 = vld [vmem:[#allocation2 + $0x6c] sm:$0xff]  ;;  %v2028_v53 = vld [vmem:[#allocation2 + $0x78] sm:$0xff] }
 0x154   : > { %v1232_v20 = vadd.f32 %v1224_v63, %v1131_v16  ;;  %v4370_v31 = vpop.eup %4369  ;;  %v2627_v35 = vadd.f32 %v6628_v21, %v2526_v60  ;;  %v2628_v39 = vadd.f32 %v6631_v5, %v2527_v18  ;;  %v1427_v38 = vmul.f32 %v6697_v13, %v1419_v59  ;;  %v2029_v2 = vld [vmem:[#allocation2 + $0x80] sm:$0xff]  ;;  %v6730_v16 = vld [vmem:[%s7535_s2 + $0xd] ss:$0 sm:$0xff] }
 0x155   : > { %v1233_v7 = vadd.f32 %v1225_v10, %v1132_v12  ;;  %v4372_v48 = vpop.eup %4371  ;;  %v3166_v42 = vmul.f32 %v4370_v31, %v6555_v49  ;;  %v1529_v52 = vmul.f32 %v6707_v22, %v1521_v11  ;;  %v1530_v21 = vmul.f32 %v6707_v22, %v1522_v25  ;;  %v2129_v60 = vld [vmem:[#allocation2 + $0x79] sm:$0xff]  ;;  %v6738_v12 = vld [vmem:[%s7535_s2 + $0xe] ss:$0 sm:$0xff]  ;;  %v2130_v11 = vld [vmem:[#allocation2 + $0x81] sm:$0xff] }
 0x156   : > { %v1333_v56 = vadd.f32 %v1325_v4, %v1232_v20  ;;  %v3167_v5 = vmul.f32 %v4372_v48, %v6558_v45  ;;  %v2728_v15 = vadd.f32 %v6646_v8, %v2627_v35  ;;  %v2729_v62 = vadd.f32 %v2705_v43, %v2628_v39  ;;  %v6723_v45 = vld [vmem:[%s7535_s2 + $0xc] ss:$0 sm:$0xff]  ;;  %v1925_v43 = vld [vmem:[#allocation2 + $0x64] sm:$0xff]  ;;  %v2230_v25 = vld [vmem:[#allocation2 + $0x7a] sm:$0xff] }
 0x157   : > { %v1334_v44 = vadd.f32 %v1326_v46, %v1233_v7  ;;  %v1630_v58 = vmul.f32 %v6716_v19, %v1622_v24  ;;  %v1631_v30 = vmul.f32 %v6716_v19, %v1623_v40  ;;  %v1731_v8 = vmul.f32 %v6723_v45, %v1723_v26  ;;  %v2231_v20 = vld [vmem:[#allocation2 + $0x82] sm:$0xff]  ;;  %v6745_v35 = vld [vmem:[%s7535_s2 + $0xf] ss:$0 sm:$0xff]  ;;  %v6758_v40 = vld [vmem:[%s7535_s2 + $0x10] ss:$0 sm:$0xff] }
 0x158   : > { %v1434_v49 = vadd.f32 %v1426_v55, %v1333_v56  ;;  %v3192_v63 = vpack.c.bf16 %v3167_v5, %v3166_v42  ;;  %v2829_v33 = vadd.f32 %v2805_v36, %v2728_v15  ;;  %v2830_v27 = vadd.f32 %v2806_v14, %v2729_v62  ;;  %v2331_v39 = vld [vmem:[#allocation2 + $0x7b] sm:$0xff]  ;;  %v2332_v48 = vld [vmem:[#allocation2 + $0x83] sm:$0xff]  ;;  %v2534_v62 = vld [vmem:[#allocation2 + $0x90] sm:$0xff] }
 0x159   : > { %v1435_v61 = vadd.f32 %v1427_v38, %v1334_v44  ;;  %v1732_v1 = vmul.f32 %v6723_v45, %v1724_v54  ;;  %v1832_v4 = vmul.f32 %v6730_v16, %v1824_v23  ;;  %v1833_v59 = vmul.f32 %v6730_v16, %v1825_v17  ;;  %v2432_v42 = vld [vmem:[#allocation2 + $0x7c] sm:$0xff]  ;;  %v2433_v56 = vld [vmem:[#allocation2 + $0x84] sm:$0xff]  ;;  %v6776_v17 = vld [vmem:[%s7535_s2 + $0x12] ss:$0 sm:$0xff] }
 0x15a   : > { %v1537_v10 = vadd.f32 %v1529_v52, %v1434_v49  ;;  %4221 = vmatmul.msk.bf16.gmra.mxu1 %vm388_vm1, %v3192_v63  ;;  %v2930_v36 = vadd.f32 %v2906_v50, %v2829_v33  ;;  %v2931_v14 = vadd.f32 %v2907_v57, %v2830_v27  ;;  %v1933_v46 = vmul.f32 %v6738_v12, %v1925_v43  ;;  %v6789_v33 = vld [vmem:[%s7535_s2 + $0x13] ss:$0 sm:$0xff] }
 0x15b   : > { %v1538_v18 = vadd.f32 %v1530_v21, %v1435_v61  ;;  %v1934_v31 = vmul.f32 %v6738_v12, %v1926_v47  ;;  %v2036_v50 = vmul.f32 %v6745_v35, %v2028_v53  ;;  %v2037_v57 = vmul.f32 %v6745_v35, %v2029_v2  ;;  %v535_v47 = vld [vmem:[%s4756_s12 + $0x49] sm:$0xff]  ;;  %v536_v53 = vld [vmem:[%s4756_s12 + $0x51] sm:$0xff] }
 0x15c   : > { %v1638_v55 = vadd.f32 %v1630_v58, %v1537_v10  ;;  %v6750_v7 = vadd.f32 %v6280_v29, %v2930_v36  ;;  %v6753_v38 = vadd.f32 %v6280_v29, %v2931_v14  ;;  %v2137_v26 = vmul.f32 %v6758_v40, %v2129_v60  ;;  %v6765_v29 = vld [vmem:[%s7535_s2 + $0x11] ss:$0 sm:$0xff]  ;;  %v2535_v58 = vld [vmem:[#allocation2 + $0x98] sm:$0xff] }
 0x15d   : > { %v1639_v24 = vadd.f32 %v1631_v30, %v1538_v18  ;;  %v2138_v21 = vmul.f32 %v6758_v40, %v2130_v11  ;;  %v2238_v5 = vmul.f32 %v6765_v29, %v2230_v25  ;;  %v6769_v15 = vmul.f32 %v6765_v29, %v2231_v20  ;;  %v434_v30 = vld [vmem:[%s4756_s12 + $0x48] sm:$0xff]  ;;  %v637_v14 = vld [vmem:[%s4756_s12 + $0x52] sm:$0xff] }
 0x15e   : > { %v1739_v52 = vadd.f32 %v1731_v8, %v1638_v55  ;;  %v3014_v44 = vsub.f32 0.0, %v6750_v7  ;;  %v3015_v54 = vsub.f32 0.0, %v6753_v38  ;;  %v6779_v49 = vmul.f32 %v6776_v17, %v2331_v39  ;;  %v435_v8 = vld [vmem:[%s4756_s12 + $0x50] sm:$0xff] }
 0x15f   : > { %v1740_v23 = vadd.f32 %v1732_v1, %v1639_v24  ;;  %v6784_v63 = vmul.f32 %v6776_v17, %v2332_v48  ;;  %v6792_v27 = vmul.f32 %v6789_v33, %v2432_v42  ;;  %v6795_v61 = vmul.f32 %v6789_v33, %v2433_v56  ;;  %v636_v36 = vld [vmem:[%s4756_s12 + $0x4a] sm:$0xff]  ;;  %v738_v42 = vld [vmem:[%s4756_s12 + $0x53] sm:$0xff] }
 0x160   : > { %v1840_v43 = vadd.f32 %v1832_v4, %v1739_v52  ;;  %v3066_v2 = vmul.f32 1.442695, %v3014_v44  ;;  %v3068_v10 = vmul.f32 1.442695, %v3015_v54  ;;  %v6802_v4 = vld [vmem:[%s7535_s2 + $0x14] ss:$0 sm:$0xff]  ;;  %v461_v25 = vmul.f32 %v6599_v37, %v434_v30 }
 0x161   : > { %v1841_v1 = vadd.f32 %v1833_v59, %v1740_v23  ;;  %7635 = vst [vmem:[#allocation3_spill] sm:$0xff] %v6802_v4  ;;  %v6805_v60 = vmul.f32 %v6802_v4, %v2534_v62  ;;  %v6810_v11 = vmul.f32 %v6802_v4, %v2535_v58  ;;  %v462_v59 = vmul.f32 %v6599_v37, %v435_v8  ;;  %v737_v20 = vld [vmem:[%s4756_s12 + $0x4b] sm:$0xff]  ;;  %v839_v44 = vld [vmem:[%s4756_s12 + $0x54] sm:$0xff] }
 0x162   : > { %v1941_v18 = vadd.f32 %v1933_v46, %v1840_v43  ;;  %4373 = vpow2.f32 %v3066_v2  ;;  %v2635_v39 = vld [vmem:[#allocation2 + $0x91] sm:$0xff]  ;;  %v562_v24 = vmul.f32 %v6606_v32, %v535_v47  ;;  %v563_v48 = vmul.f32 %v6606_v32, %v536_v53  ;;  %v2636_v23 = vld [vmem:[#allocation2 + $0x99] sm:$0xff] }
 0x163   : > { %v1942_v55 = vadd.f32 %v1934_v31, %v1841_v1  ;;  %v838_v56 = vld [vmem:[%s4756_s12 + $0x4c] sm:$0xff]  ;;  %4375 = vpow2.f32 %v3068_v10  ;;  %v663_v52 = vmul.f32 %v6615_v9, %v636_v36  ;;  %v664_v62 = vmul.f32 %v6615_v9, %v637_v14  ;;  %v3722_v43 = vld [vmem:[%s4756_s12 + $0x60] sm:$0xff] }
 0x164   : > { %v2044_v46 = vadd.f32 %v2036_v50, %v1941_v18  ;;  %v2736_v31 = vld [vmem:[#allocation2 + $0x92] sm:$0xff]  ;;  %v586_v58 = vadd.f32 %v562_v24, %v461_v25  ;;  %v587_v30 = vadd.f32 %v563_v48, %v462_v59  ;;  %v764_v8 = vmul.f32 %v6622_v34, %v737_v20  ;;  %v3723_v10 = vld [vmem:[%s4756_s12 + $0x68] sm:$0xff] }
 0x165   : > { %v2045_v54 = vadd.f32 %v2037_v57, %v1942_v55  ;;  %v6827_v50 = vld [vmem:[%s7535_s2 + $0x15] ss:$0 sm:$0xff]  ;;  %v765_v2 = vmul.f32 %v6622_v34, %v738_v42  ;;  %v865_v57 = vmul.f32 %v6636_v28, %v838_v56  ;;  %v866_v18 = vmul.f32 %v6636_v28, %v839_v44  ;;  %v3748_v25 = vld [vmem:[%s4756_s12 + $0x69] sm:$0xff] }
 0x166   : > { %v2145_v47 = vadd.f32 %v2137_v26, %v2044_v46  ;;  %7636 = vst [vmem:[#allocation7_spill] sm:$0xff] %v6827_v50  ;;  %v2643_v53 = vmul.f32 %v6827_v50, %v2635_v39  ;;  %v687_v36 = vadd.f32 %v663_v52, %v586_v58  ;;  %v688_v14 = vadd.f32 %v664_v62, %v587_v30  ;;  %v3747_v26 = vld [vmem:[%s4756_s12 + $0x61] sm:$0xff]  ;;  %v3773_v52 = vld [vmem:[%s4756_s12 + $0x6a] sm:$0xff]  ;;  %v2837_v30 = vld [vmem:[#allocation2 + $0x93] sm:$0xff] }
 0x167   : > { %v2146_v1 = vadd.f32 %v2138_v21, %v2045_v54  ;;  %v2644_v20 = vmul.f32 %v6827_v50, %v2636_v23  ;;  %v2744_v55 = vmul.f32 %v6643_v3, %v2736_v31  ;;  %v967_v39 = vmul.f32 %v6651_v51, %v3722_v43  ;;  %v3772_v46 = vld [vmem:[%s4756_s12 + $0x62] sm:$0xff] }
 0x168   : > { %v2246_v59 = vadd.f32 %v2238_v5, %v2145_v47  ;;  %v4374_v24 = vpop.eup %4373  ;;  %v788_v42 = vadd.f32 %v764_v8, %v687_v36  ;;  %v789_v21 = vadd.f32 %v765_v2, %v688_v14  ;;  %v968_v56 = vmul.f32 %v6651_v51, %v3723_v10  ;;  %v3797_v47 = vld [vmem:[%s4756_s12 + $0x63] sm:$0xff]  ;;  %v2838_v14 = vld [vmem:[#allocation2 + $0x9b] sm:$0xff] }
 0x169   : > { %v2247_v48 = vadd.f32 %v6769_v15, %v2146_v1  ;;  %v4376_v62 = vpop.eup %4375  ;;  %v3110_v44 = vadd.f32 1.0, %v4374_v24  ;;  %v1069_v54 = vmul.f32 %v6661_v6, %v3747_v26  ;;  %v1070_v23 = vmul.f32 %v6661_v6, %v3748_v25  ;;  %v2737_v15 = vld [vmem:[#allocation2 + $0x9a] sm:$0xff]  ;;  %v3798_v1 = vld [vmem:[%s4756_s12 + $0x6b] sm:$0xff] }
 0x16a   : > { %v2347_v5 = vadd.f32 %v6779_v49, %v2246_v59  ;;  %v3111_v31 = vadd.f32 1.0, %v4376_v62  ;;  %v889_v8 = vadd.f32 %v865_v57, %v788_v42  ;;  %v890_v43 = vadd.f32 %v866_v18, %v789_v21  ;;  %v3822_v18 = vld [vmem:[%s4756_s12 + $0x64] sm:$0xff]  ;;  %v6859_v59 = vld [vmem:[%s7535_s2 + $0x17] ss:$0 sm:$0xff] }
 0x16b   : > { %v2348_v58 = vadd.f32 %v6784_v63, %v2247_v48  ;;  %4377 = vrcp.f32 %v3110_v44  ;;  %v1170_v10 = vmul.f32 %v6673_v0, %v3772_v46  ;;  %v1171_v49 = vmul.f32 %v6673_v0, %v3773_v52  ;;  %v2938_v63 = vld [vmem:[#allocation2 + $0x94] sm:$0xff]  ;;  %v3823_v48 = vld [vmem:[%s4756_s12 + $0x6c] sm:$0xff]  ;;  %v3848_v52 = vld [vmem:[%s4756_s12 + $0x80] sm:$0xff] }
 0x16c   : > { %v2448_v2 = vadd.f32 %v6792_v27, %v2347_v5  ;;  %4379 = vrcp.f32 %v3111_v31  ;;  %v991_v26 = vadd.f32 %v967_v39, %v889_v8  ;;  %v992_v57 = vadd.f32 %v968_v56, %v890_v43  ;;  %v2939_v39 = vld [vmem:[#allocation2 + $0x9c] sm:$0xff]  ;;  %v6872_v5 = vld [vmem:[%s7535_s2 + $0x18] ss:$0 sm:$0xff] }
 0x16d   : > { %v2449_v36 = vadd.f32 %v6795_v61, %v2348_v58  ;;  %v2745_v27 = vmul.f32 %v6643_v3, %v2737_v15  ;;  %v2845_v24 = vmul.f32 %v6859_v59, %v2837_v30  ;;  %v1271_v61 = vmul.f32 %v6686_v41, %v3797_v47  ;;  %v3847_v46 = vld [vmem:[%s4756_s12 + $0x78] sm:$0xff] }
 0x16e   : > { %v2550_v25 = vadd.f32 %v6805_v60, %v2448_v2  ;;  %v1093_v21 = vadd.f32 %v1069_v54, %v991_v26  ;;  %v1094_v56 = vadd.f32 %v1070_v23, %v992_v57  ;;  %v1272_v60 = vmul.f32 %v6686_v41, %v3798_v1  ;;  %v3872_v30 = vld [vmem:[%s4756_s12 + $0x79] sm:$0xff]  ;;  %v3873_v1 = vld [vmem:[%s4756_s12 + $0x81] sm:$0xff] }
 0x16f   : > { %v2551_v42 = vadd.f32 %v6810_v11, %v2449_v36  ;;  %v2846_v44 = vmul.f32 %v6859_v59, %v2838_v14  ;;  %v2946_v31 = vmul.f32 %v6872_v5, %v2938_v63  ;;  %v1372_v11 = vmul.f32 %v6697_v13, %v3822_v18  ;;  %v3897_v63 = vld [vmem:[%s4756_s12 + $0x7a] sm:$0xff]  ;;  %v3898_v26 = vld [vmem:[%s4756_s12 + $0x82] sm:$0xff] }
 0x170   : > { %v2651_v62 = vadd.f32 %v2643_v53, %v2550_v25  ;;  %v1194_v54 = vadd.f32 %v1170_v10, %v1093_v21  ;;  %v1195_v23 = vadd.f32 %v1171_v49, %v1094_v56  ;;  %v1373_v15 = vmul.f32 %v6697_v13, %v3823_v48  ;;  %v3922_v25 = vld [vmem:[%s4756_s12 + $0x7b] sm:$0xff]  ;;  %v3948_v21 = vld [vmem:[%s4756_s12 + $0x84] sm:$0xff] }
 0x171   : > { %v2652_v58 = vadd.f32 %v2644_v20, %v2551_v42  ;;  %v4378_v53 = vpop.eup %4377  ;;  %v2947_v43 = vmul.f32 %v6872_v5, %v2939_v39  ;;  %v1474_v47 = vmul.f32 %v6707_v22, %v3847_v46  ;;  %v1475_v2 = vmul.f32 %v6707_v22, %v3848_v52 }
 0x172   : > { %v2752_v8 = vadd.f32 %v2744_v55, %v2651_v62  ;;  %v4380_v36 = vpop.eup %4379  ;;  %v3174_v20 = vmul.f32 %v4378_v53, %v6750_v7  ;;  %v1295_v49 = vadd.f32 %v1271_v61, %v1194_v54  ;;  %v1296_v14 = vadd.f32 %v1272_v60, %v1195_v23  ;;  %v3947_v61 = vld [vmem:[%s4756_s12 + $0x7c] sm:$0xff]  ;;  %v3997_v54 = vld [vmem:[%s4756_s12 + $0x91] sm:$0xff] }
 0x173   : > { %v2753_v10 = vadd.f32 %v2745_v27, %v2652_v58  ;;  %v3175_v55 = vmul.f32 %v4380_v36, %v6753_v38  ;;  %v1576_v18 = vmul.f32 %v6716_v19, %v3872_v30  ;;  %v1577_v7 = vmul.f32 %v6716_v19, %v3873_v1  ;;  %v3923_v27 = vld [vmem:[%s4756_s12 + $0x83] sm:$0xff]  ;;  %v3973_v58 = vld [vmem:[%s4756_s12 + $0x98] sm:$0xff] }
 0x174   : > { %v2853_v57 = vadd.f32 %v2845_v24, %v2752_v8  ;;  %v1396_v42 = vadd.f32 %v1372_v11, %v1295_v49  ;;  %v1397_v39 = vadd.f32 %v1373_v15, %v1296_v14  ;;  %v1677_v46 = vmul.f32 %v6723_v45, %v3897_v63  ;;  %v3972_v24 = vld [vmem:[%s4756_s12 + $0x90] sm:$0xff]  ;;  %v3998_v23 = vld [vmem:[%s4756_s12 + $0x99] sm:$0xff] }
 0x175   : > { %v2854_v48 = vadd.f32 %v2846_v44, %v2753_v10  ;;  %v3196_v56 = vpack.c.bf16 %v3175_v55, %v3174_v20  ;;  %v1678_v38 = vmul.f32 %v6723_v45, %v3898_v26  ;;  %v1778_v11 = vmul.f32 %v6730_v16, %v3922_v25  ;;  %v4023_v20 = vld [vmem:[%s4756_s12 + $0x9a] sm:$0xff] }
 0x176   : > { %v2954_v60 = vadd.f32 %v2946_v31, %v2853_v57  ;;  %v1498_v62 = vadd.f32 %v1474_v47, %v1396_v42  ;;  %v1499_v44 = vadd.f32 %v1475_v2, %v1397_v39  ;;  %v6903_v31 = vld [vmem:[%s7536_s3] ss:$0 sm:$0xff]  ;;  %v1779_v30 = vmul.f32 %v6730_v16, %v3923_v27  ;;  %v4047_v10 = vld [vmem:[%s4756_s12 + $0x93] sm:$0xff] }
 0x177   : > { %v2955_v52 = vadd.f32 %v2947_v43, %v2854_v48  ;;  %4225 = vmatmul.msk.bf16.gmra.mxu2 %vm388_vm1, %v3196_v56  ;;  %v1879_v53 = vmul.f32 %v6738_v12, %v3947_v61  ;;  %v1880_v8 = vmul.f32 %v6738_v12, %v3948_v21  ;;  %v4022_v43 = vld [vmem:[%s4756_s12 + $0x92] sm:$0xff]  ;;  %v1981_v36 = vmul.f32 %v6745_v35, %v3972_v24  ;;  %v4048_v49 = vld [vmem:[%s4756_s12 + $0x9b] sm:$0xff]  ;;  %v4122_v24 = vld [vmem:[%s4756_s12 + $0xa9] sm:$0xff] }
 0x178   : > { %v6906_v15 = vadd.f32 %v6903_v31, %v2954_v60  ;;  %v1600_v2 = vadd.f32 %v1576_v18, %v1498_v62  ;;  %v1601_v1 = vadd.f32 %v1577_v7, %v1499_v44  ;;  %v1982_v63 = vmul.f32 %v6745_v35, %v3973_v58  ;;  %v4072_v57 = vld [vmem:[%s4756_s12 + $0x94] sm:$0xff]  ;;  %v4073_v39 = vld [vmem:[%s4756_s12 + $0x9c] sm:$0xff]  ;;  %v4097_v7 = vld [vmem:[%s4756_s12 + $0xa8] sm:$0xff] }
 0x179   : > { %v6913_v47 = vadd.f32 %v6903_v31, %v2955_v52  ;;  %v2083_v26 = vmul.f32 %v6758_v40, %v3997_v54  ;;  %v2084_v55 = vmul.f32 %v6758_v40, %v3998_v23  ;;  %v2184_v42 = vmul.f32 %v6765_v29, %v4022_v43  ;;  %v4098_v60 = vld [vmem:[%s4756_s12 + $0xb0] sm:$0xff] }
 0x17a   : > { %v3022_v14 = vsub.f32 0.0, %v6906_v15  ;;  %v1701_v25 = vadd.f32 %v1677_v46, %v1600_v2  ;;  %v1702_v48 = vadd.f32 %v1678_v38, %v1601_v1  ;;  %v2185_v61 = vmul.f32 %v6765_v29, %v4023_v20  ;;  %v4123_v44 = vld [vmem:[%s4756_s12 + $0xb1] sm:$0xff] }
 0x17b   : > { %v3023_v18 = vsub.f32 0.0, %v6913_v47  ;;  %v2285_v21 = vmul.f32 %v6776_v17, %v4047_v10  ;;  %v2286_v56 = vmul.f32 %v6776_v17, %v4048_v49  ;;  %v2386_v38 = vmul.f32 %v6789_v33, %v4072_v57  ;;  %v4147_v58 = vld [vmem:[%s4756_s12 + $0xaa] sm:$0xff]  ;;  %v4148_v54 = vld [vmem:[%s4756_s12 + $0xb2] sm:$0xff] }
 0x17c   : > { %v3082_v27 = vmul.f32 1.442695, %v3022_v14  ;;  %v1802_v46 = vadd.f32 %v1778_v11, %v1701_v25  ;;  %v1803_v62 = vadd.f32 %v1779_v30, %v1702_v48  ;;  %v2387_v23 = vmul.f32 %v6789_v33, %v4073_v39  ;;  %v4172_v11 = vld [vmem:[%s4756_s12 + $0xab] sm:$0xff]  ;;  %v4173_v30 = vld [vmem:[%s4756_s12 + $0xb3] sm:$0xff] }
 0x17d   : > { %v3084_v52 = vmul.f32 1.442695, %v3023_v18  ;;  %v6939_v43 = vmul.f32 %v6802_v4, %v4097_v7  ;;  %v469_v2 = vmul.f32 %v6599_v37, %v4097_v7  ;;  %v470_v10 = vmul.f32 %v6599_v37, %v4098_v60  ;;  %v4198_v7 = vld [vmem:[%s4756_s12 + $0xb4] sm:$0xff] }
 0x17e   : > { %4381 = vpow2.f32 %v3082_v27  ;;  %v1903_v1 = vadd.f32 %v1879_v53, %v1802_v46  ;;  %v1904_v20 = vadd.f32 %v1880_v8, %v1803_v62  ;;  %v570_v49 = vmul.f32 %v6606_v32, %v4122_v24  ;;  %v4197_v8 = vld [vmem:[%s4756_s12 + $0xac] sm:$0xff] }
 0x17f   : > { %4383 = vpow2.f32 %v3084_v52  ;;  %v571_v14 = vmul.f32 %v6606_v32, %v4123_v44  ;;  %v671_v57 = vmul.f32 %v6615_v9, %v4147_v58  ;;  %v672_v18 = vmul.f32 %v6615_v9, %v4148_v54  ;;  %v3730_v32 = vld [vmem:[%s4756_s12 + $0xc0] sm:$0xff] }
 0x180   : > { %v2005_v25 = vadd.f32 %v1981_v36, %v1903_v1  ;;  %v2006_v48 = vadd.f32 %v1982_v63, %v1904_v20  ;;  %v2489_v39 = vmul.f32 %v6802_v4, %v4098_v60  ;;  %v2589_v53 = vmul.f32 %v6827_v50, %v4122_v24  ;;  %v3731_v60 = vld [vmem:[%s4756_s12 + $0xc8] sm:$0xff] }
 0x181   : > { %v594_v27 = vadd.f32 %v570_v49, %v469_v2  ;;  %v595_v52 = vadd.f32 %v571_v14, %v470_v10  ;;  %v772_v46 = vmul.f32 %v6622_v34, %v4172_v11  ;;  %v773_v62 = vmul.f32 %v6622_v34, %v4173_v30  ;;  %v3755_v49 = vld [vmem:[%s4756_s12 + $0xc1] sm:$0xff] }
 0x182   : > { %v2107_v37 = vadd.f32 %v2083_v26, %v2005_v25  ;;  %v2108_v9 = vadd.f32 %v2084_v55, %v2006_v48  ;;  %v2590_v36 = vmul.f32 %v6827_v50, %v4123_v44  ;;  %v6958_v63 = vmul.f32 %v6643_v3, %v4147_v58  ;;  %v3756_v48 = vld [vmem:[%s4756_s12 + $0xc9] sm:$0xff] }
 0x183   : > { %v695_v1 = vadd.f32 %v671_v57, %v594_v27  ;;  %v696_v20 = vadd.f32 %v672_v18, %v595_v52  ;;  %v873_v2 = vmul.f32 %v6636_v28, %v4197_v8  ;;  %v874_v10 = vmul.f32 %v6636_v28, %v4198_v7  ;;  %v3780_v28 = vld [vmem:[%s4756_s12 + $0xc2] sm:$0xff] }
 0x184   : > { %v4382_v24 = vpop.eup %4381  ;;  %v2208_v25 = vadd.f32 %v2184_v42, %v2107_v37  ;;  %v2209_v55 = vadd.f32 %v2185_v61, %v2108_v9  ;;  %v975_v44 = vmul.f32 %v6651_v51, %v3730_v32  ;;  %v976_v57 = vmul.f32 %v6651_v51, %v3731_v60  ;;  %v3805_v60 = vld [vmem:[%s4756_s12 + $0xc3] sm:$0xff] }
 0x185   : > { %v4384_v14 = vpop.eup %4383  ;;  %v3118_v26 = vadd.f32 1.0, %v4382_v24  ;;  %v796_v50 = vadd.f32 %v772_v46, %v695_v1  ;;  %v797_v34 = vadd.f32 %v773_v62, %v696_v20  ;;  %v1077_v52 = vmul.f32 %v6661_v6, %v3755_v49  ;;  %v3781_v24 = vld [vmem:[%s4756_s12 + $0xca] sm:$0xff] }
 0x186   : > { %v3119_v58 = vadd.f32 1.0, %v4384_v14  ;;  %v2309_v18 = vadd.f32 %v2285_v21, %v2208_v25  ;;  %v2310_v27 = vadd.f32 %v2286_v56, %v2209_v55  ;;  %v1078_v32 = vmul.f32 %v6661_v6, %v3756_v48  ;;  %v3806_v21 = vld [vmem:[%s4756_s12 + $0xcb] sm:$0xff]  ;;  %v3855_v14 = vld [vmem:[%s4756_s12 + $0xd8] sm:$0xff] }
 0x187   : > { %4385 = vrcp.f32 %v3118_v26  ;;  %v897_v37 = vadd.f32 %v873_v2, %v796_v50  ;;  %v898_v9 = vadd.f32 %v874_v10, %v797_v34  ;;  %v2691_v46 = vmul.f32 %v6643_v3, %v4148_v54  ;;  %v3830_v50 = vld [vmem:[%s4756_s12 + $0xc4] sm:$0xff]  ;;  %v3831_v54 = vld [vmem:[%s4756_s12 + $0xcc] sm:$0xff] }
 0x188   : > { %4387 = vrcp.f32 %v3119_v58  ;;  %v2410_v42 = vadd.f32 %v2386_v38, %v2309_v18  ;;  %v2411_v61 = vadd.f32 %v2387_v23, %v2310_v27  ;;  %v2791_v62 = vmul.f32 %v6859_v59, %v4172_v11  ;;  %v3881_v27 = vld [vmem:[%s4756_s12 + $0xe1] sm:$0xff] }
 0x189   : > { %v999_v56 = vadd.f32 %v975_v44, %v897_v37  ;;  %v1000_v1 = vadd.f32 %v976_v57, %v898_v9  ;;  %v1178_v20 = vmul.f32 %v6673_v0, %v3780_v28  ;;  %v1179_v49 = vmul.f32 %v6673_v0, %v3781_v24  ;;  %v3905_v24 = vld [vmem:[%s4756_s12 + $0xda] sm:$0xff]  ;;  %v3906_v37 = vld [vmem:[%s4756_s12 + $0xe2] sm:$0xff] }
 0x18a   : > { %v2512_v34 = vadd.f32 %v6939_v43, %v2410_v42  ;;  %v2513_v38 = vadd.f32 %v2489_v39, %v2411_v61  ;;  %v2792_v23 = vmul.f32 %v6859_v59, %v4173_v30  ;;  %v2892_v3 = vmul.f32 %v6872_v5, %v4197_v8  ;;  %v3856_v39 = vld [vmem:[%s4756_s12 + $0xe0] sm:$0xff] }
 0x18b   : > { %v1101_v11 = vadd.f32 %v1077_v52, %v999_v56  ;;  %v1102_v2 = vadd.f32 %v1078_v32, %v1000_v1  ;;  %v1279_v10 = vmul.f32 %v6686_v41, %v3805_v60  ;;  %v1280_v28 = vmul.f32 %v6686_v41, %v3806_v21  ;;  %v3880_v8 = vld [vmem:[%s4756_s12 + $0xd9] sm:$0xff]  ;;  %v3931_v60 = vld [vmem:[%s4756_s12 + $0xe3] sm:$0xff] }
 0x18c   : > { %v2613_v25 = vadd.f32 %v2589_v53, %v2512_v34  ;;  %v2614_v55 = vadd.f32 %v2590_v36, %v2513_v38  ;;  %v2893_v43 = vmul.f32 %v6872_v5, %v4198_v7  ;;  %v1380_v30 = vmul.f32 %v6697_v13, %v3830_v50  ;;  %v3930_v61 = vld [vmem:[%s4756_s12 + $0xdb] sm:$0xff]  ;;  %v3956_v1 = vld [vmem:[%s4756_s12 + $0xe4] sm:$0xff]  ;;  %v3980_v38 = vld [vmem:[%s4756_s12 + $0xf0] sm:$0xff] }
 0x18d   : > { %v4386_v26 = vpop.eup %4385  ;;  %v1202_v58 = vadd.f32 %v1178_v20, %v1101_v11  ;;  %v1203_v57 = vadd.f32 %v1179_v49, %v1102_v2  ;;  %v1381_v18 = vmul.f32 %v6697_v13, %v3831_v54  ;;  %v1482_v52 = vmul.f32 %v6707_v22, %v3855_v14  ;;  %v3955_v56 = vld [vmem:[%s4756_s12 + $0xdc] sm:$0xff] }
 0x18e   : > { %v4388_v44 = vpop.eup %4387  ;;  %v3182_v48 = vmul.f32 %v4386_v26, %v6906_v15  ;;  %v2714_v36 = vadd.f32 %v6958_v63, %v2613_v25  ;;  %v2715_v7 = vadd.f32 %v2691_v46, %v2614_v55  ;;  %v1483_v32 = vmul.f32 %v6707_v22, %v3856_v39  ;;  %v3981_v54 = vld [vmem:[%s4756_s12 + $0xf8] sm:$0xff] }
 0x18f   : > { %v3183_v53 = vmul.f32 %v4388_v44, %v6913_v47  ;;  %v1303_v9 = vadd.f32 %v1279_v10, %v1202_v58  ;;  %v1304_v15 = vadd.f32 %v1280_v28, %v1203_v57  ;;  %v1584_v42 = vmul.f32 %v6716_v19, %v3880_v8  ;;  %v4005_v10 = vld [vmem:[%s4756_s12 + $0xf1] sm:$0xff]  ;;  %v4006_v28 = vld [vmem:[%s4756_s12 + $0xf9] sm:$0xff] }
 0x190   : > { %v2815_v21 = vadd.f32 %v2791_v62, %v2714_v36  ;;  %v2816_v63 = vadd.f32 %v2792_v23, %v2715_v7  ;;  %v1585_v46 = vmul.f32 %v6716_v19, %v3881_v27  ;;  %v1685_v50 = vmul.f32 %v6723_v45, %v3905_v24  ;;  %v4031_v39 = vld [vmem:[%s4756_s12 + $0xfa] sm:$0xff] }
 0x191   : > { %v3200_v47 = vpack.c.bf16 %v3183_v53, %v3182_v48  ;;  %v1404_v20 = vadd.f32 %v1380_v30, %v1303_v9  ;;  %v1405_v49 = vadd.f32 %v1381_v18, %v1304_v15  ;;  %v1686_v34 = vmul.f32 %v6723_v45, %v3906_v37  ;;  %v4030_v30 = vld [vmem:[%s4756_s12 + $0xf2] sm:$0xff]  ;;  %v4056_v58 = vld [vmem:[%s4756_s12 + $0xfb] sm:$0xff]  ;;  %v4105_v15 = vld [vmem:[%s4756_s12 + $0x108] sm:$0xff] }
 0x192   : > { %v2916_v62 = vadd.f32 %v2892_v3, %v2815_v21  ;;  %v2917_v23 = vadd.f32 %v2893_v43, %v2816_v63  ;;  %v1786_v11 = vmul.f32 %v6730_v16, %v3930_v61  ;;  %v1787_v2 = vmul.f32 %v6730_v16, %v3931_v60  ;;  %v4055_v48 = vld [vmem:[%s4756_s12 + $0xf3] sm:$0xff]  ;;  %v4081_v7 = vld [vmem:[%s4756_s12 + $0xfc] sm:$0xff]  ;;  %v4130_v21 = vld [vmem:[%s4756_s12 + $0x109] sm:$0xff] }
 0x193   : > { %4229 = vmatmul.msk.bf16.gmra.mxu3 %vm388_vm1, %v3200_v47  ;;  %v1506_v14 = vadd.f32 %v1482_v52, %v1404_v20  ;;  %v1507_v26 = vadd.f32 %v1483_v32, %v1405_v49  ;;  %v1887_v25 = vmul.f32 %v6738_v12, %v3955_v56  ;;  %v1888_v55 = vmul.f32 %v6738_v12, %v3956_v1  ;;  %v4080_v36 = vld [vmem:[%s4756_s12 + $0xf4] sm:$0xff]  ;;  %v7052_v49 = vld [vmem:[%s4756_s12 + $0x10a] sm:$0xff] }
 0x194   : > { %v7018_v3 = vadd.f32 %v6903_v31, %v2916_v62  ;;  %v7021_v43 = vadd.f32 %v6903_v31, %v2917_v23  ;;  %v1989_v8 = vmul.f32 %v6745_v35, %v3980_v38  ;;  %v1990_v44 = vmul.f32 %v6745_v35, %v3981_v54  ;;  %v4106_v47 = vld [vmem:[%s4756_s12 + $0x110] sm:$0xff]  ;;  %v7637_v23 = vld [vmem:[#allocation6_spill] sm:$0xff] }
 0x195   : > { %v1608_v57 = vadd.f32 %v1584_v42, %v1506_v14  ;;  %v1609_v18 = vadd.f32 %v1585_v46, %v1507_v26  ;;  %v2091_v27 = vmul.f32 %v6758_v40, %v4005_v10  ;;  %v2092_v53 = vmul.f32 %v6758_v40, %v4006_v28  ;;  %v4131_v63 = vld [vmem:[%s4756_s12 + $0x111] sm:$0xff] }
 0x196   : > { %v3000_v52 = vsub.f32 0.0, %v7018_v3  ;;  %v3001_v24 = vsub.f32 0.0, %v7021_v43  ;;  %v2192_v37 = vmul.f32 %v6765_v29, %v4030_v30  ;;  %v2193_v9 = vmul.f32 %v6765_v29, %v4031_v39  ;;  %v7058_v54 = vld [vmem:[%s4756_s12 + $0x112] sm:$0xff] }
 0x197   : > { %v1709_v32 = vadd.f32 %v1685_v50, %v1608_v57  ;;  %v1710_v42 = vadd.f32 %v1686_v34, %v1609_v18  ;;  %v7037_v61 = vmul.f32 %v6776_v17, %v4055_v48  ;;  %v7040_v60 = vmul.f32 %v6776_v17, %v4056_v58  ;;  %v7061_v62 = vld [vmem:[%s4756_s12 + $0x10b] sm:$0xff]  ;;  %v7065_v28 = vld [vmem:[%s4756_s12 + $0x113] sm:$0xff] }
 0x198   : > { %v3038_v46 = vmul.f32 1.442695, %v3000_v52  ;;  %v3040_v56 = vmul.f32 1.442695, %v3001_v24  ;;  %v7046_v1 = vmul.f32 %v6789_v33, %v4080_v36  ;;  %v7049_v20 = vmul.f32 %v6789_v33, %v4081_v7  ;;  %v7638_v26 = vld [vmem:[#allocation9_spill] sm:$0xff]  ;;  %v7639_v57 = vld [vmem:[#allocation4_spill] sm:$0xff] }
 0x199   : > { %v1810_v50 = vadd.f32 %v1786_v11, %v1709_v32  ;;  %v1811_v34 = vadd.f32 %v1787_v2, %v1710_v42  ;;  %v7055_v38 = vmul.f32 %v6802_v4, %v4105_v15  ;;  %v477_v10 = vmul.f32 %v7637_v23, %v4105_v15  ;;  %v7071_v48 = vld [vmem:[%s4756_s12 + $0x10c] sm:$0xff]  ;;  %v7074_v58 = vld [vmem:[%s4756_s12 + $0x114] sm:$0xff] }
 0x19a   : > { %4389 = vpow2.f32 %v3038_v46  ;;  %v478_v14 = vmul.f32 %v7637_v23, %v4106_v47  ;;  %v578_v30 = vmul.f32 %v7638_v26, %v4130_v21  ;;  %v579_v11 = vmul.f32 %v7638_v26, %v4131_v63  ;;  %v7640_v24 = vld [vmem:[#allocation8_spill] sm:$0xff]  ;;  %v3738_v46 = vld [vmem:[%s4756_s12 + $0x120] sm:$0xff]  ;;  %v7641_v23 = vld [vmem:[#allocation10_spill] sm:$0xff] }
 0x19b   : > { %4391 = vpow2.f32 %v3040_v56  ;;  %v1911_v2 = vadd.f32 %v1887_v25, %v1810_v50  ;;  %v1912_v39 = vadd.f32 %v1888_v55, %v1811_v34  ;;  %v679_v18 = vmul.f32 %v7639_v57, %v7052_v49  ;;  %v3739_v56 = vld [vmem:[%s4756_s12 + $0x128] sm:$0xff] }
 0x19c   : > { %v602_v36 = vadd.f32 %v578_v30, %v477_v10  ;;  %v603_v7 = vadd.f32 %v579_v11, %v478_v14  ;;  %v680_v52 = vmul.f32 %v7639_v57, %v7058_v54  ;;  %v780_v15 = vmul.f32 %v7640_v24, %v7061_v62 }
 0x19d   : > { %v2013_v32 = vadd.f32 %v1989_v8, %v1911_v2  ;;  %v2014_v25 = vadd.f32 %v1990_v44, %v1912_v39  ;;  %v2497_v55 = vmul.f32 %v6802_v4, %v4106_v47  ;;  %v781_v42 = vmul.f32 %v7640_v24, %v7065_v28  ;;  %v3763_v8 = vld [vmem:[%s4756_s12 + $0x121] sm:$0xff]  ;;  %v3764_v2 = vld [vmem:[%s4756_s12 + $0x129] sm:$0xff] }
 0x19e   : > { %v703_v50 = vadd.f32 %v679_v18, %v602_v36  ;;  %v704_v34 = vadd.f32 %v680_v52, %v603_v7  ;;  %v881_v10 = vmul.f32 %v7641_v23, %v7071_v48  ;;  %v882_v14 = vmul.f32 %v7641_v23, %v7074_v58  ;;  %v7642_v47 = vld [vmem:[#allocation7_spill] sm:$0xff]  ;;  %v411_v24 = vld [vmem:[%s5193_s30 + $0x48] sm:$0xff]  ;;  %v412_v23 = vld [vmem:[%s5193_s30 + $0x50] sm:$0xff] }
 0x19f   : > { %v2115_v44 = vadd.f32 %v2091_v27, %v2013_v32  ;;  %v2116_v26 = vadd.f32 %v2092_v53, %v2014_v25  ;;  %v2597_v30 = vmul.f32 %v7642_v47, %v4130_v21  ;;  %v2598_v11 = vmul.f32 %v7642_v47, %v4131_v63  ;;  %v3788_v52 = vld [vmem:[%s4756_s12 + $0x122] sm:$0xff]  ;;  %v3789_v32 = vld [vmem:[%s4756_s12 + $0x12a] sm:$0xff]  ;;  %424 = vst.msk [vmem:[#allocation2 + $0xa8] sm:$0xff] %vm388_vm1, %v411_v24 }
 0x1a0   : > { %v4390_v39 = vpop.eup %4389  ;;  %v804_v57 = vadd.f32 %v780_v15, %v703_v50  ;;  %v805_v18 = vadd.f32 %v781_v42, %v704_v34  ;;  %v983_v36 = vmul.f32 %v6651_v51, %v3738_v46  ;;  %v984_v7 = vmul.f32 %v6651_v51, %v3739_v56  ;;  %v413_v51 = vld [vmem:[%s5193_s30 + $0x58] sm:$0xf]  ;;  %425 = vst.msk [vmem:[#allocation2 + $0xb0] sm:$0xff] %vm388_vm1, %v412_v23  ;;  %v3813_v50 = vld [vmem:[%s4756_s12 + $0x123] sm:$0xff]  ;;  %v3814_v34 = vld [vmem:[%s4756_s12 + $0x12b] sm:$0xff] }
 0x1a1   : > { %v4392_v4 = vpop.eup %4391  ;;  %v3096_v27 = vadd.f32 1.0, %v4390_v39  ;;  %v2216_v53 = vadd.f32 %v2192_v37, %v2115_v44  ;;  %v2217_v21 = vadd.f32 %v2193_v9, %v2116_v26  ;;  %v1085_v63 = vmul.f32 %v6661_v6, %v3763_v8  ;;  %426 = vst.msk [vmem:[#allocation2 + $0xb8] sm:$0xf] %vm391_vm2, %v413_v51  ;;  %v3838_v26 = vld [vmem:[%s4756_s12 + $0x124] sm:$0xff] }
 0x1a2   : > { %v3097_v15 = vadd.f32 1.0, %v4392_v4  ;;  %v905_v25 = vadd.f32 %v881_v10, %v804_v57  ;;  %v906_v42 = vadd.f32 %v882_v14, %v805_v18  ;;  %v1086_v46 = vmul.f32 %v6661_v6, %v3764_v2  ;;  %v3839_v2 = vld [vmem:[%s4756_s12 + $0x12c] sm:$0xff]  ;;  %v3914_v51 = vld [vmem:[%s4756_s12 + $0x142] sm:$0xff] }
 0x1a3   : > { %4393 = vrcp.f32 %v3096_v27  ;;  %v2317_v56 = vadd.f32 %v7037_v61, %v2216_v53  ;;  %v2318_v37 = vadd.f32 %v7040_v60, %v2217_v21  ;;  %v1186_v9 = vmul.f32 %v6673_v0, %v3788_v52  ;;  %v7118_v60 = vld [vmem:[%s7535_s2 + $0x16] ss:$0 sm:$0xff] }
 0x1a4   : > { %4395 = vrcp.f32 %v3097_v15  ;;  %v1007_v4 = vadd.f32 %v983_v36, %v905_v25  ;;  %v1008_v6 = vadd.f32 %v984_v7, %v906_v42  ;;  %v1187_v10 = vmul.f32 %v6673_v0, %v3789_v32  ;;  %v3864_v7 = vld [vmem:[%s4756_s12 + $0x140] sm:$0xff] }
 0x1a5   : > { %v2418_v14 = vadd.f32 %v7046_v1, %v2317_v56  ;;  %v2419_v61 = vadd.f32 %v7049_v20, %v2318_v37  ;;  %v2698_v8 = vmul.f32 %v7118_v60, %v7052_v49  ;;  %v2699_v44 = vmul.f32 %v7118_v60, %v7058_v54  ;;  %v3863_v20 = vld [vmem:[%s4756_s12 + $0x138] sm:$0xff] }
 0x1a6   : > { %v1109_v39 = vadd.f32 %v1085_v63, %v1007_v4  ;;  %v1110_v0 = vadd.f32 %v1086_v46, %v1008_v6  ;;  %v1287_v1 = vmul.f32 %v6686_v41, %v3813_v50  ;;  %v1288_v57 = vmul.f32 %v6686_v41, %v3814_v34  ;;  %v3938_v56 = vld [vmem:[%s4756_s12 + $0x13b] sm:$0xff]  ;;  %v3939_v50 = vld [vmem:[%s4756_s12 + $0x143] sm:$0xff] }
 0x1a7   : > { %v2520_v18 = vadd.f32 %v7055_v38, %v2418_v14  ;;  %v2521_v36 = vadd.f32 %v2497_v55, %v2419_v61  ;;  %v2799_v49 = vmul.f32 %v6859_v59, %v7061_v62  ;;  %v2800_v54 = vmul.f32 %v6859_v59, %v7065_v28  ;;  %v3888_v55 = vld [vmem:[%s4756_s12 + $0x139] sm:$0xff]  ;;  %v3889_v28 = vld [vmem:[%s4756_s12 + $0x141] sm:$0xff]  ;;  %v3988_v14 = vld [vmem:[%s4756_s12 + $0x150] sm:$0xff] }
 0x1a8   : > { %v1210_v52 = vadd.f32 %v1186_v9, %v1109_v39  ;;  %v1211_v24 = vadd.f32 %v1187_v10, %v1110_v0  ;;  %v1388_v23 = vmul.f32 %v6697_v13, %v3838_v26  ;;  %v1389_v41 = vmul.f32 %v6697_v13, %v3839_v2  ;;  %v3963_v34 = vld [vmem:[%s4756_s12 + $0x13c] sm:$0xff]  ;;  %v4013_v2 = vld [vmem:[%s4756_s12 + $0x151] sm:$0xff] }
 0x1a9   : > { %v4394_v27 = vpop.eup %4393  ;;  %v2621_v53 = vadd.f32 %v2597_v30, %v2520_v18  ;;  %v2622_v21 = vadd.f32 %v2598_v11, %v2521_v36  ;;  %v2900_v38 = vmul.f32 %v6872_v5, %v7071_v48  ;;  %v1490_v62 = vmul.f32 %v6707_v22, %v3863_v20  ;;  %v3913_v30 = vld [vmem:[%s4756_s12 + $0x13a] sm:$0xff]  ;;  %v4038_v18 = vld [vmem:[%s4756_s12 + $0x152] sm:$0xff] }
 0x1aa   : > { %v4396_v63 = vpop.eup %4395  ;;  %v3160_v32 = vmul.f32 %v4394_v27, %v7018_v3  ;;  %v1311_v15 = vadd.f32 %v1287_v1, %v1210_v52  ;;  %v1312_v25 = vadd.f32 %v1288_v57, %v1211_v24  ;;  %v1491_v13 = vmul.f32 %v6707_v22, %v3864_v7  ;;  %v4014_v20 = vld [vmem:[%s4756_s12 + $0x159] sm:$0xff] }
 0x1ab   : > { %v3161_v11 = vmul.f32 %v4396_v63, %v7021_v43  ;;  %v2722_v42 = vadd.f32 %v2698_v8, %v2621_v53  ;;  %v2723_v48 = vadd.f32 %v2699_v44, %v2622_v21  ;;  %v2901_v46 = vmul.f32 %v6872_v5, %v7074_v58  ;;  %v3964_v58 = vld [vmem:[%s4756_s12 + $0x144] sm:$0xff]  ;;  %v4039_v7 = vld [vmem:[%s4756_s12 + $0x15a] sm:$0xff] }
 0x1ac   : > { %v1412_v37 = vadd.f32 %v1388_v23, %v1311_v15  ;;  %v1413_v3 = vadd.f32 %v1389_v41, %v1312_v25  ;;  %v1592_v9 = vmul.f32 %v6716_v19, %v3888_v55  ;;  %v1593_v22 = vmul.f32 %v6716_v19, %v3889_v28  ;;  %v3989_v19 = vld [vmem:[%s4756_s12 + $0x158] sm:$0xff]  ;;  %v4113_v28 = vld [vmem:[%s4756_s12 + $0x168] sm:$0xff] }
 0x1ad   : > { %v3189_v43 = vpack.c.bf16 %v3161_v11, %v3160_v32  ;;  %v2823_v4 = vadd.f32 %v2799_v49, %v2722_v42  ;;  %v2824_v6 = vadd.f32 %v2800_v54, %v2723_v48  ;;  %v1693_v10 = vmul.f32 %v6723_v45, %v3913_v30  ;;  %v4063_v52 = vld [vmem:[%s4756_s12 + $0x153] sm:$0xff]  ;;  %v4064_v27 = vld [vmem:[%s4756_s12 + $0x15b] sm:$0xff]  ;;  %v509_v25 = vld [vmem:[#allocation2 + $0x48] sm:$0xff] }
 0x1ae   : > { %v1514_v61 = vadd.f32 %v1490_v62, %v1412_v37  ;;  %v1515_v8 = vadd.f32 %v1491_v13, %v1413_v3  ;;  %v1694_v44 = vmul.f32 %v6723_v45, %v3914_v51  ;;  %v1794_v26 = vmul.f32 %v6730_v16, %v3938_v56  ;;  %v4088_v53 = vld [vmem:[%s4756_s12 + $0x154] sm:$0xff]  ;;  %v4089_v55 = vld [vmem:[%s4756_s12 + $0x15c] sm:$0xff]  ;;  %v610_v48 = vld [vmem:[#allocation2 + $0x49] sm:$0xff] }
 0x1af   : > { %4218 = vmatmul.msk.bf16.gmra.mxu0 %vm388_vm1, %v3189_v43  ;;  %v2924_v39 = vadd.f32 %v2900_v38, %v2823_v4  ;;  %v2925_v0 = vadd.f32 %v2901_v46, %v2824_v6  ;;  %v1795_v1 = vmul.f32 %v6730_v16, %v3939_v50  ;;  %v1895_v57 = vmul.f32 %v6738_v12, %v3963_v34  ;;  %v510_v13 = vld [vmem:[#allocation2 + $0x50] sm:$0xff]  ;;  %v7643_v3 = vld [vmem:[#allocation3_spill] sm:$0xff] }
 0x1b0   : > { %v1616_v36 = vadd.f32 %v1592_v9, %v1514_v61  ;;  %v1617_v45 = vadd.f32 %v1593_v22, %v1515_v8  ;;  %v1896_v49 = vmul.f32 %v6738_v12, %v3964_v58  ;;  %v1997_v54 = vmul.f32 %v6745_v35, %v3988_v14  ;;  %v611_v46 = vld [vmem:[#allocation2 + $0x51] sm:$0xff]  ;;  %v4628_v34 = vld [vmem:[%s7535_s2] ss:$0 sm:$0xff]  ;;  %v4629_v14 = vld [vmem:[%s7535_s2 + $0x1] ss:$0 sm:$0xff] }
 0x1b1   : > { %v7171_v24 = vadd.f32 %v6903_v31, %v2924_v39  ;;  %v7174_v23 = vadd.f32 %v6903_v31, %v2925_v0  ;;  %v1998_v16 = vmul.f32 %v6745_v35, %v3989_v19  ;;  %v2099_v41 = vmul.f32 %v6758_v40, %v4013_v2  ;;  %v711_v51 = vld [vmem:[#allocation2 + $0x4a] sm:$0xff]  ;;  %v712_v22 = vld [vmem:[#allocation2 + $0x52] sm:$0xff] }
 0x1b2   : > { %v1717_v21 = vadd.f32 %v1693_v10, %v1616_v36  ;;  %v1718_v38 = vadd.f32 %v1694_v44, %v1617_v45  ;;  %v2100_v12 = vmul.f32 %v6758_v40, %v4014_v20  ;;  %v2200_v62 = vmul.f32 %v6765_v29, %v4038_v18  ;;  %v812_v6 = vld [vmem:[#allocation2 + $0x4b] sm:$0xff]  ;;  %v813_v10 = vld [vmem:[#allocation2 + $0x53] sm:$0xff]  ;;  %v4630_v44 = vld [vmem:[%s7535_s2 + $0x2] ss:$0 sm:$0xff] }
 0x1b3   : > { %v3008_v63 = vsub.f32 0.0, %v7171_v24  ;;  %v3009_v32 = vsub.f32 0.0, %v7174_v23  ;;  %v2201_v15 = vmul.f32 %v6765_v29, %v4039_v7  ;;  %v7188_v35 = vmul.f32 %v6776_v17, %v4063_v52  ;;  %v4114_v58 = vld [vmem:[%s4756_s12 + $0x170] sm:$0xff]  ;;  %v4631_v45 = vld [vmem:[%s7535_s2 + $0x3] ss:$0 sm:$0xff] }
 0x1b4   : > { %v1818_v30 = vadd.f32 %v1794_v26, %v1717_v21  ;;  %v1819_v11 = vadd.f32 %v1795_v1, %v1718_v38  ;;  %v7191_v42 = vmul.f32 %v6776_v17, %v4064_v27  ;;  %v7194_v40 = vmul.f32 %v6789_v33, %v4088_v53  ;;  %v913_v0 = vld [vmem:[#allocation2 + $0x4c] sm:$0xff]  ;;  %v914_v1 = vld [vmem:[#allocation2 + $0x54] sm:$0xff]  ;;  %v1016_v21 = vld [vmem:[#allocation2 + $0x60] sm:$0xff] }
 0x1b5   : > { %v3054_v56 = vmul.f32 1.442695, %v3008_v63  ;;  %v3056_v29 = vmul.f32 1.442695, %v3009_v32  ;;  %v7197_v37 = vmul.f32 %v6789_v33, %v4089_v55  ;;  %v7200_v9 = vmul.f32 %v7643_v3, %v4113_v28  ;;  %v4138_v33 = vld [vmem:[%s4756_s12 + $0x169] sm:$0xff] }
 0x1b6   : > { %v1919_v50 = vadd.f32 %v1895_v57, %v1818_v30  ;;  %v1920_v17 = vadd.f32 %v1896_v49, %v1819_v11  ;;  %v517_v43 = vmul.f32 %v4628_v34, %v509_v25  ;;  %v518_v4 = vmul.f32 %v4628_v34, %v510_v13  ;;  %v4139_v57 = vld [vmem:[%s4756_s12 + $0x171] sm:$0xff]  ;;  %v1017_v38 = vld [vmem:[#allocation2 + $0x68] sm:$0xff]  ;;  %v4633_v63 = vld [vmem:[%s7535_s2 + $0x4] ss:$0 sm:$0xff] }
 0x1b7   : > { %4397 = vpow2.f32 %v3054_v56  ;;  %v618_v61 = vmul.f32 %v4629_v14, %v610_v48  ;;  %v619_v8 = vmul.f32 %v4629_v14, %v611_v46  ;;  %v719_v26 = vmul.f32 %v4630_v44, %v711_v51  ;;  %v4163_v20 = vld [vmem:[%s4756_s12 + $0x16a] sm:$0xff]  ;;  %v4635_v34 = vld [vmem:[%s7535_s2 + $0x6] ss:$0 sm:$0xff] }
 0x1b8   : > { %4399 = vpow2.f32 %v3056_v29  ;;  %v2021_v19 = vadd.f32 %v1997_v54, %v1919_v50  ;;  %v2022_v2 = vadd.f32 %v1998_v16, %v1920_v17  ;;  %v720_v39 = vmul.f32 %v4630_v44, %v712_v22  ;;  %v7221_v54 = vld [vmem:[%s7535_s2 + $0x14] ss:$0 sm:$0xff]  ;;  %v1118_v48 = vld [vmem:[#allocation2 + $0x69] sm:$0xff]  ;;  %v4634_v29 = vld [vmem:[%s7535_s2 + $0x5] ss:$0 sm:$0xff] }
 0x1b9   : > { %v626_v18 = vadd.f32 %v618_v61, %v517_v43  ;;  %v627_v36 = vadd.f32 %v619_v8, %v518_v4  ;;  %v820_v49 = vmul.f32 %v4631_v45, %v812_v6  ;;  %v821_v7 = vmul.f32 %v4631_v45, %v813_v10  ;;  %v1218_v50 = vld [vmem:[#allocation2 + $0x62] sm:$0xff]  ;;  %v1219_v4 = vld [vmem:[#allocation2 + $0x6a] sm:$0xff]  ;;  %v4164_v10 = vld [vmem:[%s4756_s12 + $0x172] sm:$0xff] }
 0x1ba   : > { %v2123_v52 = vadd.f32 %v2099_v41, %v2021_v19  ;;  %v2124_v27 = vadd.f32 %v2100_v12, %v2022_v2  ;;  %v2505_v16 = vmul.f32 %v7221_v54, %v4114_v58  ;;  %v2605_v53 = vmul.f32 %v7642_v47, %v4138_v33  ;;  %v1117_v12 = vld [vmem:[#allocation2 + $0x61] sm:$0xff]  ;;  %v4188_v58 = vld [vmem:[%s4756_s12 + $0x16b] sm:$0xff]  ;;  %v4189_v2 = vld [vmem:[%s4756_s12 + $0x173] sm:$0xff] }
 0x1bb   : > { %v727_v55 = vadd.f32 %v719_v26, %v626_v18  ;;  %v728_v28 = vadd.f32 %v720_v39, %v627_v36  ;;  %v921_v32 = vmul.f32 %v4633_v63, %v913_v0  ;;  %v922_v41 = vmul.f32 %v4633_v63, %v914_v1  ;;  %v1319_v26 = vld [vmem:[#allocation2 + $0x63] sm:$0xff]  ;;  %v1320_v19 = vld [vmem:[#allocation2 + $0x6b] sm:$0xff] }
 0x1bc   : > { %v2224_v25 = vadd.f32 %v2200_v62, %v2123_v52  ;;  %v2225_v13 = vadd.f32 %v2201_v15, %v2124_v27  ;;  %v2606_v30 = vmul.f32 %v7642_v47, %v4139_v57  ;;  %v2706_v11 = vmul.f32 %v7118_v60, %v4163_v20  ;;  %v4213_v39 = vld [vmem:[%s4756_s12 + $0x16c] sm:$0xff]  ;;  %v1420_v36 = vld [vmem:[#allocation2 + $0x64] sm:$0xff] }
 0x1bd   : > { %v4398_v46 = vpop.eup %4397  ;;  %v828_v51 = vadd.f32 %v820_v49, %v727_v55  ;;  %v829_v56 = vadd.f32 %v821_v7, %v728_v28  ;;  %v1024_v3 = vmul.f32 %v4634_v29, %v1016_v21  ;;  %v1025_v22 = vmul.f32 %v4634_v29, %v1017_v38  ;;  %v1421_v45 = vld [vmem:[#allocation2 + $0x6c] sm:$0xff]  ;;  %v4214_v49 = vld [vmem:[%s4756_s12 + $0x174] sm:$0xff]  ;;  %v4637_v27 = vld [vmem:[%s7535_s2 + $0x8] ss:$0 sm:$0xff] }
 0x1be   : > { %v4400_v17 = vpop.eup %4399  ;;  %v3104_v62 = vadd.f32 1.0, %v4398_v46  ;;  %v2325_v15 = vadd.f32 %v7188_v35, %v2224_v25  ;;  %v2326_v47 = vadd.f32 %v7191_v42, %v2225_v13  ;;  %v1125_v43 = vmul.f32 %v4635_v34, %v1117_v12  ;;  %v4636_v42 = vld [vmem:[%s7535_s2 + $0x7] ss:$0 sm:$0xff]  ;;  %v1523_v55 = vld [vmem:[#allocation2 + $0x78] sm:$0xff]  ;;  %v4638_v25 = vld [vmem:[%s7535_s2 + $0x9] ss:$0 sm:$0xff] }
 0x1bf   : > { %v3105_v6 = vadd.f32 1.0, %v4400_v17  ;;  %v929_v33 = vadd.f32 %v921_v32, %v828_v51  ;;  %v930_v14 = vadd.f32 %v922_v41, %v829_v56  ;;  %v1126_v61 = vmul.f32 %v4635_v34, %v1118_v48  ;;  %v1524_v32 = vld [vmem:[#allocation2 + $0x80] sm:$0xff] }
 0x1c0   : > { %4401 = vrcp.f32 %v3104_v62  ;;  %v2426_v8 = vadd.f32 %v7194_v40, %v2325_v15  ;;  %v2427_v35 = vadd.f32 %v7197_v37, %v2326_v47  ;;  %v1226_v44 = vmul.f32 %v4636_v42, %v1218_v50 }
 0x1c1   : > { %4403 = vrcp.f32 %v3105_v6  ;;  %v1032_v0 = vadd.f32 %v1024_v3, %v929_v33  ;;  %v1033_v1 = vadd.f32 %v1025_v22, %v930_v14  ;;  %v1227_v57 = vmul.f32 %v4636_v42, %v1219_v4  ;;  %v1625_v3 = vld [vmem:[#allocation2 + $0x81] sm:$0xff] }
 0x1c2   : > { %v2528_v20 = vadd.f32 %v7200_v9, %v2426_v8  ;;  %v2529_v18 = vadd.f32 %v2505_v16, %v2427_v35  ;;  %v2707_v40 = vmul.f32 %v7118_v60, %v4164_v10  ;;  %v2807_v37 = vmul.f32 %v6859_v59, %v4188_v58  ;;  %v1726_v4 = vld [vmem:[#allocation2 + $0x82] sm:$0xff]  ;;  %v4640_v10 = vld [vmem:[%s7535_s2 + $0xb] ss:$0 sm:$0xff] }
 0x1c3   : > { %v1133_v7 = vadd.f32 %v1125_v43, %v1032_v0  ;;  %v1134_v52 = vadd.f32 %v1126_v61, %v1033_v1  ;;  %v1327_v21 = vmul.f32 %v4637_v27, %v1319_v26  ;;  %v1328_v38 = vmul.f32 %v4637_v27, %v1320_v19  ;;  %v1725_v43 = vld [vmem:[#allocation2 + $0x7a] sm:$0xff]  ;;  %v1827_v35 = vld [vmem:[#allocation2 + $0x83] sm:$0xff] }
 0x1c4   : > { %v2629_v28 = vadd.f32 %v2605_v53, %v2528_v20  ;;  %v2630_v63 = vadd.f32 %v2606_v30, %v2529_v18  ;;  %v2808_v9 = vmul.f32 %v6859_v59, %v4189_v2  ;;  %v2908_v16 = vmul.f32 %v6872_v5, %v4213_v39  ;;  %v4639_v59 = vld [vmem:[%s7535_s2 + $0xa] ss:$0 sm:$0xff]  ;;  %v1624_v30 = vld [vmem:[#allocation2 + $0x79] sm:$0xff]  ;;  %v4642_v18 = vld [vmem:[%s7535_s2 + $0xd] ss:$0 sm:$0xff] }
 0x1c5   : > { %v1234_v41 = vadd.f32 %v1226_v44, %v1133_v7  ;;  %v1235_v12 = vadd.f32 %v1227_v57, %v1134_v52  ;;  %v1428_v13 = vmul.f32 %v4638_v25, %v1420_v36  ;;  %v1429_v48 = vmul.f32 %v4638_v25, %v1421_v45  ;;  %v1826_v8 = vld [vmem:[#allocation2 + $0x7b] sm:$0xff]  ;;  %v1928_v1 = vld [vmem:[#allocation2 + $0x84] sm:$0xff] }
 0x1c6   : > { %v4402_v46 = vpop.eup %4401  ;;  %v2730_v51 = vadd.f32 %v2706_v11, %v2629_v28  ;;  %v2731_v56 = vadd.f32 %v2707_v40, %v2630_v63  ;;  %v2909_v29 = vmul.f32 %v6872_v5, %v4214_v49  ;;  %v1531_v53 = vmul.f32 %v4639_v59, %v1523_v55  ;;  %v1927_v0 = vld [vmem:[#allocation2 + $0x7c] sm:$0xff]  ;;  %v2030_v49 = vld [vmem:[#allocation2 + $0x90] sm:$0xff] }
 0x1c7   : > { %v4404_v22 = vpop.eup %4403  ;;  %v3168_v50 = vmul.f32 %v4402_v46, %v7171_v24  ;;  %v1335_v17 = vadd.f32 %v1327_v21, %v1234_v41  ;;  %v1336_v62 = vadd.f32 %v1328_v38, %v1235_v12  ;;  %v1532_v15 = vmul.f32 %v4639_v59, %v1524_v32  ;;  %v2031_v7 = vld [vmem:[#allocation2 + $0x98] sm:$0xff]  ;;  %v4644_v41 = vld [vmem:[%s7535_s2 + $0xf] ss:$0 sm:$0xff] }
 0x1c8   : > { %v3169_v47 = vmul.f32 %v4404_v22, %v7174_v23  ;;  %v2831_v34 = vadd.f32 %v2807_v37, %v2730_v51  ;;  %v2832_v11 = vadd.f32 %v2808_v9, %v2731_v56  ;;  %v1632_v58 = vmul.f32 %v4640_v10, %v1624_v30  ;;  %v4641_v23 = vld [vmem:[%s7535_s2 + $0xc] ss:$0 sm:$0xff]  ;;  %v2131_v55 = vld [vmem:[#allocation2 + $0x91] sm:$0xff]  ;;  %v2132_v9 = vld [vmem:[#allocation2 + $0x99] sm:$0xff] }
 0x1c9   : > { %v1436_v5 = vadd.f32 %v1428_v13, %v1335_v17  ;;  %v1437_v6 = vadd.f32 %v1429_v48, %v1336_v62  ;;  %v1633_v33 = vmul.f32 %v4640_v10, %v1625_v3  ;;  %v1733_v26 = vmul.f32 %v4641_v23, %v1725_v43  ;;  %v4645_v13 = vld [vmem:[%s7535_s2 + $0x10] ss:$0 sm:$0xff]  ;;  %v2232_v46 = vld [vmem:[#allocation2 + $0x92] sm:$0xff]  ;;  %v2233_v51 = vld [vmem:[#allocation2 + $0x9a] sm:$0xff] }
 0x1ca   : > { %v3193_v14 = vpack.c.bf16 %v3169_v47, %v3168_v50  ;;  %v2932_v61 = vadd.f32 %v2908_v16, %v2831_v34  ;;  %v2933_v24 = vadd.f32 %v2909_v29, %v2832_v11  ;;  %v1734_v19 = vmul.f32 %v4641_v23, %v1726_v4  ;;  %v2334_v30 = vld [vmem:[#allocation2 + $0x9b] sm:$0xff]  ;;  %v4646_v50 = vld [vmem:[%s7535_s2 + $0x11] ss:$0 sm:$0xff]  ;;  %v4647_v43 = vld [vmem:[%s7535_s2 + $0x12] ss:$0 sm:$0xff] }
 0x1cb   : > { %v1539_v42 = vadd.f32 %v1531_v53, %v1436_v5  ;;  %v1540_v44 = vadd.f32 %v1532_v15, %v1437_v6  ;;  %v1834_v40 = vmul.f32 %v4642_v18, %v1826_v8  ;;  %v1835_v37 = vmul.f32 %v4642_v18, %v1827_v35  ;;  %v2333_v53 = vld [vmem:[#allocation2 + $0x93] sm:$0xff]  ;;  %v2435_v47 = vld [vmem:[#allocation2 + $0x9c] sm:$0xff]  ;;  %v2536_v6 = vld [vmem:[#allocation2 + $0xa8] sm:$0xff] }
 0x1cc   : > { %4222 = vmatmul.msk.bf16.gmra.mxu1 %vm388_vm1, %v3193_v14  ;;  %v7273_v2 = vadd.f32 %v6903_v31, %v2932_v61  ;;  %v7276_v39 = vadd.f32 %v6903_v31, %v2933_v24  ;;  %v4643_v31 = vld [vmem:[%s7535_s2 + $0xe] ss:$0 sm:$0xff]  ;;  %v2038_v12 = vmul.f32 %v4644_v41, %v2030_v49  ;;  %v2039_v25 = vmul.f32 %v4644_v41, %v2031_v7  ;;  %v2434_v15 = vld [vmem:[#allocation2 + $0x94] sm:$0xff] }
 0x1cd   : > { %v1640_v57 = vadd.f32 %v1632_v58, %v1539_v42  ;;  %v1641_v20 = vadd.f32 %v1633_v33, %v1540_v44  ;;  %v1935_v21 = vmul.f32 %v4643_v31, %v1927_v0  ;;  %v1936_v38 = vmul.f32 %v4643_v31, %v1928_v1  ;;  %v4648_v58 = vld [vmem:[%s7535_s2 + $0x13] ss:$0 sm:$0xff]  ;;  %v2839_v7 = vld [vmem:[#allocation2 + $0xab] sm:$0xff] }
 0x1ce   : > { %v3016_v36 = vsub.f32 0.0, %v7273_v2  ;;  %v3017_v45 = vsub.f32 0.0, %v7276_v39  ;;  %v2139_v48 = vmul.f32 %v4645_v13, %v2131_v55  ;;  %v2140_v59 = vmul.f32 %v4645_v13, %v2132_v9  ;;  %v2537_v14 = vld [vmem:[#allocation2 + $0xb0] sm:$0xff]  ;;  %v4651_v13 = vld [vmem:[%s7535_s2 + $0x18] ss:$0 sm:$0xff] }
 0x1cf   : > { %v1741_v52 = vadd.f32 %v1733_v26, %v1640_v57  ;;  %v1742_v27 = vadd.f32 %v1734_v19, %v1641_v20  ;;  %v2240_v17 = vmul.f32 %v4646_v50, %v2232_v46  ;;  %v2241_v62 = vmul.f32 %v4646_v50, %v2233_v51  ;;  %v2637_v26 = vld [vmem:[#allocation2 + $0xa9] sm:$0xff]  ;;  %v2638_v19 = vld [vmem:[#allocation2 + $0xb1] sm:$0xff] }
 0x1d0   : > { %v3070_v28 = vmul.f32 1.442695, %v3016_v36  ;;  %v3072_v63 = vmul.f32 1.442695, %v3017_v45  ;;  %v2341_v4 = vmul.f32 %v4647_v43, %v2333_v53  ;;  %v2342_v5 = vmul.f32 %v4647_v43, %v2334_v30  ;;  %v2738_v20 = vld [vmem:[#allocation2 + $0xaa] sm:$0xff]  ;;  %v2739_v18 = vld [vmem:[#allocation2 + $0xb2] sm:$0xff]  ;;  %v3288_v53 = vpop.f32.mrf.mxu1 }
 0x1d1   : > { %v1842_v16 = vadd.f32 %v1834_v40, %v1741_v52  ;;  %v1843_v32 = vadd.f32 %v1835_v37, %v1742_v27  ;;  %v2442_v33 = vmul.f32 %v4648_v58, %v2434_v15  ;;  %v2443_v42 = vmul.f32 %v4648_v58, %v2435_v47  ;;  %v4649_v36 = vld [vmem:[%s7535_s2 + $0x15] ss:$0 sm:$0xff]  ;;  %v4652_v43 = vld [vmem:[%s7536_s3] ss:$0 sm:$0xff] }
 0x1d2   : > { %4405 = vpow2.f32 %v3070_v28  ;;  %v2544_v23 = vmul.f32 %v7221_v54, %v2536_v6  ;;  %v2545_v57 = vmul.f32 %v7221_v54, %v2537_v14  ;;  %v2645_v45 = vmul.f32 %v4649_v36, %v2637_v26  ;;  %v2840_v52 = vld [vmem:[#allocation2 + $0xb3] sm:$0xff] }
 0x1d3   : > { %4407 = vpow2.f32 %v3072_v63  ;;  %v1943_v56 = vadd.f32 %v1935_v21, %v1842_v16  ;;  %v1944_v29 = vadd.f32 %v1936_v38, %v1843_v32  ;;  %v2646_v49 = vmul.f32 %v4649_v36, %v2638_v19  ;;  %v2940_v54 = vld [vmem:[#allocation2 + $0xac] sm:$0xff]  ;;  %v2941_v55 = vld [vmem:[#allocation2 + $0xb4] sm:$0xff] }
 0x1d4   : > { %v2746_v21 = vmul.f32 %v7118_v60, %v2738_v20  ;;  %v2747_v38 = vmul.f32 %v7118_v60, %v2739_v18  ;;  %v4650_v16 = vld [vmem:[%s7535_s2 + $0x17] ss:$0 sm:$0xff] }
 0x1d5   : > { %v2046_v3 = vadd.f32 %v2038_v12, %v1943_v56  ;;  %v2047_v22 = vadd.f32 %v2039_v25, %v1944_v29  ;;  %v2847_v32 = vmul.f32 %v4650_v16, %v2839_v7  ;;  %v2848_v41 = vmul.f32 %v4650_v16, %v2840_v52  ;;  %v7319_v29 = vld [vmem:[%s7538_s5] ss:$0 sm:$0xff] }
 0x1d6   : > { %v2949_v56 = vmul.f32 %v4651_v13, %v2941_v55 }
 0x1d7   : > { %v2147_v34 = vadd.f32 %v2139_v48, %v2046_v3  ;;  %v2148_v11 = vadd.f32 %v2140_v59, %v2047_v22  ;;  %v2948_v48 = vmul.f32 %v4651_v13, %v2940_v54  ;;  %v3268_v59 = vpop.f32.mrf.mxu0  ;;  %v3308_v22 = vpop.f32.mrf.mxu2 }
 0x1d8   : > { %v4406_v10 = vpop.eup %4405  ;;  %v7322_v50 = vadd.f32 %v7319_v29, %v3268_v59 }
 0x1d9   : > { %v4408_v61 = vpop.eup %4407  ;;  %v3112_v24 = vadd.f32 1.0, %v4406_v10  ;;  %v2248_v8 = vadd.f32 %v2240_v17, %v2147_v34  ;;  %v2249_v35 = vadd.f32 %v2241_v62, %v2148_v11  ;;  %v7325_v17 = vadd.f32 %v7319_v29, %v3288_v53 }
 0x1da   : > { %v3113_v44 = vadd.f32 1.0, %v4408_v61  ;;  %v3348_v47 = vsub.f32 0.0, %v7322_v50 }
 0x1db   : > { %4409 = vrcp.f32 %v3112_v24  ;;  %v2349_v0 = vadd.f32 %v2341_v4, %v2248_v8  ;;  %v2350_v1 = vadd.f32 %v2342_v5, %v2249_v35  ;;  %v3356_v34 = vsub.f32 0.0, %v7325_v17  ;;  %v3290_v24 = vpop.f32.mrf.mxu1 }
 0x1dc   : > { %4411 = vrcp.f32 %v3113_v44  ;;  %v3380_v6 = vmul.f32 1.442695, %v3348_v47  ;;  %v7347_v26 = vadd.f32 %v7319_v29, %v3290_v24 }
 0x1dd   : > { %v2450_v40 = vadd.f32 %v2442_v33, %v2349_v0  ;;  %v2451_v37 = vadd.f32 %v2443_v42, %v2350_v1  ;;  %v3396_v10 = vmul.f32 1.442695, %v3356_v34 }
 0x1de   : > { %4413 = vpow2.f32 %v3380_v6 }
 0x1df   : > { %v2552_v27 = vadd.f32 %v2544_v23, %v2450_v40  ;;  %v2553_v31 = vadd.f32 %v2545_v57, %v2451_v37  ;;  %v3270_v61 = vpop.f32.mrf.mxu0  ;;  %4415 = vpow2.f32 %v3396_v10  ;;  %v3310_v44 = vpop.f32.mrf.mxu2  ;;  %v3357_v57 = vsub.f32 0.0, %v7347_v26 }
 0x1e0   : > { %v7344_v42 = vadd.f32 %v7319_v29, %v3270_v61  ;;  %v3328_v23 = vpop.f32.mrf.mxu3  ;;  %v7350_v19 = vadd.f32 %v7319_v29, %v3310_v44 }
 0x1e1   : > { %v4410_v28 = vpop.eup %4409  ;;  %v2653_v63 = vadd.f32 %v2645_v45, %v2552_v27  ;;  %v2654_v9 = vadd.f32 %v2646_v49, %v2553_v31  ;;  %v7353_v0 = vadd.f32 %v7319_v29, %v3328_v23  ;;  %v3398_v36 = vmul.f32 1.442695, %v3357_v57 }
 0x1e2   : > { %v4412_v12 = vpop.eup %4411  ;;  %v3176_v25 = vmul.f32 %v4410_v28, %v7273_v2  ;;  %v3349_v1 = vsub.f32 0.0, %v7344_v42  ;;  %v3365_v20 = vsub.f32 0.0, %v7350_v19 }
 0x1e3   : > { %v3177_v60 = vmul.f32 %v4412_v12, %v7276_v39  ;;  %v2754_v46 = vadd.f32 %v2746_v21, %v2653_v63  ;;  %v2755_v51 = vadd.f32 %v2747_v38, %v2654_v9  ;;  %v7328_v39 = vadd.f32 %v7319_v29, %v3308_v22  ;;  %v3293_v38 = vpop.f32.mrf.mxu1 }
 0x1e4   : > { %v3372_v18 = vsub.f32 0.0, %v7353_v0  ;;  %v3382_v40 = vmul.f32 1.442695, %v3349_v1  ;;  %v4414_v37 = vpop.eup %4413  ;;  %v3414_v27 = vmul.f32 1.442695, %v3365_v20  ;;  %v7363_v63 = vadd.f32 %v7319_v29, %v3293_v38 }
 0x1e5   : > { %v3197_v30 = vpack.c.bf16 %v3177_v60, %v3176_v25  ;;  %v2855_v3 = vadd.f32 %v2847_v32, %v2754_v46  ;;  %v2856_v2 = vadd.f32 %v2848_v41, %v2755_v51  ;;  %v3364_v11 = vsub.f32 0.0, %v7328_v39  ;;  %v4416_v45 = vpop.eup %4415 }
 0x1e6   : > { %v3444_v49 = vadd.f32 1.0, %v4414_v37  ;;  %v3452_v52 = vadd.f32 1.0, %v4416_v45  ;;  %v3428_v31 = vmul.f32 1.442695, %v3372_v18  ;;  %v3358_v60 = vsub.f32 0.0, %v7363_v63 }
 0x1e7   : > { %4226 = vmatmul.msk.bf16.gmra.mxu2 %vm388_vm1, %v3197_v30  ;;  %v2956_v62 = vadd.f32 %v2948_v48, %v2855_v3  ;;  %v2957_v15 = vadd.f32 %v2949_v56, %v2856_v2  ;;  %v3412_v58 = vmul.f32 1.442695, %v3364_v11  ;;  %v3273_v21 = vpop.f32.mrf.mxu0  ;;  %v3313_v9 = vpop.f32.mrf.mxu2 }
 0x1e8   : > { %v7360_v28 = vadd.f32 %v7319_v29, %v3273_v21  ;;  %v3330_v16 = vpop.f32.mrf.mxu3  ;;  %v7366_v12 = vadd.f32 %v7319_v29, %v3313_v9  ;;  %v3400_v22 = vmul.f32 1.442695, %v3358_v60 }
 0x1e9   : > { %v7337_v4 = vadd.f32 %v4652_v43, %v2956_v62  ;;  %v7339_v5 = vadd.f32 %v4652_v43, %v2957_v15  ;;  %4417 = vpow2.f32 %v3412_v58  ;;  %v7369_v25 = vadd.f32 %v7319_v29, %v3330_v16 }
 0x1ea   : > { %v3350_v48 = vsub.f32 0.0, %v7360_v28  ;;  %v3366_v46 = vsub.f32 0.0, %v7366_v12 }
 0x1eb   : > { %v3024_v33 = vsub.f32 0.0, %v7337_v4  ;;  %v3025_v14 = vsub.f32 0.0, %v7339_v5  ;;  %v3373_v51 = vsub.f32 0.0, %v7369_v25  ;;  %v3295_v43 = vpop.f32.mrf.mxu1 }
 0x1ec   : > { %v3384_v30 = vmul.f32 1.442695, %v3350_v48  ;;  %v3416_v47 = vmul.f32 1.442695, %v3366_v46 }
 0x1ed   : > { %v3086_v8 = vmul.f32 1.442695, %v3024_v33  ;;  %v3088_v35 = vmul.f32 1.442695, %v3025_v14  ;;  %v3430_v34 = vmul.f32 1.442695, %v3373_v51  ;;  %v7387_v33 = vadd.f32 %v7319_v29, %v3295_v43 }
 0x1ef   : > { %4419 = vpow2.f32 %v3086_v8  ;;  %v4418_v7 = vpop.eup %4417  ;;  %v3275_v11 = vpop.f32.mrf.mxu0  ;;  %v3359_v1 = vsub.f32 0.0, %v7387_v33 }
 0x1f0   : > { %4421 = vpow2.f32 %v3088_v35  ;;  %v3460_v55 = vadd.f32 1.0, %v4418_v7  ;;  %v7384_v58 = vadd.f32 %v7319_v29, %v3275_v11  ;;  %v3315_v14 = vpop.f32.mrf.mxu2  ;;  %v3333_v61 = vpop.f32.mrf.mxu3 }
 0x1f1   : > { %4423 = vpow2.f32 %v3382_v40  ;;  %v7393_v8 = vadd.f32 %v7319_v29, %v3315_v14 }
 0x1f2   : > { %4425 = vpow2.f32 %v3398_v36  ;;  %v3351_v23 = vsub.f32 0.0, %v7384_v58 }
 0x1f3   : > { %4427 = vrcp.f32 %v3444_v49  ;;  %v3367_v20 = vsub.f32 0.0, %v7393_v8  ;;  %v3402_v49 = vmul.f32 1.442695, %v3359_v1 }
 0x1f4   : > { %4429 = vrcp.f32 %v3452_v52  ;;  %v3386_v37 = vmul.f32 1.442695, %v3351_v23 }
 0x1f5   : > { %v4420_v54 = vpop.eup %4419  ;;  %4431 = vrcp.f32 %v3460_v55  ;;  %v3418_v21 = vmul.f32 1.442695, %v3367_v20 }
 0x1f6   : > { %v4422_v32 = vpop.eup %4421  ;;  %v3120_v41 = vadd.f32 1.0, %v4420_v54  ;;  %v3298_v54 = vpop.f32.mrf.mxu1 }
 0x1f7   : > { %v3121_v13 = vadd.f32 1.0, %v4422_v32  ;;  %v4424_v56 = vpop.eup %4423  ;;  %v3278_v38 = vpop.f32.mrf.mxu0  ;;  %v7417_v16 = vadd.f32 %v7319_v29, %v3298_v54 }
 0x1f8   : > { %4433 = vrcp.f32 %v3120_v41  ;;  %v4426_v59 = vpop.eup %4425  ;;  %v3445_v53 = vadd.f32 1.0, %v4424_v56  ;;  %v3335_v41 = vpop.f32.mrf.mxu3 }
 0x1f9   : > { %4435 = vrcp.f32 %v3121_v13  ;;  %v4428_v3 = vpop.eup %4427  ;;  %v3453_v2 = vadd.f32 1.0, %v4426_v59  ;;  %v7425_v60 = vadd.f32 %v7319_v29, %v3335_v41 }
 0x1fa   : > { %4437 = vpow2.f32 %v3414_v27  ;;  %v4430_v62 = vpop.eup %4429  ;;  %v3508_v15 = vmul.f32 %v4428_v3, %v7322_v50  ;;  %v3318_v32 = vpop.f32.mrf.mxu2 }
 0x1fb   : > { %4439 = vpow2.f32 %v3428_v31  ;;  %v4432_v6 = vpop.eup %4431  ;;  %v3516_v10 = vmul.f32 %v4430_v62, %v7325_v17  ;;  %v7396_v17 = vadd.f32 %v7319_v29, %v3333_v61  ;;  %v7422_v48 = vadd.f32 %v7319_v29, %v3318_v32 }
 0x1fc   : > { %4441 = vrcp.f32 %v3445_v53  ;;  %3541 = vst.msk [vmem:[%s7379_s18] sm:$0xff] %vm3540_vm3, %v3508_v15  ;;  %v3524_v24 = vmul.f32 %v4432_v6, %v7328_v39 }
 0x1fd   : > { %4443 = vrcp.f32 %v3453_v2  ;;  %3549 = vst.msk [vmem:[%s7379_s18 + $0x40] sm:$0xff] %vm3540_vm3, %v3516_v10  ;;  %v3368_v3 = vsub.f32 0.0, %v7422_v48 }
 0x1fe   : > { %v4434_v50 = vpop.eup %4433  ;;  %4445 = vpow2.f32 %v3384_v30  ;;  %3557 = vst.msk [vmem:[%s7379_s18 + $0x80] sm:$0xff] %vm3540_vm3, %v3524_v24  ;;  %v3360_v30 = vsub.f32 0.0, %v7417_v16 }
 0x1ff   : > { %v4436_v35 = vpop.eup %4435  ;;  %v3184_v44 = vmul.f32 %v4434_v50, %v7337_v4  ;;  %4447 = vpow2.f32 %v3400_v22  ;;  %v3420_v14 = vmul.f32 1.442695, %v3368_v3  ;;  %v3280_v61 = vpop.f32.mrf.mxu0 }
 0x200   : > { %v4438_v57 = vpop.eup %4437  ;;  %v3185_v39 = vmul.f32 %v4436_v35, %v7339_v5  ;;  %4449 = vpow2.f32 %v3416_v47  ;;  %v3374_v5 = vsub.f32 0.0, %v7396_v17  ;;  %v3375_v47 = vsub.f32 0.0, %v7425_v60  ;;  %v3300_v50 = vpop.f32.mrf.mxu1 }
 0x201   : > { %v4440_v18 = vpop.eup %4439  ;;  %v3461_v40 = vadd.f32 1.0, %v4438_v57  ;;  %4451 = vpow2.f32 %v3430_v34  ;;  %v3404_v10 = vmul.f32 1.442695, %v3360_v30  ;;  %v7438_v35 = vadd.f32 %v7319_v29, %v3280_v61 }
 0x202   : > { %v4442_v4 = vpop.eup %4441  ;;  %v3201_v36 = vpack.c.bf16 %v3185_v39, %v3184_v44  ;;  %v3468_v45 = vadd.f32 1.0, %v4440_v18  ;;  %v3432_v56 = vmul.f32 1.442695, %v3374_v5  ;;  %v3320_v44 = vpop.f32.mrf.mxu2  ;;  %v3434_v57 = vmul.f32 1.442695, %v3375_v47 }
 0x203   : > { %v4444_v7 = vpop.eup %4443  ;;  %v3509_v52 = vmul.f32 %v4442_v4, %v7344_v42  ;;  %4453 = vrcp.f32 %v3461_v40  ;;  %v7414_v42 = vadd.f32 %v7319_v29, %v3278_v38  ;;  %v7445_v39 = vadd.f32 %v7319_v29, %v3320_v44 }
 0x204   : > { %v4446_v27 = vpop.eup %4445  ;;  %4230 = vmatmul.msk.bf16.gmra.mxu3 %vm388_vm1, %v3201_v36  ;;  %v3517_v31 = vmul.f32 %v4444_v7, %v7347_v26  ;;  %4455 = vrcp.f32 %v3468_v45  ;;  %v3353_v40 = vsub.f32 0.0, %v7438_v35 }
 0x205   : > { %v4448_v55 = vpop.eup %4447  ;;  %3542 = vst.msk [vmem:[%s7379_s18 + $0x8] sm:$0xff] %vm3540_vm3, %v3509_v52  ;;  %v3446_v9 = vadd.f32 1.0, %v4446_v27  ;;  %4457 = vpow2.f32 %v3386_v37  ;;  %v3352_v59 = vsub.f32 0.0, %v7414_v42  ;;  %v3369_v36 = vsub.f32 0.0, %v7445_v39 }
 0x206   : > { %v4450_v13 = vpop.eup %4449  ;;  %3550 = vst.msk [vmem:[%s7379_s18 + $0x48] sm:$0xff] %vm3540_vm3, %v3517_v31  ;;  %v3454_v26 = vadd.f32 1.0, %v4448_v55  ;;  %4459 = vpow2.f32 %v3402_v49 }
 0x207   : > { %v4452_v46 = vpop.eup %4451  ;;  %4461 = vrcp.f32 %v3446_v9  ;;  %v3462_v51 = vadd.f32 1.0, %v4450_v13  ;;  %v3388_v22 = vmul.f32 1.442695, %v3352_v59  ;;  %v3422_v38 = vmul.f32 1.442695, %v3369_v36 }
 0x208   : > { %4463 = vrcp.f32 %v3454_v26  ;;  %v3469_v53 = vadd.f32 1.0, %v4452_v46 }
 0x209   : > { %v4454_v2 = vpop.eup %4453  ;;  %4465 = vrcp.f32 %v3462_v51 }
 0x20a   : > { %v4456_v62 = vpop.eup %4455  ;;  %v3525_v15 = vmul.f32 %v4454_v2, %v7350_v19  ;;  %4467 = vrcp.f32 %v3469_v53 }
 0x20b   : > { %v4458_v34 = vpop.eup %4457  ;;  %v3532_v11 = vmul.f32 %v4456_v62, %v7353_v0  ;;  %4469 = vpow2.f32 %v3418_v21  ;;  %v7441_v0 = vadd.f32 %v7319_v29, %v3300_v50 }
 0x20c   : > { %v4460_v43 = vpop.eup %4459  ;;  %3558 = vst.msk [vmem:[%s7379_s18 + $0x88] sm:$0xff] %vm3540_vm3, %v3525_v15  ;;  %v3447_v6 = vadd.f32 1.0, %v4458_v34  ;;  %4471 = vpow2.f32 %v3432_v56 }
 0x20d   : > { %v4462_v24 = vpop.eup %4461  ;;  %3565 = vst.msk [vmem:[%s7379_s18 + $0xc0] sm:$0xff] %vm3540_vm3, %v3532_v11  ;;  %v3455_v19 = vadd.f32 1.0, %v4460_v43  ;;  %4473 = vpow2.f32 %v3388_v22  ;;  %v3361_v37 = vsub.f32 0.0, %v7441_v0 }
 0x20e   : > { %v4464_v23 = vpop.eup %4463  ;;  %v3510_v1 = vmul.f32 %v4462_v24, %v7360_v28  ;;  %4475 = vrcp.f32 %v3447_v6 }
 0x20f   : > { %v4466_v20 = vpop.eup %4465  ;;  %v3518_v18 = vmul.f32 %v4464_v23, %v7363_v63  ;;  %4477 = vrcp.f32 %v3455_v19  ;;  %v3390_v63 = vmul.f32 1.442695, %v3353_v40 }
 0x210   : > { %v4468_v4 = vpop.eup %4467  ;;  %3543 = vst.msk [vmem:[%s7379_s18 + $0x10] sm:$0xff] %vm3540_vm3, %v3510_v1  ;;  %v3526_v28 = vmul.f32 %v4466_v20, %v7366_v12  ;;  %4479 = vpow2.f32 %v3404_v10  ;;  %v3406_v12 = vmul.f32 1.442695, %v3361_v37 }
 0x211   : > { %v4470_v45 = vpop.eup %4469  ;;  %3551 = vst.msk [vmem:[%s7379_s18 + $0x50] sm:$0xff] %vm3540_vm3, %v3518_v18  ;;  %v3533_v49 = vmul.f32 %v4468_v4, %v7369_v25  ;;  %4481 = vpow2.f32 %v3420_v14 }
 0x212   : > { %v4472_v7 = vpop.eup %4471  ;;  %3559 = vst.msk [vmem:[%s7379_s18 + $0x90] sm:$0xff] %vm3540_vm3, %v3526_v28  ;;  %v3463_v52 = vadd.f32 1.0, %v4470_v45  ;;  %4483 = vpow2.f32 %v3434_v57 }
 0x213   : > { %v4474_v5 = vpop.eup %4473  ;;  %3566 = vst.msk [vmem:[%s7379_s18 + $0xc8] sm:$0xff] %vm3540_vm3, %v3533_v49  ;;  %v3470_v27 = vadd.f32 1.0, %v4472_v7  ;;  %4485 = vpow2.f32 %v3390_v63 }
 0x214   : > { %v4476_v31 = vpop.eup %4475  ;;  %4487 = vrcp.f32 %v3463_v52  ;;  %v3448_v21 = vadd.f32 1.0, %v4474_v5 }
 0x215   : > { %v4478_v25 = vpop.eup %4477  ;;  %v3511_v54 = vmul.f32 %v4476_v31, %v7384_v58  ;;  %4489 = vrcp.f32 %v3470_v27 }
 0x216   : > { %v3338_v55 = vpop.f32.mrf.mxu3  ;;  %v4480_v9 = vpop.eup %4479  ;;  %v3519_v32 = vmul.f32 %v4478_v25, %v7387_v33  ;;  %4491 = vrcp.f32 %v3448_v21 }
 0x217   : > { %v3339_v41 = vadd.f32 %v7319_v29, %v3338_v55  ;;  %v4482_v13 = vpop.eup %4481  ;;  %3544 = vst.msk [vmem:[%s7379_s18 + $0x18] sm:$0xff] %vm3540_vm3, %v3511_v54  ;;  %v3456_v26 = vadd.f32 1.0, %v4480_v9  ;;  %4493 = vpow2.f32 %v3406_v12 }
 0x218   : > { %v4484_v46 = vpop.eup %4483  ;;  %3552 = vst.msk [vmem:[%s7379_s18 + $0x58] sm:$0xff] %vm3540_vm3, %v3519_v32  ;;  %v3464_v51 = vadd.f32 1.0, %v4482_v13  ;;  %4495 = vpow2.f32 %v3422_v38 }
 0x219   : > { %v3376_v58 = vsub.f32 0.0, %v3339_v41  ;;  %v4486_v56 = vpop.eup %4485  ;;  %4497 = vrcp.f32 %v3456_v26  ;;  %v3471_v59 = vadd.f32 1.0, %v4484_v46 }
 0x21a   : > { %v4488_v33 = vpop.eup %4487  ;;  %4499 = vrcp.f32 %v3464_v51  ;;  %v3449_v53 = vadd.f32 1.0, %v4486_v56 }
 0x21b   : > { %v3436_v30 = vmul.f32 1.442695, %v3376_v58  ;;  %v4490_v3 = vpop.eup %4489  ;;  %v3527_v2 = vmul.f32 %v4488_v33, %v7393_v8  ;;  %4501 = vrcp.f32 %v3471_v59 }
 0x21c   : > { %v4492_v22 = vpop.eup %4491  ;;  %v3534_v62 = vmul.f32 %v4490_v3, %v7396_v17  ;;  %4503 = vrcp.f32 %v3449_v53 }
 0x21d   : > { %v4494_v15 = vpop.eup %4493  ;;  %3560 = vst.msk [vmem:[%s7379_s18 + $0x98] sm:$0xff] %vm3540_vm3, %v3527_v2  ;;  %v3512_v47 = vmul.f32 %v4492_v22, %v7414_v42  ;;  %4505 = vpow2.f32 %v3436_v30 }
 0x21e   : > { %v4496_v34 = vpop.eup %4495  ;;  %3567 = vst.msk [vmem:[%s7379_s18 + $0xd0] sm:$0xff] %vm3540_vm3, %v3534_v62  ;;  %v3457_v11 = vadd.f32 1.0, %v4494_v15  ;;  %v3340_v52 = vpop.f32.mrf.mxu3 }
 0x21f   : > { %v4498_v43 = vpop.eup %4497  ;;  %3545 = vst.msk [vmem:[%s7379_s18 + $0x20] sm:$0xff] %vm3540_vm3, %v3512_v47  ;;  %v3465_v8 = vadd.f32 1.0, %v4496_v34  ;;  %v3341_v27 = vadd.f32 %v7319_v29, %v3340_v52 }
 0x220   : > { %v4500_v17 = vpop.eup %4499  ;;  %v3520_v6 = vmul.f32 %v4498_v43, %v7417_v16  ;;  %4507 = vrcp.f32 %v3457_v11 }
 0x221   : > { %v4502_v10 = vpop.eup %4501  ;;  %v3528_v14 = vmul.f32 %v4500_v17, %v7422_v48  ;;  %4509 = vrcp.f32 %v3465_v8  ;;  %v3377_v21 = vsub.f32 0.0, %v3341_v27 }
 0x222   : > { %v4504_v42 = vpop.eup %4503  ;;  %3553 = vst.msk [vmem:[%s7379_s18 + $0x60] sm:$0xff] %vm3540_vm3, %v3520_v6  ;;  %v3535_v61 = vmul.f32 %v4502_v10, %v7425_v60 }
 0x223   : > { %v4506_v50 = vpop.eup %4505  ;;  %3561 = vst.msk [vmem:[%s7379_s18 + $0xa0] sm:$0xff] %vm3540_vm3, %v3528_v14  ;;  %v3513_v24 = vmul.f32 %v4504_v42, %v7438_v35  ;;  %v3438_v54 = vmul.f32 1.442695, %v3377_v21 }
 0x224   : > { %3568 = vst.msk [vmem:[%s7379_s18 + $0xd8] sm:$0xff] %vm3540_vm3, %v3535_v61  ;;  %v3472_v16 = vadd.f32 1.0, %v4506_v50 }
 0x225   : > { %3546 = vst.msk [vmem:[%s7379_s18 + $0x28] sm:$0xff] %vm3540_vm3, %v3513_v24 }
 0x226   : > { %v4508_v48 = vpop.eup %4507  ;;  %4511 = vrcp.f32 %v3472_v16 }
 0x227   : > { %v4510_v19 = vpop.eup %4509  ;;  %v3521_v44 = vmul.f32 %v4508_v48, %v7441_v0 }
 0x228   : > { %v3529_v23 = vmul.f32 %v4510_v19, %v7445_v39 }
 0x229   : > { %3554 = vst.msk [vmem:[%s7379_s18 + $0x68] sm:$0xff] %vm3540_vm3, %v3521_v44 }
 0x22a   : > { %3562 = vst.msk [vmem:[%s7379_s18 + $0xa8] sm:$0xff] %vm3540_vm3, %v3529_v23 }
 0x22c   : > { %v4512_v60 = vpop.eup %4511  ;;  %v3283_v1 = vpop.f32.mrf.mxu0 }
 0x22d   : > { %v3536_v35 = vmul.f32 %v4512_v60, %v3339_v41  ;;  %v3284_v57 = vadd.f32 %v7319_v29, %v3283_v1 }
 0x22f   : > { %3569 = vst.msk [vmem:[%s7379_s18 + $0xe0] sm:$0xff] %vm3540_vm3, %v3536_v35  ;;  %v3354_v20 = vsub.f32 0.0, %v3284_v57 }
 0x231   : > { %v3392_v18 = vmul.f32 1.442695, %v3354_v20 }
 0x233   : > { %4513 = vpow2.f32 %v3392_v18 }
 0x234   : > { %v3285_v12 = vpop.f32.mrf.mxu0 }
 0x235   : > { %v3286_v38 = vadd.f32 %v7319_v29, %v3285_v12 }
 0x237   : > { %v3355_v55 = vsub.f32 0.0, %v3286_v38 }
 0x239   : > { %v4514_v40 = vpop.eup %4513  ;;  %v3394_v32 = vmul.f32 1.442695, %v3355_v55 }
 0x23a   : > { %v3450_v37 = vadd.f32 1.0, %v4514_v40 }
 0x23c   : > { %4515 = vrcp.f32 %v3450_v37 }
 0x242   : > { %v4516_v0 = vpop.eup %4515 }
 0x243   : > { %v3514_v39 = vmul.f32 %v4516_v0, %v3284_v57 }
 0x245   : > { %3547 = vst.msk [vmem:[%s7379_s18 + $0x30] sm:$0xff] %vm3540_vm3, %v3514_v39 }
 0x249   : > { %v3303_v4 = vpop.f32.mrf.mxu1 }
 0x24a   : > { %v3304_v28 = vadd.f32 %v7319_v29, %v3303_v4 }
 0x24c   : > { %v3362_v36 = vsub.f32 0.0, %v3304_v28 }
 0x24e   : > { %v3408_v45 = vmul.f32 1.442695, %v3362_v36 }
 0x250   : > { %4517 = vpow2.f32 %v3408_v45 }
 0x251   : > { %v3305_v31 = vpop.f32.mrf.mxu1 }
 0x252   : > { %v3306_v25 = vadd.f32 %v7319_v29, %v3305_v31 }
 0x254   : > { %v3363_v9 = vsub.f32 0.0, %v3306_v25 }
 0x256   : > { %v4518_v49 = vpop.eup %4517  ;;  %v3410_v41 = vmul.f32 1.442695, %v3363_v9 }
 0x257   : > { %v3458_v63 = vadd.f32 1.0, %v4518_v49 }
 0x259   : > { %4519 = vrcp.f32 %v3458_v63 }
 0x25a   : > { %4521 = vpow2.f32 %v3438_v54 }
 0x25b   : > { %4523 = vpow2.f32 %v3394_v32 }
 0x25c   : > { %4525 = vpow2.f32 %v3410_v41 }
 0x25f   : > { %v4520_v7 = vpop.eup %4519 }
 0x260   : > { %v3522_v5 = vmul.f32 %v4520_v7, %v3304_v28  ;;  %v4522_v46 = vpop.eup %4521 }
 0x261   : > { %v3473_v58 = vadd.f32 1.0, %v4522_v46  ;;  %v4524_v56 = vpop.eup %4523 }
 0x262   : > { %3555 = vst.msk [vmem:[%s7379_s18 + $0x70] sm:$0xff] %vm3540_vm3, %v3522_v5  ;;  %v4526_v59 = vpop.eup %4525  ;;  %v3451_v53 = vadd.f32 1.0, %v4524_v56 }
 0x263   : > { %4527 = vrcp.f32 %v3473_v58  ;;  %v3459_v30 = vadd.f32 1.0, %v4526_v59 }
 0x269   : > { %v4528_v22 = vpop.eup %4527 }
 0x26a   : > { %v3323_v13 = vpop.f32.mrf.mxu2  ;;  %v3537_v15 = vmul.f32 %v4528_v22, %v3341_v27 }
 0x26b   : > { %v3324_v26 = vadd.f32 %v7319_v29, %v3323_v13 }
 0x26c   : > { %3570 = vst.msk [vmem:[%s7379_s18 + $0xe8] sm:$0xff] %vm3540_vm3, %v3537_v15 }
 0x26d   : > { %v3370_v51 = vsub.f32 0.0, %v3324_v26 }
 0x26f   : > { %v3424_v33 = vmul.f32 1.442695, %v3370_v51 }
 0x271   : > { %4529 = vpow2.f32 %v3424_v33 }
 0x272   : > { %4531 = vrcp.f32 %v3451_v53  ;;  %v3325_v3 = vpop.f32.mrf.mxu2 }
 0x273   : > { %4533 = vrcp.f32 %v3459_v30  ;;  %v3326_v2 = vadd.f32 %v7319_v29, %v3325_v3 }
 0x275   : > { %v3371_v62 = vsub.f32 0.0, %v3326_v2 }
 0x277   : > { %v4530_v47 = vpop.eup %4529  ;;  %v3426_v34 = vmul.f32 1.442695, %v3371_v62 }
 0x278   : > { %v4532_v11 = vpop.eup %4531  ;;  %v3466_v43 = vadd.f32 1.0, %v4530_v47 }
 0x279   : > { %v4534_v8 = vpop.eup %4533  ;;  %v3515_v17 = vmul.f32 %v4532_v11, %v3286_v38  ;;  %4535 = vpow2.f32 %v3426_v34 }
 0x27a   : > { %4537 = vrcp.f32 %v3466_v43  ;;  %v3523_v6 = vmul.f32 %v4534_v8, %v3306_v25 }
 0x27b   : > { %3548 = vst.msk [vmem:[%s7379_s18 + $0x38] sm:$0xff] %vm3540_vm3, %v3515_v17 }
 0x27c   : > { %3556 = vst.msk [vmem:[%s7379_s18 + $0x78] sm:$0xff] %vm3540_vm3, %v3523_v6 }
 0x27f   : > { %v4536_v10 = vpop.eup %4535 }
 0x280   : > { %v4538_v14 = vpop.eup %4537  ;;  %v3467_v42 = vadd.f32 1.0, %v4536_v10 }
 0x281   : > { %v3530_v61 = vmul.f32 %v4538_v14, %v3324_v26 }
 0x282   : > { %4539 = vrcp.f32 %v3467_v42 }
 0x283   : > { %3563 = vst.msk [vmem:[%s7379_s18 + $0xb0] sm:$0xff] %vm3540_vm3, %v3530_v61 }
 0x287   : > { %v3343_v50 = vpop.f32.mrf.mxu3 }
 0x288   : > { %v4540_v24 = vpop.eup %4539  ;;  %v3344_v16 = vadd.f32 %v7319_v29, %v3343_v50 }
 0x289   : > { %v3531_v48 = vmul.f32 %v4540_v24, %v3326_v2 }
 0x28a   : > { %v3378_v19 = vsub.f32 0.0, %v3344_v16 }
 0x28b   : > { %3564 = vst.msk [vmem:[%s7379_s18 + $0xb8] sm:$0xff] %vm3540_vm3, %v3531_v48 }
 0x28c   : > { %v3440_v44 = vmul.f32 1.442695, %v3378_v19 }
 0x28e   : > { %4541 = vpow2.f32 %v3440_v44 }
 0x28f   : > { %v3345_v23 = vpop.f32.mrf.mxu3 }
 0x290   : > { %v3346_v60 = vadd.f32 %v7319_v29, %v3345_v23 }
 0x292   : > { %v3379_v1 = vsub.f32 0.0, %v3346_v60 }
 0x294   : > { %v4542_v35 = vpop.eup %4541  ;;  %v3442_v57 = vmul.f32 1.442695, %v3379_v1 }
 0x295   : > { %v3474_v20 = vadd.f32 1.0, %v4542_v35 }
 0x296   : > { %4543 = vpow2.f32 %v3442_v57 }
 0x297   : > { %4545 = vrcp.f32 %v3474_v20 }
 0x29c   : > { %v4544_v18 = vpop.eup %4543 }
 0x29d   : > { %v4546_v40 = vpop.eup %4545  ;;  %v3475_v37 = vadd.f32 1.0, %v4544_v18 }
 0x29e   : > { %v3538_v0 = vmul.f32 %v4546_v40, %v3344_v16 }
 0x29f   : > { %4547 = vrcp.f32 %v3475_v37 }
 0x2a0   : > { %3571 = vst.msk [vmem:[%s7379_s18 + $0xf0] sm:$0xff] %vm3540_vm3, %v3538_v0 }
 0x2a5   : > { %v4548_v39 = vpop.eup %4547 }
 0x2a6   : > { %v3539_v4 = vmul.f32 %v4548_v39, %v3346_v60 }
 0x2a8   : > { %3572 = vst.msk [vmem:[%s7379_s18 + $0xf8] sm:$0xff] %vm3540_vm3, %v3539_v4 }
 0x2a9 PF: > { %s16_s23 = sadd.s32 1, %s4675_s23   ;;  %s7644_s21 = smov %s4671_s22 }
 0x2aa   : > { %p13_p5 = scmp.ge.s32.totalorder %s16_s23, 4   ;;  %s7645_s22 = smov %s7647_s24 }
 0x2ac   :  { %15 = sbr.rel (!%p13_p5) target bundleno = 2 (0x2), region = 110 }

</bundles_post_ra>
